<compile_context>
chip_gen: v6e
topology: v6e:2x2x1
jax: 0.10.0
libtpu: 0.0.40
codegen_flags: <defaults>
</compile_context>

<pallas_src>
import jax
import jax.numpy as jnp
from jax.experimental import pallas as pl
from jax.experimental.pallas import tpu as pltpu

BN_EPS = 1e-5
COMPUTE_DTYPE = jnp.bfloat16


# ----------------------------------------------------------------------------
# BN folding / stride-phase split glue (plain JAX, ~1x input bytes, no im2col)
# ----------------------------------------------------------------------------
def fold_bn(bn):
    scale = bn["gamma"] / jnp.sqrt(bn["var"] + BN_EPS)
    bias = bn["beta"] - bn["mean"] * scale
    return scale, bias  # f32


def make_phases(x_nhwc, stride):
    """Zero-pad (conv pad=1) and split into stride-phases so every 3x3 tap is a
    unit-stride slice inside the kernel.  A 1-row margin is added at the top
    and bottom of every phase so the kernel can also read the conv2-halo
    (virtual conv1 output rows -1 and Ho) without out-of-bounds slicing; those
    halo rows are zeroed inside the kernel at the image border.
    Returns (N, s*s*PH, PW, C), (n, ho, wo), PH."""
    xp = jnp.pad(x_nhwc, ((0, 0), (1, 1), (1, 1), (0, 0)))
    n, hp, wp, c = xp.shape
    ho = (hp - 3) // stride + 1
    wo = (wp - 3) // stride + 1
    halo = 2 // stride                      # max tap offset inside a phase
    ph = ho + halo + 2                      # +1 margin row top and bottom
    pw = wo + halo
    phases = []
    for py in range(stride):
        for px in range(stride):
            p = xp[:, py::stride, px::stride, :][:, :ho + halo, :pw, :]
            p = jnp.pad(p, ((0, 0),
                            (1, ph - 1 - p.shape[1]),
                            (0, pw - p.shape[2]),
                            (0, 0)))
            phases.append(p)
    stacked = jnp.stack(phases, axis=1)     # (N, s*s, PH, PW, C)
    return stacked.reshape(n, stride * stride * ph, pw, c), (n, ho, wo), ph


def _pick_block_rows(ho, wo, target_rows=1024):
    """Largest Ho-divisor block height with block_rows*Wo <= target (M tile)."""
    best = 1
    for bh in range(1, ho + 1):
        if ho % bh == 0 and bh * wo <= target_rows:
            best = bh
    return best


# ----------------------------------------------------------------------------
# Single fused Pallas kernel for the whole BasicBlock
# ----------------------------------------------------------------------------
def fused_basic_block(phases, ph_rows, w1, b1, w2, b2, n, ho, wo,
                      cin, cmid, cout, *, stride, out_dtype,
                      proj=None, residual=None):
    """out = relu( conv3x3(relu(conv3x3_s(x)*bn1)*... ) * bn2 + shortcut ).

    phases  : (N, s*s*PH, PW, Cin) bf16 -- stride-phase-split padded input
    w1      : (9, Cin, Cmid)        bf16 -- bn1-scale-folded conv1 weights
    w2      : (9, Cmid, Cout)       bf16 -- bn2-scale-folded conv2 weights
    b1/b2   : (Cmid,)/(Cout,)       f32  -- folded BN biases
    proj    : optional (xs, ws, bs) fused 1x1-conv+BN projection shortcut
    residual: optional (N, Ho, Wo, Cout) identity shortcut (bf16)
    """
    bh = _pick_block_rows(ho, wo)
    grid = (n, ho // bh)
    pw = phases.shape[2]

    # tap (ky,kx) -> (phase index, row offset inside phase, col offset)
    taps1 = [((ky % stride) * stride + (kx % stride), ky // stride, kx // stride)
             for ky in range(3) for kx in range(3)]
    taps2 = [(ky, kx) for ky in range(3) for kx in range(3)]

    mode = "proj" if proj is not None else "res"

    def kernel(*refs):
        ph_ref, w1_ref, b1_ref, w2_ref, b2_ref = refs[:5]
        if mode == "proj":
            xs_ref, ws_ref, bs_ref, o_ref, h1_pad = refs[5:10]
        else:
            res_ref, o_ref, h1_pad = refs[5:8]

        j = pl.program_id(1)
        row0 = j * bh

        # -------- conv1 + bn1 + relu for bh+2 halo-extended output rows ------
        acc1 = jnp.zeros(((bh + 2) * wo, cmid), jnp.float32)
        for ti, (p, dy, dx) in enumerate(taps1):
            xt = ph_ref[pl.ds(p * ph_rows + row0 + dy, bh + 2),
                        pl.ds(dx, wo), :]
            xt = xt.reshape((bh + 2) * wo, cin)
            acc1 = acc1 + jnp.dot(xt, w1_ref[ti],
                                  preferred_element_type=jnp.float32)
        h1 = jnp.maximum(acc1 + b1_ref[...], 0.0).reshape(bh + 2, wo, cmid)

        # -------- stage h1 (with zero halo) in VMEM for conv2 ---------------
        zcol = jnp.zeros((bh + 2, 1, cmid), h1_pad.dtype)
        h1_pad[:, pl.ds(0, 1), :] = zcol
        h1_pad[:, pl.ds(wo + 1, 1), :] = zcol
        h1_pad[:, pl.ds(1, wo), :] = h1.astype(h1_pad.dtype)
        zrow = jnp.zeros((1, wo + 2, cmid), h1_pad.dtype)

        @pl.when(j == 0)                       # conv2 top zero-padding
        def _():
            h1_pad[pl.ds(0, 1), :, :] = zrow

        @pl.when(j == pl.num_programs(1) - 1)  # conv2 bottom zero-padding
        def _():
            h1_pad[pl.ds(bh + 1, 1), :, :] = zrow

        # -------- conv2 + bn2 directly from VMEM-resident h1 ----------------
        acc2 = jnp.zeros((bh * wo, cout), jnp.float32)
        for ti, (ky, kx) in enumerate(taps2):
            xt = h1_pad[pl.ds(ky, bh), pl.ds(kx, wo), :].reshape(bh * wo, cmid)
            acc2 = acc2 + jnp.dot(xt, w2_ref[ti],
                                  preferred_element_type=jnp.float32)
        out = acc2 + b2_ref[...]

        # -------- shortcut + relu -------------------------------------------
        if mode == "proj":      # fused 1x1 conv + BN projection shortcut
            sc = jnp.dot(xs_ref[...].reshape(bh * wo, cin), ws_ref[...],
                         preferred_element_type=jnp.float32)
            out = out + sc + bs_ref[...]
        else:                   # fused identity shortcut
            out = out + res_ref[...].reshape(bh * wo, cout).astype(jnp.float32)
        out = jnp.maximum(out, 0.0)
        o_ref[...] = out.reshape(bh, wo, cout).astype(o_ref.dtype)

    in_specs = [
        # full phase-split image: resident across the inner grid axis
        pl.BlockSpec((None, phases.shape[1], pw, cin), lambda i, j: (i, 0, 0, 0)),
        pl.BlockSpec((9, cin, cmid), lambda i, j: (0, 0, 0)),
        pl.BlockSpec((1, cmid), lambda i, j: (0, 0)),
        pl.BlockSpec((9, cmid, cout), lambda i, j: (0, 0, 0)),
        pl.BlockSpec((1, cout), lambda i, j: (0, 0)),
    ]
    args = [phases, w1, b1.reshape(1, cmid), w2, b2.reshape(1, cout)]
    if mode == "proj":
        xs, ws, bs = proj
        in_specs += [
            pl.BlockSpec((None, bh, wo, cin), lambda i, j: (i, j, 0, 0)),
            pl.BlockSpec((cin, cout), lambda i, j: (0, 0)),
            pl.BlockSpec((1, cout), lambda i, j: (0, 0)),
        ]
        args += [xs, ws, bs.reshape(1, cout)]
    else:
        in_specs += [pl.BlockSpec((None, bh, wo, cout), lambda i, j: (i, j, 0, 0))]
        args += [residual]

    return pl.pallas_call(
        kernel,
        out_shape=jax.ShapeDtypeStruct((n, ho, wo, cout), out_dtype),
        grid=grid,
        in_specs=in_specs,
        out_specs=pl.BlockSpec((None, bh, wo, cout), lambda i, j: (i, j, 0, 0)),
        scratch_shapes=[pltpu.VMEM((bh + 2, wo + 2, cmid), COMPUTE_DTYPE)],
        compiler_params=pltpu.CompilerParams(
            dimension_semantics=("parallel", "parallel"),
            vmem_limit_bytes=32 * 1024 * 1024,
        ),
    )(*args)


# ----------------------------------------------------------------------------
# BasicBlock forward (NCHW in / NCHW out, matching the PyTorch module)
# ----------------------------------------------------------------------------
def basic_block_forward(x_nchw, params, in_planes, planes, stride):
    x = jnp.transpose(x_nchw, (0, 2, 3, 1))                      # NHWC

    s1, b1 = fold_bn(params["bn1"])
    w1 = (params["w1"] * s1).astype(COMPUTE_DTYPE).reshape(9, in_planes, planes)
    s2, b2 = fold_bn(params["bn2"])
    w2 = (params["w2"] * s2).astype(COMPUTE_DTYPE).reshape(9, planes, planes)

    phases, (n, ho, wo), ph = make_phases(x.astype(COMPUTE_DTYPE), stride)

    if stride != 1 or in_planes != planes:
        ss, bs = fold_bn(params["bns"])
        ws = (params["ws"] * ss[None, :]).astype(COMPUTE_DTYPE)   # (Cin, Cout)
        xs = x[:, ::stride, ::stride, :].astype(COMPUTE_DTYPE)    # 1x1-conv input
        out = fused_basic_block(phases, ph, w1, b1, w2, b2, n, ho, wo,
                                in_planes, planes, planes, stride=stride,
                                out_dtype=x.dtype, proj=(xs, ws, bs))
    else:
        out = fused_basic_block(phases, ph, w1, b1, w2, b2, n, ho, wo,
                                in_planes, planes, planes, stride=stride,
                                out_dtype=x.dtype,
                                residual=x.astype(COMPUTE_DTYPE))
    return jnp.transpose(out, (0, 3, 1, 2))                       # NCHW


# ----------------------------------------------------------------------------
# Pure-JAX reference (lax conv, same bf16-operand / f32-accumulate recipe)
# ----------------------------------------------------------------------------
def _ref_conv(x_nhwc, w_hwio, stride, pad):
    return jax.lax.conv_general_dilated(
        x_nhwc, w_hwio, window_strides=(stride, stride),
        padding=((pad, pad), (pad, pad)),
        dimension_numbers=("NHWC", "HWIO", "NHWC"),
        preferred_element_type=jnp.float32)


def ref_forward(x_nchw, params, in_planes, planes, stride):
    x = jnp.transpose(x_nchw, (0, 2, 3, 1))
    s1, b1 = fold_bn(params["bn1"])
    w1 = (params["w1"] * s1).astype(COMPUTE_DTYPE)
    h1 = jax.nn.relu(_ref_conv(x.astype(COMPUTE_DTYPE), w1, stride, 1) + b1)
    h1 = h1.astype(COMPUTE_DTYPE)
    s2, b2 = fold_bn(params["bn2"])
    w2 = (params["w2"] * s2).astype(COMPUTE_DTYPE)
    out = _ref_conv(h1, w2, 1, 1) + b2
    if stride != 1 or in_planes != planes:
        ss, bs = fold_bn(params["bns"])
        ws = (params["ws"] * ss[None, :]).astype(COMPUTE_DTYPE)
        sc = _ref_conv(x.astype(COMPUTE_DTYPE),
                       ws.reshape(1, 1, in_planes, planes), stride, 0) + bs
    else:
        sc = x.astype(COMPUTE_DTYPE).astype(jnp.float32)
    return jnp.transpose(jax.nn.relu(out + sc), (0, 3, 1, 2)).astype(x_nchw.dtype)


# ----------------------------------------------------------------------------
# Deterministic parameters
# ----------------------------------------------------------------------------
def init_params(key, in_planes, planes, stride):
    ks = jax.random.split(key, 16)

    def bn_params(k, c):
        k1, k2, k3, k4 = jax.random.split(k, 4)
        return {
            "gamma": 1.0 + 0.1 * jax.random.normal(k1, (c,), jnp.float32),
            "beta": 0.1 * jax.random.normal(k2, (c,), jnp.float32),
            "mean": 0.1 * jax.random.normal(k3, (c,), jnp.float32),
            "var": 1.0 + 0.5 * jax.random.uniform(k4, (c,), jnp.float32),
        }

    params = {
        "w1": 0.1 * jax.random.normal(ks[0], (3, 3, in_planes, planes), jnp.float32),
        "bn1": bn_params(ks[1], planes),
        "w2": 0.1 * jax.random.normal(ks[2], (3, 3, planes, planes), jnp.float32),
        "bn2": bn_params(ks[3], planes),
    }
    if stride != 1 or in_planes != planes:
        params["ws"] = 0.1 * jax.random.normal(ks[4], (in_planes, planes), jnp.float32)
        params["bns"] = bn_params(ks[5], planes)
    return params


if __name__ == "__main__":
    fwd = jax.jit(basic_block_forward, static_argnums=(2, 3, 4))
    ref = jax.jit(ref_forward, static_argnums=(2, 3, 4))
    root = jax.random.PRNGKey(0)

    # Config 1: stride-2 downsample block (fused 1x1 projection shortcut).
    kx, kp = jax.random.split(jax.random.fold_in(root, 1))
    x = jax.random.normal(kx, (2, 4, 16, 16), jnp.float32)        # NCHW
    params = init_params(kp, 4, 8, 2)
    out = jax.block_until_ready(fwd(x, params, 4, 8, 2))
    ref_out = jax.block_until_ready(ref(x, params, 4, 8, 2))
    assert out.shape == (2, 8, 8, 8), out.shape
    assert jnp.allclose(out, ref_out, atol=2e-2, rtol=2e-2), \
        float(jnp.max(jnp.abs(out - ref_out)))

    # Config 2: stride-1 identity-shortcut block (fused residual add).
    kx, kp = jax.random.split(jax.random.fold_in(root, 2))
    x = jax.random.normal(kx, (2, 8, 16, 16), jnp.float32)
    params = init_params(kp, 8, 8, 1)
    out = jax.block_until_ready(fwd(x, params, 8, 8, 1))
    ref_out = jax.block_until_ready(ref(x, params, 8, 8, 1))
    assert out.shape == (2, 8, 16, 16), out.shape
    assert jnp.allclose(out, ref_out, atol=2e-2, rtol=2e-2), \
        float(jnp.max(jnp.abs(out - ref_out)))

    print("KERNEL_OK")
</pallas_src>

<mosaic_0001>
module attributes {stable_mosaic.version = 11 : i64} {
  func.func @kernel(%arg0: i32, %arg1: i32, %arg2: memref<1x44x9x4xbf16, #tpu.memory_space<vmem>>, %arg3: memref<9x4x8xbf16, #tpu.memory_space<vmem>>, %arg4: memref<1x8xf32, #tpu.memory_space<vmem>>, %arg5: memref<9x8x8xbf16, #tpu.memory_space<vmem>>, %arg6: memref<1x8xf32, #tpu.memory_space<vmem>>, %arg7: memref<1x8x8x4xbf16, #tpu.memory_space<vmem>>, %arg8: memref<4x8xbf16, #tpu.memory_space<vmem>>, %arg9: memref<1x8xf32, #tpu.memory_space<vmem>>, %arg10: memref<1x8x8x8xf32, #tpu.memory_space<vmem>>, %arg11: memref<10x10x8xbf16, #tpu.memory_space<vmem>>) attributes {dimension_semantics = [#tpu.dimension_semantics<parallel>, #tpu.dimension_semantics<parallel>], iteration_bounds = array<i64: 2, 1>, scalar_prefetch = 0 : i64, scratch_operands = 1 : i64, tpu.core_type = #tpu.core_type<tc>, window_params = [{transform_indices = @transform_0, window_bounds = array<i64: 1, 44, 9, 4>}, {pipeline_mode = #tpu.pipeline_mode<synchronous>, transform_indices = @transform_1, window_bounds = array<i64: 9, 4, 8>}, {pipeline_mode = #tpu.pipeline_mode<synchronous>, transform_indices = @transform_2, window_bounds = array<i64: 1, 8>}, {pipeline_mode = #tpu.pipeline_mode<synchronous>, transform_indices = @transform_3, window_bounds = array<i64: 9, 8, 8>}, {pipeline_mode = #tpu.pipeline_mode<synchronous>, transform_indices = @transform_4, window_bounds = array<i64: 1, 8>}, {transform_indices = @transform_5, window_bounds = array<i64: 1, 8, 8, 4>}, {pipeline_mode = #tpu.pipeline_mode<synchronous>, transform_indices = @transform_6, window_bounds = array<i64: 4, 8>}, {pipeline_mode = #tpu.pipeline_mode<synchronous>, transform_indices = @transform_7, window_bounds = array<i64: 1, 8>}, {transform_indices = @transform_8, window_bounds = array<i64: 1, 8, 8, 8>}]} {
    %c8_i32 = arith.constant 8 : i32
    %0 = arith.muli %arg1, %c8_i32 : i32
    %cst = arith.constant 0.000000e+00 : f32
    %1 = vector.broadcast %cst : f32 to vector<80x8xf32>
    %c0_i32 = arith.constant 0 : i32
    %2 = arith.addi %c0_i32, %0 : i32
    %c0_i32_0 = arith.constant 0 : i32
    %3 = arith.addi %2, %c0_i32_0 : i32
    %c0 = arith.constant 0 : index
    %4 = arith.index_cast %3 : i32 to index
    %c0_1 = arith.constant 0 : index
    %c0_2 = arith.constant 0 : index
    %5 = vector.load %arg2[%c0, %4, %c0_1, %c0_2] : memref<1x44x9x4xbf16, #tpu.memory_space<vmem>>, vector<1x10x8x4xbf16>
    %6 = vector.shape_cast %5 : vector<1x10x8x4xbf16> to vector<10x8x4xbf16>
    %7 = vector.shape_cast %6 : vector<10x8x4xbf16> to vector<80x4xbf16>
    %c0_3 = arith.constant 0 : index
    %c0_4 = arith.constant 0 : index
    %c0_5 = arith.constant 0 : index
    %8 = vector.load %arg3[%c0_3, %c0_4, %c0_5] : memref<9x4x8xbf16, #tpu.memory_space<vmem>>, vector<1x4x8xbf16>
    %9 = vector.shape_cast %8 : vector<1x4x8xbf16> to vector<4x8xbf16>
    %cst_6 = arith.constant dense<0.000000e+00> : vector<80x8xf32>
    %10 = tpu.matmul %7, %9, %cst_6 {dimension_numbers = #tpu.dot_dimension_numbers<[1], [0], [0], [1], [0, 0, 1, 1], [], []>} : vector<80x4xbf16>, vector<4x8xbf16>, vector<80x8xf32> -> vector<80x8xf32>
    %11 = arith.addf %1, %10 : vector<80x8xf32>
    %c11_i32 = arith.constant 11 : i32
    %12 = arith.addi %c11_i32, %0 : i32
    %c0_i32_7 = arith.constant 0 : i32
    %13 = arith.addi %12, %c0_i32_7 : i32
    %c0_8 = arith.constant 0 : index
    %14 = arith.index_cast %13 : i32 to index
    %c0_9 = arith.constant 0 : index
    %c0_10 = arith.constant 0 : index
    %15 = vector.load %arg2[%c0_8, %14, %c0_9, %c0_10] : memref<1x44x9x4xbf16, #tpu.memory_space<vmem>>, vector<1x10x8x4xbf16>
    %16 = vector.shape_cast %15 : vector<1x10x8x4xbf16> to vector<10x8x4xbf16>
    %17 = vector.shape_cast %16 : vector<10x8x4xbf16> to vector<80x4xbf16>
    %c1 = arith.constant 1 : index
    %c0_11 = arith.constant 0 : index
    %c0_12 = arith.constant 0 : index
    %18 = vector.load %arg3[%c1, %c0_11, %c0_12] : memref<9x4x8xbf16, #tpu.memory_space<vmem>>, vector<1x4x8xbf16>
    %19 = vector.shape_cast %18 : vector<1x4x8xbf16> to vector<4x8xbf16>
    %cst_13 = arith.constant dense<0.000000e+00> : vector<80x8xf32>
    %20 = tpu.matmul %17, %19, %cst_13 {dimension_numbers = #tpu.dot_dimension_numbers<[1], [0], [0], [1], [0, 0, 1, 1], [], []>} : vector<80x4xbf16>, vector<4x8xbf16>, vector<80x8xf32> -> vector<80x8xf32>
    %21 = arith.addf %11, %20 : vector<80x8xf32>
    %c0_i32_14 = arith.constant 0 : i32
    %22 = arith.addi %c0_i32_14, %0 : i32
    %c0_i32_15 = arith.constant 0 : i32
    %23 = arith.addi %22, %c0_i32_15 : i32
    %c0_16 = arith.constant 0 : index
    %24 = arith.index_cast %23 : i32 to index
    %c1_17 = arith.constant 1 : index
    %c0_18 = arith.constant 0 : index
    %25 = vector.load %arg2[%c0_16, %24, %c1_17, %c0_18] : memref<1x44x9x4xbf16, #tpu.memory_space<vmem>>, vector<1x10x8x4xbf16>
    %26 = vector.shape_cast %25 : vector<1x10x8x4xbf16> to vector<10x8x4xbf16>
    %27 = vector.shape_cast %26 : vector<10x8x4xbf16> to vector<80x4xbf16>
    %c2 = arith.constant 2 : index
    %c0_19 = arith.constant 0 : index
    %c0_20 = arith.constant 0 : index
    %28 = vector.load %arg3[%c2, %c0_19, %c0_20] : memref<9x4x8xbf16, #tpu.memory_space<vmem>>, vector<1x4x8xbf16>
    %29 = vector.shape_cast %28 : vector<1x4x8xbf16> to vector<4x8xbf16>
    %cst_21 = arith.constant dense<0.000000e+00> : vector<80x8xf32>
    %30 = tpu.matmul %27, %29, %cst_21 {dimension_numbers = #tpu.dot_dimension_numbers<[1], [0], [0], [1], [0, 0, 1, 1], [], []>} : vector<80x4xbf16>, vector<4x8xbf16>, vector<80x8xf32> -> vector<80x8xf32>
    %31 = arith.addf %21, %30 : vector<80x8xf32>
    %c22_i32 = arith.constant 22 : i32
    %32 = arith.addi %c22_i32, %0 : i32
    %c0_i32_22 = arith.constant 0 : i32
    %33 = arith.addi %32, %c0_i32_22 : i32
    %c0_23 = arith.constant 0 : index
    %34 = arith.index_cast %33 : i32 to index
    %c0_24 = arith.constant 0 : index
    %c0_25 = arith.constant 0 : index
    %35 = vector.load %arg2[%c0_23, %34, %c0_24, %c0_25] : memref<1x44x9x4xbf16, #tpu.memory_space<vmem>>, vector<1x10x8x4xbf16>
    %36 = vector.shape_cast %35 : vector<1x10x8x4xbf16> to vector<10x8x4xbf16>
    %37 = vector.shape_cast %36 : vector<10x8x4xbf16> to vector<80x4xbf16>
    %c3 = arith.constant 3 : index
    %c0_26 = arith.constant 0 : index
    %c0_27 = arith.constant 0 : index
    %38 = vector.load %arg3[%c3, %c0_26, %c0_27] : memref<9x4x8xbf16, #tpu.memory_space<vmem>>, vector<1x4x8xbf16>
    %39 = vector.shape_cast %38 : vector<1x4x8xbf16> to vector<4x8xbf16>
    %cst_28 = arith.constant dense<0.000000e+00> : vector<80x8xf32>
    %40 = tpu.matmul %37, %39, %cst_28 {dimension_numbers = #tpu.dot_dimension_numbers<[1], [0], [0], [1], [0, 0, 1, 1], [], []>} : vector<80x4xbf16>, vector<4x8xbf16>, vector<80x8xf32> -> vector<80x8xf32>
    %41 = arith.addf %31, %40 : vector<80x8xf32>
    %c33_i32 = arith.constant 33 : i32
    %42 = arith.addi %c33_i32, %0 : i32
    %c0_i32_29 = arith.constant 0 : i32
    %43 = arith.addi %42, %c0_i32_29 : i32
    %c0_30 = arith.constant 0 : index
    %44 = arith.index_cast %43 : i32 to index
    %c0_31 = arith.constant 0 : index
    %c0_32 = arith.constant 0 : index
    %45 = vector.load %arg2[%c0_30, %44, %c0_31, %c0_32] : memref<1x44x9x4xbf16, #tpu.memory_space<vmem>>, vector<1x10x8x4xbf16>
    %46 = vector.shape_cast %45 : vector<1x10x8x4xbf16> to vector<10x8x4xbf16>
    %47 = vector.shape_cast %46 : vector<10x8x4xbf16> to vector<80x4xbf16>
    %c4 = arith.constant 4 : index
    %c0_33 = arith.constant 0 : index
    %c0_34 = arith.constant 0 : index
    %48 = vector.load %arg3[%c4, %c0_33, %c0_34] : memref<9x4x8xbf16, #tpu.memory_space<vmem>>, vector<1x4x8xbf16>
    %49 = vector.shape_cast %48 : vector<1x4x8xbf16> to vector<4x8xbf16>
    %cst_35 = arith.constant dense<0.000000e+00> : vector<80x8xf32>
    %50 = tpu.matmul %47, %49, %cst_35 {dimension_numbers = #tpu.dot_dimension_numbers<[1], [0], [0], [1], [0, 0, 1, 1], [], []>} : vector<80x4xbf16>, vector<4x8xbf16>, vector<80x8xf32> -> vector<80x8xf32>
    %51 = arith.addf %41, %50 : vector<80x8xf32>
    %c22_i32_36 = arith.constant 22 : i32
    %52 = arith.addi %c22_i32_36, %0 : i32
    %c0_i32_37 = arith.constant 0 : i32
    %53 = arith.addi %52, %c0_i32_37 : i32
    %c0_38 = arith.constant 0 : index
    %54 = arith.index_cast %53 : i32 to index
    %c1_39 = arith.constant 1 : index
    %c0_40 = arith.constant 0 : index
    %55 = vector.load %arg2[%c0_38, %54, %c1_39, %c0_40] : memref<1x44x9x4xbf16, #tpu.memory_space<vmem>>, vector<1x10x8x4xbf16>
    %56 = vector.shape_cast %55 : vector<1x10x8x4xbf16> to vector<10x8x4xbf16>
    %57 = vector.shape_cast %56 : vector<10x8x4xbf16> to vector<80x4xbf16>
    %c5 = arith.constant 5 : index
    %c0_41 = arith.constant 0 : index
    %c0_42 = arith.constant 0 : index
    %58 = vector.load %arg3[%c5, %c0_41, %c0_42] : memref<9x4x8xbf16, #tpu.memory_space<vmem>>, vector<1x4x8xbf16>
    %59 = vector.shape_cast %58 : vector<1x4x8xbf16> to vector<4x8xbf16>
    %cst_43 = arith.constant dense<0.000000e+00> : vector<80x8xf32>
    %60 = tpu.matmul %57, %59, %cst_43 {dimension_numbers = #tpu.dot_dimension_numbers<[1], [0], [0], [1], [0, 0, 1, 1], [], []>} : vector<80x4xbf16>, vector<4x8xbf16>, vector<80x8xf32> -> vector<80x8xf32>
    %61 = arith.addf %51, %60 : vector<80x8xf32>
    %c0_i32_44 = arith.constant 0 : i32
    %62 = arith.addi %c0_i32_44, %0 : i32
    %c1_i32 = arith.constant 1 : i32
    %63 = arith.addi %62, %c1_i32 : i32
    %c0_45 = arith.constant 0 : index
    %64 = arith.index_cast %63 : i32 to index
    %c0_46 = arith.constant 0 : index
    %c0_47 = arith.constant 0 : index
    %65 = vector.load %arg2[%c0_45, %64, %c0_46, %c0_47] : memref<1x44x9x4xbf16, #tpu.memory_space<vmem>>, vector<1x10x8x4xbf16>
    %66 = vector.shape_cast %65 : vector<1x10x8x4xbf16> to vector<10x8x4xbf16>
    %67 = vector.shape_cast %66 : vector<10x8x4xbf16> to vector<80x4xbf16>
    %c6 = arith.constant 6 : index
    %c0_48 = arith.constant 0 : index
    %c0_49 = arith.constant 0 : index
    %68 = vector.load %arg3[%c6, %c0_48, %c0_49] : memref<9x4x8xbf16, #tpu.memory_space<vmem>>, vector<1x4x8xbf16>
    %69 = vector.shape_cast %68 : vector<1x4x8xbf16> to vector<4x8xbf16>
    %cst_50 = arith.constant dense<0.000000e+00> : vector<80x8xf32>
    %70 = tpu.matmul %67, %69, %cst_50 {dimension_numbers = #tpu.dot_dimension_numbers<[1], [0], [0], [1], [0, 0, 1, 1], [], []>} : vector<80x4xbf16>, vector<4x8xbf16>, vector<80x8xf32> -> vector<80x8xf32>
    %71 = arith.addf %61, %70 : vector<80x8xf32>
    %c11_i32_51 = arith.constant 11 : i32
    %72 = arith.addi %c11_i32_51, %0 : i32
    %c1_i32_52 = arith.constant 1 : i32
    %73 = arith.addi %72, %c1_i32_52 : i32
    %c0_53 = arith.constant 0 : index
    %74 = arith.index_cast %73 : i32 to index
    %c0_54 = arith.constant 0 : index
    %c0_55 = arith.constant 0 : index
    %75 = vector.load %arg2[%c0_53, %74, %c0_54, %c0_55] : memref<1x44x9x4xbf16, #tpu.memory_space<vmem>>, vector<1x10x8x4xbf16>
    %76 = vector.shape_cast %75 : vector<1x10x8x4xbf16> to vector<10x8x4xbf16>
    %77 = vector.shape_cast %76 : vector<10x8x4xbf16> to vector<80x4xbf16>
    %c7 = arith.constant 7 : index
    %c0_56 = arith.constant 0 : index
    %c0_57 = arith.constant 0 : index
    %78 = vector.load %arg3[%c7, %c0_56, %c0_57] : memref<9x4x8xbf16, #tpu.memory_space<vmem>>, vector<1x4x8xbf16>
    %79 = vector.shape_cast %78 : vector<1x4x8xbf16> to vector<4x8xbf16>
    %cst_58 = arith.constant dense<0.000000e+00> : vector<80x8xf32>
    %80 = tpu.matmul %77, %79, %cst_58 {dimension_numbers = #tpu.dot_dimension_numbers<[1], [0], [0], [1], [0, 0, 1, 1], [], []>} : vector<80x4xbf16>, vector<4x8xbf16>, vector<80x8xf32> -> vector<80x8xf32>
    %81 = arith.addf %71, %80 : vector<80x8xf32>
    %c0_i32_59 = arith.constant 0 : i32
    %82 = arith.addi %c0_i32_59, %0 : i32
    %c1_i32_60 = arith.constant 1 : i32
    %83 = arith.addi %82, %c1_i32_60 : i32
    %c0_61 = arith.constant 0 : index
    %84 = arith.index_cast %83 : i32 to index
    %c1_62 = arith.constant 1 : index
    %c0_63 = arith.constant 0 : index
    %85 = vector.load %arg2[%c0_61, %84, %c1_62, %c0_63] : memref<1x44x9x4xbf16, #tpu.memory_space<vmem>>, vector<1x10x8x4xbf16>
    %86 = vector.shape_cast %85 : vector<1x10x8x4xbf16> to vector<10x8x4xbf16>
    %87 = vector.shape_cast %86 : vector<10x8x4xbf16> to vector<80x4xbf16>
    %c8 = arith.constant 8 : index
    %c0_64 = arith.constant 0 : index
    %c0_65 = arith.constant 0 : index
    %88 = vector.load %arg3[%c8, %c0_64, %c0_65] : memref<9x4x8xbf16, #tpu.memory_space<vmem>>, vector<1x4x8xbf16>
    %89 = vector.shape_cast %88 : vector<1x4x8xbf16> to vector<4x8xbf16>
    %cst_66 = arith.constant dense<0.000000e+00> : vector<80x8xf32>
    %90 = tpu.matmul %87, %89, %cst_66 {dimension_numbers = #tpu.dot_dimension_numbers<[1], [0], [0], [1], [0, 0, 1, 1], [], []>} : vector<80x4xbf16>, vector<4x8xbf16>, vector<80x8xf32> -> vector<80x8xf32>
    %91 = arith.addf %81, %90 : vector<80x8xf32>
    %c0_67 = arith.constant 0 : index
    %c0_68 = arith.constant 0 : index
    %92 = vector.load %arg4[%c0_67, %c0_68] : memref<1x8xf32, #tpu.memory_space<vmem>>, vector<1x8xf32>
    %93 = vector.broadcast %92 : vector<1x8xf32> to vector<80x8xf32>
    %94 = arith.addf %91, %93 : vector<80x8xf32>
    %cst_69 = arith.constant 0.000000e+00 : f32
    %95 = vector.broadcast %cst_69 : f32 to vector<80x8xf32>
    %96 = arith.maximumf %94, %95 : vector<80x8xf32>
    %97 = vector.shape_cast %96 : vector<80x8xf32> to vector<10x8x8xf32>
    %cst_70 = arith.constant 0.000000e+00 : bf16
    %98 = vector.broadcast %cst_70 : bf16 to vector<10x1x8xbf16>
    %c0_71 = arith.constant 0 : index
    %c0_72 = arith.constant 0 : index
    %c0_73 = arith.constant 0 : index
    %99 = vector.load %arg11[%c0_71, %c0_72, %c0_73] : memref<10x10x8xbf16, #tpu.memory_space<vmem>>, vector<10x1x8xbf16>
    tpu.vector_store %arg11[%c0_71, %c0_72, %c0_73], %98 {strides = array<i32>} : memref<10x10x8xbf16, #tpu.memory_space<vmem>>, vector<10x1x8xbf16>,
    %c0_74 = arith.constant 0 : index
    %c9 = arith.constant 9 : index
    %c0_75 = arith.constant 0 : index
    %100 = vector.load %arg11[%c0_74, %c9, %c0_75] : memref<10x10x8xbf16, #tpu.memory_space<vmem>>, vector<10x1x8xbf16>
    tpu.vector_store %arg11[%c0_74, %c9, %c0_75], %98 {strides = array<i32>} : memref<10x10x8xbf16, #tpu.memory_space<vmem>>, vector<10x1x8xbf16>,
    %101 = arith.truncf %97 : vector<10x8x8xf32> to vector<10x8x8xbf16>
    %c0_76 = arith.constant 0 : index
    %c1_77 = arith.constant 1 : index
    %c0_78 = arith.constant 0 : index
    %102 = vector.load %arg11[%c0_76, %c1_77, %c0_78] : memref<10x10x8xbf16, #tpu.memory_space<vmem>>, vector<10x8x8xbf16>
    tpu.vector_store %arg11[%c0_76, %c1_77, %c0_78], %101 {strides = array<i32>} : memref<10x10x8xbf16, #tpu.memory_space<vmem>>, vector<10x8x8xbf16>,
    %cst_79 = arith.constant 0.000000e+00 : bf16
    %103 = vector.broadcast %cst_79 : bf16 to vector<1x10x8xbf16>
    %c0_i32_80 = arith.constant 0 : i32
    %104 = arith.cmpi eq, %arg1, %c0_i32_80 : i32
    %105 = arith.extui %104 : i1 to i32
    %c0_i32_81 = arith.constant 0 : i32
    %106 = arith.cmpi ne, %105, %c0_i32_81 : i32
    scf.if %106 {
      %c0_164 = arith.constant 0 : index
      %c0_165 = arith.constant 0 : index
      %c0_166 = arith.constant 0 : index
      %183 = vector.load %arg11[%c0_164, %c0_165, %c0_166] : memref<10x10x8xbf16, #tpu.memory_space<vmem>>, vector<1x10x8xbf16>
      tpu.vector_store %arg11[%c0_164, %c0_165, %c0_166], %103 {strides = array<i32>} : memref<10x10x8xbf16, #tpu.memory_space<vmem>>, vector<1x10x8xbf16>,
    } else {
    }
    %c0_i32_82 = arith.constant 0 : i32
    %107 = arith.cmpi eq, %arg1, %c0_i32_82 : i32
    %108 = arith.extui %107 : i1 to i32
    %c0_i32_83 = arith.constant 0 : i32
    %109 = arith.cmpi ne, %108, %c0_i32_83 : i32
    scf.if %109 {
      %c9_164 = arith.constant 9 : index
      %c0_165 = arith.constant 0 : index
      %c0_166 = arith.constant 0 : index
      %183 = vector.load %arg11[%c9_164, %c0_165, %c0_166] : memref<10x10x8xbf16, #tpu.memory_space<vmem>>, vector<1x10x8xbf16>
      tpu.vector_store %arg11[%c9_164, %c0_165, %c0_166], %103 {strides = array<i32>} : memref<10x10x8xbf16, #tpu.memory_space<vmem>>, vector<1x10x8xbf16>,
    } else {
    }
    %cst_84 = arith.constant 0.000000e+00 : f32
    %110 = vector.broadcast %cst_84 : f32 to vector<64x8xf32>
    %c0_85 = arith.constant 0 : index
    %c0_86 = arith.constant 0 : index
    %c0_87 = arith.constant 0 : index
    %111 = vector.load %arg11[%c0_85, %c0_86, %c0_87] : memref<10x10x8xbf16, #tpu.memory_space<vmem>>, vector<8x8x8xbf16>
    %112 = vector.shape_cast %111 : vector<8x8x8xbf16> to vector<64x8xbf16>
    %c0_88 = arith.constant 0 : index
    %c0_89 = arith.constant 0 : index
    %c0_90 = arith.constant 0 : index
    %113 = vector.load %arg5[%c0_88, %c0_89, %c0_90] : memref<9x8x8xbf16, #tpu.memory_space<vmem>>, vector<1x8x8xbf16>
    %114 = vector.shape_cast %113 : vector<1x8x8xbf16> to vector<8x8xbf16>
    %cst_91 = arith.constant dense<0.000000e+00> : vector<64x8xf32>
    %115 = tpu.matmul %112, %114, %cst_91 {dimension_numbers = #tpu.dot_dimension_numbers<[1], [0], [0], [1], [0, 0, 1, 1], [], []>} : vector<64x8xbf16>, vector<8x8xbf16>, vector<64x8xf32> -> vector<64x8xf32>
    %116 = arith.addf %110, %115 : vector<64x8xf32>
    %c0_92 = arith.constant 0 : index
    %c1_93 = arith.constant 1 : index
    %c0_94 = arith.constant 0 : index
    %117 = vector.load %arg11[%c0_92, %c1_93, %c0_94] : memref<10x10x8xbf16, #tpu.memory_space<vmem>>, vector<8x8x8xbf16>
    %118 = vector.shape_cast %117 : vector<8x8x8xbf16> to vector<64x8xbf16>
    %c1_95 = arith.constant 1 : index
    %c0_96 = arith.constant 0 : index
    %c0_97 = arith.constant 0 : index
    %119 = vector.load %arg5[%c1_95, %c0_96, %c0_97] : memref<9x8x8xbf16, #tpu.memory_space<vmem>>, vector<1x8x8xbf16>
    %120 = vector.shape_cast %119 : vector<1x8x8xbf16> to vector<8x8xbf16>
    %cst_98 = arith.constant dense<0.000000e+00> : vector<64x8xf32>
    %121 = tpu.matmul %118, %120, %cst_98 {dimension_numbers = #tpu.dot_dimension_numbers<[1], [0], [0], [1], [0, 0, 1, 1], [], []>} : vector<64x8xbf16>, vector<8x8xbf16>, vector<64x8xf32> -> vector<64x8xf32>
    %122 = arith.addf %116, %121 : vector<64x8xf32>
    %c0_99 = arith.constant 0 : index
    %c2_100 = arith.constant 2 : index
    %c0_101 = arith.constant 0 : index
    %123 = vector.load %arg11[%c0_99, %c2_100, %c0_101] : memref<10x10x8xbf16, #tpu.memory_space<vmem>>, vector<8x8x8xbf16>
    %124 = vector.shape_cast %123 : vector<8x8x8xbf16> to vector<64x8xbf16>
    %c2_102 = arith.constant 2 : index
    %c0_103 = arith.constant 0 : index
    %c0_104 = arith.constant 0 : index
    %125 = vector.load %arg5[%c2_102, %c0_103, %c0_104] : memref<9x8x8xbf16, #tpu.memory_space<vmem>>, vector<1x8x8xbf16>
    %126 = vector.shape_cast %125 : vector<1x8x8xbf16> to vector<8x8xbf16>
    %cst_105 = arith.constant dense<0.000000e+00> : vector<64x8xf32>
    %127 = tpu.matmul %124, %126, %cst_105 {dimension_numbers = #tpu.dot_dimension_numbers<[1], [0], [0], [1], [0, 0, 1, 1], [], []>} : vector<64x8xbf16>, vector<8x8xbf16>, vector<64x8xf32> -> vector<64x8xf32>
    %128 = arith.addf %122, %127 : vector<64x8xf32>
    %c1_106 = arith.constant 1 : index
    %c0_107 = arith.constant 0 : index
    %c0_108 = arith.constant 0 : index
    %129 = vector.load %arg11[%c1_106, %c0_107, %c0_108] : memref<10x10x8xbf16, #tpu.memory_space<vmem>>, vector<8x8x8xbf16>
    %130 = vector.shape_cast %129 : vector<8x8x8xbf16> to vector<64x8xbf16>
    %c3_109 = arith.constant 3 : index
    %c0_110 = arith.constant 0 : index
    %c0_111 = arith.constant 0 : index
    %131 = vector.load %arg5[%c3_109, %c0_110, %c0_111] : memref<9x8x8xbf16, #tpu.memory_space<vmem>>, vector<1x8x8xbf16>
    %132 = vector.shape_cast %131 : vector<1x8x8xbf16> to vector<8x8xbf16>
    %cst_112 = arith.constant dense<0.000000e+00> : vector<64x8xf32>
    %133 = tpu.matmul %130, %132, %cst_112 {dimension_numbers = #tpu.dot_dimension_numbers<[1], [0], [0], [1], [0, 0, 1, 1], [], []>} : vector<64x8xbf16>, vector<8x8xbf16>, vector<64x8xf32> -> vector<64x8xf32>
    %134 = arith.addf %128, %133 : vector<64x8xf32>
    %c1_113 = arith.constant 1 : index
    %c1_114 = arith.constant 1 : index
    %c0_115 = arith.constant 0 : index
    %135 = vector.load %arg11[%c1_113, %c1_114, %c0_115] : memref<10x10x8xbf16, #tpu.memory_space<vmem>>, vector<8x8x8xbf16>
    %136 = vector.shape_cast %135 : vector<8x8x8xbf16> to vector<64x8xbf16>
    %c4_116 = arith.constant 4 : index
    %c0_117 = arith.constant 0 : index
    %c0_118 = arith.constant 0 : index
    %137 = vector.load %arg5[%c4_116, %c0_117, %c0_118] : memref<9x8x8xbf16, #tpu.memory_space<vmem>>, vector<1x8x8xbf16>
    %138 = vector.shape_cast %137 : vector<1x8x8xbf16> to vector<8x8xbf16>
    %cst_119 = arith.constant dense<0.000000e+00> : vector<64x8xf32>
    %139 = tpu.matmul %136, %138, %cst_119 {dimension_numbers = #tpu.dot_dimension_numbers<[1], [0], [0], [1], [0, 0, 1, 1], [], []>} : vector<64x8xbf16>, vector<8x8xbf16>, vector<64x8xf32> -> vector<64x8xf32>
    %140 = arith.addf %134, %139 : vector<64x8xf32>
    %c1_120 = arith.constant 1 : index
    %c2_121 = arith.constant 2 : index
    %c0_122 = arith.constant 0 : index
    %141 = vector.load %arg11[%c1_120, %c2_121, %c0_122] : memref<10x10x8xbf16, #tpu.memory_space<vmem>>, vector<8x8x8xbf16>
    %142 = vector.shape_cast %141 : vector<8x8x8xbf16> to vector<64x8xbf16>
    %c5_123 = arith.constant 5 : index
    %c0_124 = arith.constant 0 : index
    %c0_125 = arith.constant 0 : index
    %143 = vector.load %arg5[%c5_123, %c0_124, %c0_125] : memref<9x8x8xbf16, #tpu.memory_space<vmem>>, vector<1x8x8xbf16>
    %144 = vector.shape_cast %143 : vector<1x8x8xbf16> to vector<8x8xbf16>
    %cst_126 = arith.constant dense<0.000000e+00> : vector<64x8xf32>
    %145 = tpu.matmul %142, %144, %cst_126 {dimension_numbers = #tpu.dot_dimension_numbers<[1], [0], [0], [1], [0, 0, 1, 1], [], []>} : vector<64x8xbf16>, vector<8x8xbf16>, vector<64x8xf32> -> vector<64x8xf32>
    %146 = arith.addf %140, %145 : vector<64x8xf32>
    %c2_127 = arith.constant 2 : index
    %c0_128 = arith.constant 0 : index
    %c0_129 = arith.constant 0 : index
    %147 = vector.load %arg11[%c2_127, %c0_128, %c0_129] : memref<10x10x8xbf16, #tpu.memory_space<vmem>>, vector<8x8x8xbf16>
    %148 = vector.shape_cast %147 : vector<8x8x8xbf16> to vector<64x8xbf16>
    %c6_130 = arith.constant 6 : index
    %c0_131 = arith.constant 0 : index
    %c0_132 = arith.constant 0 : index
    %149 = vector.load %arg5[%c6_130, %c0_131, %c0_132] : memref<9x8x8xbf16, #tpu.memory_space<vmem>>, vector<1x8x8xbf16>
    %150 = vector.shape_cast %149 : vector<1x8x8xbf16> to vector<8x8xbf16>
    %cst_133 = arith.constant dense<0.000000e+00> : vector<64x8xf32>
    %151 = tpu.matmul %148, %150, %cst_133 {dimension_numbers = #tpu.dot_dimension_numbers<[1], [0], [0], [1], [0, 0, 1, 1], [], []>} : vector<64x8xbf16>, vector<8x8xbf16>, vector<64x8xf32> -> vector<64x8xf32>
    %152 = arith.addf %146, %151 : vector<64x8xf32>
    %c2_134 = arith.constant 2 : index
    %c1_135 = arith.constant 1 : index
    %c0_136 = arith.constant 0 : index
    %153 = vector.load %arg11[%c2_134, %c1_135, %c0_136] : memref<10x10x8xbf16, #tpu.memory_space<vmem>>, vector<8x8x8xbf16>
    %154 = vector.shape_cast %153 : vector<8x8x8xbf16> to vector<64x8xbf16>
    %c7_137 = arith.constant 7 : index
    %c0_138 = arith.constant 0 : index
    %c0_139 = arith.constant 0 : index
    %155 = vector.load %arg5[%c7_137, %c0_138, %c0_139] : memref<9x8x8xbf16, #tpu.memory_space<vmem>>, vector<1x8x8xbf16>
    %156 = vector.shape_cast %155 : vector<1x8x8xbf16> to vector<8x8xbf16>
    %cst_140 = arith.constant dense<0.000000e+00> : vector<64x8xf32>
    %157 = tpu.matmul %154, %156, %cst_140 {dimension_numbers = #tpu.dot_dimension_numbers<[1], [0], [0], [1], [0, 0, 1, 1], [], []>} : vector<64x8xbf16>, vector<8x8xbf16>, vector<64x8xf32> -> vector<64x8xf32>
    %158 = arith.addf %152, %157 : vector<64x8xf32>
    %c2_141 = arith.constant 2 : index
    %c2_142 = arith.constant 2 : index
    %c0_143 = arith.constant 0 : index
    %159 = vector.load %arg11[%c2_141, %c2_142, %c0_143] : memref<10x10x8xbf16, #tpu.memory_space<vmem>>, vector<8x8x8xbf16>
    %160 = vector.shape_cast %159 : vector<8x8x8xbf16> to vector<64x8xbf16>
    %c8_144 = arith.constant 8 : index
    %c0_145 = arith.constant 0 : index
    %c0_146 = arith.constant 0 : index
    %161 = vector.load %arg5[%c8_144, %c0_145, %c0_146] : memref<9x8x8xbf16, #tpu.memory_space<vmem>>, vector<1x8x8xbf16>
    %162 = vector.shape_cast %161 : vector<1x8x8xbf16> to vector<8x8xbf16>
    %cst_147 = arith.constant dense<0.000000e+00> : vector<64x8xf32>
    %163 = tpu.matmul %160, %162, %cst_147 {dimension_numbers = #tpu.dot_dimension_numbers<[1], [0], [0], [1], [0, 0, 1, 1], [], []>} : vector<64x8xbf16>, vector<8x8xbf16>, vector<64x8xf32> -> vector<64x8xf32>
    %164 = arith.addf %158, %163 : vector<64x8xf32>
    %c0_148 = arith.constant 0 : index
    %c0_149 = arith.constant 0 : index
    %165 = vector.load %arg6[%c0_148, %c0_149] : memref<1x8xf32, #tpu.memory_space<vmem>>, vector<1x8xf32>
    %166 = vector.broadcast %165 : vector<1x8xf32> to vector<64x8xf32>
    %167 = arith.addf %164, %166 : vector<64x8xf32>
    %c0_150 = arith.constant 0 : index
    %c0_151 = arith.constant 0 : index
    %c0_152 = arith.constant 0 : index
    %c0_153 = arith.constant 0 : index
    %168 = vector.load %arg7[%c0_150, %c0_151, %c0_152, %c0_153] : memref<1x8x8x4xbf16, #tpu.memory_space<vmem>>, vector<1x8x8x4xbf16>
    %169 = vector.shape_cast %168 : vector<1x8x8x4xbf16> to vector<8x8x4xbf16>
    %170 = vector.shape_cast %169 : vector<8x8x4xbf16> to vector<64x4xbf16>
    %c0_154 = arith.constant 0 : index
    %c0_155 = arith.constant 0 : index
    %171 = vector.load %arg8[%c0_154, %c0_155] : memref<4x8xbf16, #tpu.memory_space<vmem>>, vector<4x8xbf16>
    %cst_156 = arith.constant dense<0.000000e+00> : vector<64x8xf32>
    %172 = tpu.matmul %170, %171, %cst_156 {dimension_numbers = #tpu.dot_dimension_numbers<[1], [0], [0], [1], [0, 0, 1, 1], [], []>} : vector<64x4xbf16>, vector<4x8xbf16>, vector<64x8xf32> -> vector<64x8xf32>
    %173 = arith.addf %167, %172 : vector<64x8xf32>
    %c0_157 = arith.constant 0 : index
    %c0_158 = arith.constant 0 : index
    %174 = vector.load %arg9[%c0_157, %c0_158] : memref<1x8xf32, #tpu.memory_space<vmem>>, vector<1x8xf32>
    %175 = vector.broadcast %174 : vector<1x8xf32> to vector<64x8xf32>
    %176 = arith.addf %173, %175 : vector<64x8xf32>
    %cst_159 = arith.constant 0.000000e+00 : f32
    %177 = vector.broadcast %cst_159 : f32 to vector<64x8xf32>
    %178 = arith.maximumf %176, %177 : vector<64x8xf32>
    %179 = vector.shape_cast %178 : vector<64x8xf32> to vector<8x8x8xf32>
    %c0_160 = arith.constant 0 : index
    %c0_161 = arith.constant 0 : index
    %c0_162 = arith.constant 0 : index
    %c0_163 = arith.constant 0 : index
    %180 = vector.load %arg10[%c0_160, %c0_161, %c0_162, %c0_163] : memref<1x8x8x8xf32, #tpu.memory_space<vmem>>, vector<1x8x8x8xf32>
    %181 = vector.shape_cast %180 : vector<1x8x8x8xf32> to vector<8x8x8xf32>
    %182 = vector.shape_cast %179 : vector<8x8x8xf32> to vector<1x8x8x8xf32>
    tpu.vector_store %arg10[%c0_160, %c0_161, %c0_162, %c0_163], %182 {strides = array<i32>} : memref<1x8x8x8xf32, #tpu.memory_space<vmem>>, vector<1x8x8x8xf32>,
    return
  }
  func.func @transform_0(%arg0: i32, %arg1: i32) -> (i32, i32, i32, i32) {
    %c0_i32 = arith.constant 0 : i32
    %c0_i32_0 = arith.constant 0 : i32
    %c0_i32_1 = arith.constant 0 : i32
    %c0_i32_2 = arith.constant 0 : i32
    return %arg0, %c0_i32, %c0_i32_0, %c0_i32_1 : i32, i32, i32, i32
  }
  func.func @transform_1(%arg0: i32, %arg1: i32) -> (i32, i32, i32) {
    %c0_i32 = arith.constant 0 : i32
    %c0_i32_0 = arith.constant 0 : i32
    %c0_i32_1 = arith.constant 0 : i32
    %c0_i32_2 = arith.constant 0 : i32
    return %c0_i32, %c0_i32_0, %c0_i32_1 : i32, i32, i32
  }
  func.func @transform_2(%arg0: i32, %arg1: i32) -> (i32, i32) {
    %c0_i32 = arith.constant 0 : i32
    %c0_i32_0 = arith.constant 0 : i32
    %c0_i32_1 = arith.constant 0 : i32
    return %c0_i32, %c0_i32_0 : i32, i32
  }
  func.func @transform_3(%arg0: i32, %arg1: i32) -> (i32, i32, i32) {
    %c0_i32 = arith.constant 0 : i32
    %c0_i32_0 = arith.constant 0 : i32
    %c0_i32_1 = arith.constant 0 : i32
    %c0_i32_2 = arith.constant 0 : i32
    return %c0_i32, %c0_i32_0, %c0_i32_1 : i32, i32, i32
  }
  func.func @transform_4(%arg0: i32, %arg1: i32) -> (i32, i32) {
    %c0_i32 = arith.constant 0 : i32
    %c0_i32_0 = arith.constant 0 : i32
    %c0_i32_1 = arith.constant 0 : i32
    return %c0_i32, %c0_i32_0 : i32, i32
  }
  func.func @transform_5(%arg0: i32, %arg1: i32) -> (i32, i32, i32, i32) {
    %c0_i32 = arith.constant 0 : i32
    %c0_i32_0 = arith.constant 0 : i32
    %c0_i32_1 = arith.constant 0 : i32
    return %arg0, %arg1, %c0_i32, %c0_i32_0 : i32, i32, i32, i32
  }
  func.func @transform_6(%arg0: i32, %arg1: i32) -> (i32, i32) {
    %c0_i32 = arith.constant 0 : i32
    %c0_i32_0 = arith.constant 0 : i32
    %c0_i32_1 = arith.constant 0 : i32
    return %c0_i32, %c0_i32_0 : i32, i32
  }
  func.func @transform_7(%arg0: i32, %arg1: i32) -> (i32, i32) {
    %c0_i32 = arith.constant 0 : i32
    %c0_i32_0 = arith.constant 0 : i32
    %c0_i32_1 = arith.constant 0 : i32
    return %c0_i32, %c0_i32_0 : i32, i32
  }
  func.func @transform_8(%arg0: i32, %arg1: i32) -> (i32, i32, i32, i32) {
    %c0_i32 = arith.constant 0 : i32
    %c0_i32_0 = arith.constant 0 : i32
    %c0_i32_1 = arith.constant 0 : i32
    return %arg0, %arg1, %c0_i32, %c0_i32_0 : i32, i32, i32, i32
  }
}

</mosaic_0001>

<bundles_post_ra>
// kernel: basic_block_forward.1
= control target key start
LH: loop header
LB: loop body
LE: loop exit
PB: predicated region body
PF: predicated region fallthrough
CT: control target
= control target key end

     0   :  { %s5020_s27 = smov 0   ;;  %s5022_s28 = smov 0   ;;  %s6151_s0 = inlined_call_operand.vmem [shape: bf16[2,44,9,4], index: 0, kind: input, shape index: {}]   ;;  %s6152_s1 = inlined_call_operand.vmem [shape: bf16[9,4,8], index: 1, kind: input, shape index: {}]   ;;  %s6153_s2 = inlined_call_operand.vmem [shape: f32[1,8], index: 2, kind: input, shape index: {}]   ;;  %s6154_s3 = inlined_call_operand.vmem [shape: bf16[9,8,8], index: 3, kind: input, shape index: {}]   ;;  %s6155_s4 = inlined_call_operand.vmem [shape: f32[1,8], index: 4, kind: input, shape index: {}]   ;;  %s6156_s5 = inlined_call_operand.vmem [shape: bf16[2,8,8,4], index: 5, kind: input, shape index: {}]   ;;  %s6157_s6 = inlined_call_operand.vmem [shape: bf16[4,8], index: 6, kind: input, shape index: {}]   ;;  %s6158_s7 = inlined_call_operand.vmem [shape: f32[1,8], index: 7, kind: input, shape index: {}]   ;;  %s6159_s8 = inlined_call_operand.vmem [shape: f32[2,8,8,8], index: 8, kind: output, shape index: {}]  }
   0x1   :  { %s5024_s29 = smov 0  }
   0x2 LB: > { %s30_s30 = sadd.s32 1, %s4966_s28  ;;  %p4129_p0 = scmp.ge.s32.totalorder %s4970_s29, 1  ;;  %s4970_s29 = sphi %s5024_s29, %s18_s29   ;;  %s4966_s28 = sphi %s5022_s28, %s6181_s28   ;;  %s4962_s27 = sphi %s5020_s27, %s6180_s27  }
   0x3   : > { %p32_p1 = scmp.ge.s32.totalorder %s30_s30, 2  ;;  %p293_p2 = scmp.lt.s32.totalorder %s4970_s29, 3 }
   0x5   : > { %s6183_s30 = smov (%p32_p1, %s30_s30), 0  ;;  %p294_p3 = pnand %p4129_p0, %p293_p2 }
   0x7   : > { %297 = sbr.rel (%p294_p3) target bundleno = 735 (0x2df), region = 52 }
   0xc   : > { %v4145_v0 = vld [vmem:[%s6152_s1 + $0x2] sm:$0x3]  ;;  %vm438_vm0 = vcmask 1041408   ;;  %v380_v1 = vld [vmem:[%s6152_s1] sm:$0x3]  ;;  %v4972_v2 = vmov 0.0  }
   0xd   : > { %4566 = vmatprep.subr.bf16.mxu0 %v4972_v2  ;;  %v440_v3 = vsel %vm438_vm0, %v4145_v0, 0  ;;  %4588 = vmatprep.subr.bf16.mxu1 %v4972_v2  ;;  %v556_v4 = vsel %vm438_vm0, %v380_v1, 0  ;;  %p340_p4 = scmp.lt.s32.totalorder %s4962_s27, 1  ;;  %vm4973_vm1 = vmmov 0   ;;  %v4166_v5 = vld [vmem:[%s6152_s1 + $0x4] sm:$0x3] }
   0xe   : > { %4567 = vmatpush3.bf16.msra.mxu0 %v440_v3  ;;  %4589 = vmatpush3.bf16.msra.mxu1 %v556_v4  ;;  %vm422_vm2 = vcmask 31744   ;;  %v827_v6 = vsel %vm438_vm0, %v4166_v5, 0  ;;  %v4187_v7 = vld [vmem:[%s6152_s1 + $0x6] sm:$0x3]  ;;  %vm651_vm3 = vsmask.f32 3328 }
   0xf   : > { %4568 = vmatprep.mubr.msk.bf16.mxu0 %vm4973_vm1, %v4972_v2  ;;  %4590 = vmatprep.mubr.msk.bf16.mxu1 %vm4973_vm1, %v4972_v2  ;;  %s6185_s27 = smov (!%p340_p4, %s4962_s27), 1  ;;  %v969_v10 = vsel %vm438_vm0, %v4187_v7, 0  ;;  %vm652_vm4 = vsmask.f32 7440  ;;  %v4208_v0 = vld [vmem:[%s6152_s1 + $0x8] sm:$0x3] }
  0x10   : > { %4610 = vmatprep.subr.bf16.mxu0 %v4972_v2  ;;  %4632 = vmatprep.subr.bf16.mxu1 %v4972_v2  ;;  %s4874_s15 = smul.u32 352, %s6185_s27  ;;  %vm5117_vm5 = vmor %vm651_vm3, %vm652_vm4  ;;  %v4239_v1 = vld [vmem:[%s6152_s1 + $0xa] sm:$0x3]  ;;  %vm2063_vm6 = vcmask 57344   ;;  %vm2064_vm7 = vsmask.f32 256 }
  0x11   : > { %vm5400_vm8 = vmand %vm2063_vm6, %vm2064_vm7  ;;  %vm2096_vm9 = vsmask.f32 7938  ;;  %vm2497_vm11 = vcmask 1043456   ;;  %vm2268_vm12 = vcmask 60416   ;;  %s4450_s23 = sshll.u32 %s6185_s27, 5  ;;  %vm2484_vm14 = vcmask 64512  }
  0x12   : > { %s5063_s18 = scalar_lea.vmem %s6151_s0, %s4874_s15  ;;  %vm5408_vm10 = vmand %vm2063_vm6, %vm2096_vm9  ;;  %s5566_s26 = scalar_lea.vmem %s6156_s5, %s4450_s23  ;;  %vm2690_vm15 = vcmask 1042432  }
  0x13   : > { %v4902_v8 = vld [vmem:[%s5063_s18 + $0x58] ss:$8 sps:$4 sm:$0xff]   ;;  %v4904_v11 = vld [vmem:[%s5063_s18 + $0x68] ss:$8 sps:$4 sm:$0xff]   ;;  %v632_v22 = vld [vmem:[%s5063_s18 + $0x4] sm:$0x1] }
  0x14   : > { %v4903_v9 = vld [vmem:[%s5063_s18] ss:$8 sps:$4 sm:$0xff]   ;;  %4569 = vmatmul.mubr.msk.bf16.vlgmr.msra.gmra.mxu0 %vm422_vm2, %v4902_v8  ;;  %v4905_v12 = vld [vmem:[%s5063_s18 + $0x10] ss:$8 sps:$4 sm:$0xff]   ;;  %v634_v23 = vld [vmem:[%s5063_s18 + $0xc] sm:$0x1] }
  0x15   : > { %4591 = vmatmul.mubr.msk.bf16.vlgmr.msra.gmra.mxu1 %vm422_vm2, %v4903_v9  ;;  %4611 = vmatpush3.bf16.msra.mxu0 %v827_v6  ;;  %v4906_v13 = vld [vmem:[%s5063_s18 + $0x78] ss:$8 sps:$4 sm:$0xff]   ;;  %v633_v16 = vld [vmem:[%s5063_s18 + $0x8] sm:$0xf]  ;;  %v635_v26 = vld [vmem:[%s5063_s18 + $0x10] sm:$0xf] }
  0x16   : > { %4572 = vmatprep.mubr.msk.bf16.mxu0 %vm4973_vm1, %v4972_v2  ;;  %4594 = vmatprep.mubr.msk.bf16.mxu1 %vm4973_vm1, %v4972_v2  ;;  %v631_v14 = vld [vmem:[%s5063_s18] sm:$0xf]  ;;  %v669_v19 = vshrl.u32 %v633_v16, 16  ;;  %v672_v20 = vshll.u32 %v633_v16, 16  ;;  %v4908_v21 = vld [vmem:[%s5063_s18 + $0x88] ss:$8 sps:$4 sm:$0xff]   ;;  %vm5572_vm13 = vmand %vm2268_vm12, %vm2096_vm9 }
  0x17   : > { %4633 = vmatpush3.bf16.msra.mxu1 %v969_v10  ;;  %4654 = vmatprep.subr.bf16.mxu0 %v4972_v2  ;;  %v4907_v15 = vld [vmem:[%s5063_s18 + $0x20] ss:$8 sps:$4 sm:$0xff]   ;;  %v655_v17 = vshrl.u32 %v631_v14, 16  ;;  %v658_v18 = vshll.u32 %v631_v14, 16  ;;  %v637_v29 = vld [vmem:[%s5063_s18 + $0x18] sm:$0xf] }
  0x18   : > { %4676 = vmatprep.subr.bf16.mxu1 %v4972_v2  ;;  %v671_v27 = vrot.slane %v669_v19, 4  ;;  %v674_v28 = vrot.slane %v672_v20, 5  ;;  %v4909_v30 = vld [vmem:[%s5063_s18 + $0x30] ss:$8 sps:$4 sm:$0xff]   ;;  %v683_v31 = vshrl.u32 %v635_v26, 16  ;;  %v686_v32 = vshll.u32 %v635_v26, 16 }
  0x19   : > { %v657_v24 = vrot.slane %v655_v17, 4  ;;  %v660_v25 = vrot.slane %v658_v18, 5  ;;  %v664_v33 = vshll.u32 %v632_v22, 16  ;;  %v678_v34 = vshll.u32 %v634_v23, 16  ;;  %v4910_v39 = vld [vmem:[%s5063_s18 + $0x98] ss:$8 sps:$4 sm:$0xff]  }
  0x1a   : > { %v697_v35 = vshrl.u32 %v637_v29, 16  ;;  %v700_v36 = vshll.u32 %v637_v29, 16  ;;  %v675_v38 = vor.u32 %v674_v28, %v671_v27  ;;  %v685_v40 = vrot.slane %v683_v31, 4  ;;  %v4911_v42 = vld [vmem:[%s5063_s18 + $0x40] ss:$8 sps:$4 sm:$0xff]   ;;  %s4451_s25 = sshll.u32 %s6185_s27, 6 }
  0x1b   : > { %v661_v37 = vor.u32 %v660_v25, %v657_v24  ;;  %v688_v41 = vrot.slane %v686_v32, 5  ;;  %v666_v43 = vrot.slane %v664_v33, 5  ;;  %v680_v44 = vrot.slane %v678_v34, 5  ;;  %v636_v45 = vld [vmem:[%s5063_s18 + $0x14] sm:$0x1]  ;;  %s6115_s27 = scalar_lea.vmem %s6159_s8, %s4451_s25 }
  0x1c   : > { %4573 = vmatmul.mubr.msk.bf16.gmra.mxu0 %vm422_vm2, %v4904_v11  ;;  %v699_v46 = vrot.slane %v697_v35, 4  ;;  %v702_v47 = vrot.slane %v700_v36, 5  ;;  %v676_v49 = vrot.slane %v675_v38, 4  ;;  %v638_v50 = vld [vmem:[%s5063_s18 + $0x1c] sm:$0x1]  ;;  %v692_v55 = vshll.u32 %v636_v45, 16 }
  0x1d   : > { %4595 = vmatmul.mubr.msk.bf16.gmra.mxu1 %vm422_vm2, %v4905_v12  ;;  %4576 = vmatprep.mubr.msk.bf16.mxu0 %vm4973_vm1, %v4972_v2  ;;  %v662_v48 = vrot.slane %v661_v37, 4  ;;  %v639_v51 = vld [vmem:[%s5063_s18 + $0x20] sm:$0xf]  ;;  %v641_v52 = vld [vmem:[%s5063_s18 + $0x28] sm:$0xf]  ;;  %v689_v54 = vor.u32 %v688_v41, %v685_v40  ;;  %v706_v57 = vshll.u32 %v638_v50, 16 }
  0x1e   : > { %4598 = vmatprep.mubr.msk.bf16.mxu1 %vm4973_vm1, %v4972_v2  ;;  %v703_v56 = vor.u32 %v702_v47, %v699_v46  ;;  %v711_v58 = vshrl.u32 %v639_v51, 16  ;;  %v714_v59 = vshll.u32 %v639_v51, 16  ;;  %v725_v60 = vshrl.u32 %v641_v52, 16  ;;  %v640_v5 = vld [vmem:[%s5063_s18 + $0x24] sm:$0x1] }
  0x1f   : > { %v728_v61 = vshll.u32 %v641_v52, 16  ;;  %v667_v62 = vsel %vm5117_vm5, %v662_v48, %v666_v43  ;;  %v681_v63 = vsel %vm5117_vm5, %v676_v49, %v680_v44  ;;  %v690_v3 = vrot.slane %v689_v54, 4  ;;  %v642_v6 = vld [vmem:[%s5063_s18 + $0x2c] sm:$0x1]  ;;  %v643_v14 = vld [vmem:[%s5063_s18 + $0x30] sm:$0xf] }
  0x20   : > { %v694_v4 = vrot.slane %v692_v55, 5  ;;  %v704_v7 = vrot.slane %v703_v56, 4  ;;  %v708_v8 = vrot.slane %v706_v57, 5  ;;  %v713_v9 = vrot.slane %v711_v58, 4  ;;  %v645_v16 = vld [vmem:[%s5063_s18 + $0x38] sm:$0xf] }
  0x21   : > { %v716_v10 = vrot.slane %v714_v59, 5  ;;  %v4167_v11 = vcombine.low %v667_v62, %v681_v63  ;;  %v727_v12 = vrot.slane %v725_v60, 4  ;;  %v1111_v17 = vsel %vm438_vm0, %v4208_v0, 0  ;;  %v4913_v32 = vld [vmem:[%s5063_s18 + $0xc0] ss:$8 sps:$4 sm:$0xff]  }
  0x22   : > { %v695_v18 = vsel %vm5117_vm5, %v690_v3, %v694_v4  ;;  %v720_v19 = vshll.u32 %v640_v5, 16  ;;  %v1389_v20 = vsel %vm438_vm0, %v4239_v1, 0  ;;  %v734_v23 = vshll.u32 %v642_v6, 16  ;;  %v644_v35 = vld [vmem:[%s5063_s18 + $0x34] sm:$0x1] }
  0x23   : > { %v717_v22 = vor.u32 %v716_v10, %v713_v9  ;;  %v739_v24 = vshrl.u32 %v643_v14, 16  ;;  %v742_v26 = vshll.u32 %v643_v14, 16  ;;  %v753_v27 = vshrl.u32 %v645_v16, 16  ;;  %v649_v37 = vld [vmem:[%s5063_s18 + $0x48] sm:$0xf] }
  0x24   : > { %4577 = vmatmul.mubr.msk.bf16.gmra.mxu0 %vm422_vm2, %v4906_v13  ;;  %v730_v13 = vrot.slane %v728_v61, 5  ;;  %v756_v28 = vshll.u32 %v645_v16, 16  ;;  %v722_v29 = vrot.slane %v720_v19, 5  ;;  %v736_v34 = vrot.slane %v734_v23, 5  ;;  %v648_v54 = vld [vmem:[%s5063_s18 + $0x44] sm:$0x1] }
  0x25   : > { %4599 = vmatmul.mubr.msk.bf16.gmra.mxu1 %vm422_vm2, %v4907_v15  ;;  %4580 = vmatprep.mubr.msk.bf16.mxu0 %vm4973_vm1, %v4972_v2  ;;  %v4912_v15 = vld [vmem:[%s5063_s18 + $0xb0] ss:$8 sps:$4 sm:$0xff]   ;;  %v718_v33 = vrot.slane %v717_v22, 4  ;;  %v741_v36 = vrot.slane %v739_v24, 4  ;;  %v744_v40 = vrot.slane %v742_v26, 5  ;;  %v755_v41 = vrot.slane %v753_v27, 4 }
  0x26   : > { %4602 = vmatprep.mubr.msk.bf16.mxu1 %vm4973_vm1, %v4972_v2  ;;  %v731_v25 = vor.u32 %v730_v13, %v727_v12  ;;  %v781_v45 = vshrl.u32 %v649_v37, 16  ;;  %v784_v46 = vshll.u32 %v649_v37, 16  ;;  %v748_v49 = vshll.u32 %v644_v35, 16  ;;  %v650_v55 = vld [vmem:[%s5063_s18 + $0x4c] sm:$0x1] }
  0x27   : > { %v723_v47 = vsel %vm5117_vm5, %v718_v33, %v722_v29  ;;  %v745_v51 = vor.u32 %v744_v40, %v741_v36  ;;  %v4219_v63 = vld [vmem:[%s5063_s18 + $0xb0] sm:$0xf]  ;;  %v4221_v0 = vld [vmem:[%s5063_s18 + $0xb8] sm:$0xf]  ;;  %v776_v5 = vshll.u32 %v648_v54, 16  ;;  %v790_v6 = vshll.u32 %v650_v55, 16 }
  0x28   : > { %v732_v38 = vrot.slane %v731_v25, 4  ;;  %v783_v58 = vrot.slane %v781_v45, 4  ;;  %v786_v59 = vrot.slane %v784_v46, 5  ;;  %v750_v61 = vrot.slane %v748_v49, 5  ;;  %v4914_v1 = vld [vmem:[%s5063_s18 + $0xd0] ss:$8 sps:$4 sm:$0xff]  }
  0x29   : > { %v746_v3 = vrot.slane %v745_v51, 4  ;;  %v1217_v9 = vshrl.u32 %v4219_v63, 16  ;;  %v1220_v10 = vshll.u32 %v4219_v63, 16  ;;  %v1234_v12 = vshll.u32 %v4221_v0, 16  ;;  %v4223_v27 = vld [vmem:[%s5063_s18 + $0xc0] sm:$0xf] }
  0x2a   : > { %v737_v48 = vsel %vm5117_vm5, %v732_v38, %v736_v34  ;;  %v792_v16 = vrot.slane %v790_v6, 5  ;;  %v1245_v33 = vshrl.u32 %v4223_v27, 16  ;;  %v1248_v34 = vshll.u32 %v4223_v27, 16  ;;  %v4226_v45 = vld [vmem:[%s5063_s18 + $0xcc] sm:$0x1] }
  0x2b   : > { %v4169_v60 = vcombine.low %v723_v47, %v737_v48  ;;  %v751_v13 = vsel %vm5117_vm5, %v746_v3, %v750_v61  ;;  %v1219_v22 = vrot.slane %v1217_v9, 4  ;;  %v1222_v23 = vrot.slane %v1220_v10, 5  ;;  %v4227_v51 = vld [vmem:[%s5063_s18 + $0xd0] sm:$0xf]  ;;  %v4228_v9 = vld [vmem:[%s5063_s18 + $0xd4] sm:$0x1] }
  0x2c   : > { %4581 = vmatmul.mubr.msk.bf16.gmra.mxu0 %vm422_vm2, %v4908_v21  ;;  %v709_v21 = vsel %vm5117_vm5, %v704_v7, %v708_v8  ;;  %v787_v8 = vor.u32 %v786_v59, %v783_v58  ;;  %v1236_v25 = vrot.slane %v1234_v12, 5  ;;  %v1247_v46 = vrot.slane %v1245_v33, 4  ;;  %v4230_v10 = vld [vmem:[%s5063_s18 + $0xdc] sm:$0x1]  ;;  %v4232_v33 = vld [vmem:[%s5063_s18 + $0xe4] sm:$0x1] }
  0x2d   : > { %4603 = vmatmul.mubr.msk.bf16.gmra.mxu1 %vm422_vm2, %v4909_v30  ;;  %4584 = vmatprep.mubr.msk.bf16.mxu0 %vm4973_vm1, %v4972_v2  ;;  %v647_v30 = vld [vmem:[%s5063_s18 + $0x40] sm:$0xf]  ;;  %v4168_v31 = vcombine.low %v695_v18, %v709_v21  ;;  %v1250_v47 = vrot.slane %v1248_v34, 5  ;;  %v1268_v55 = vshll.u32 %v4226_v45, 16  ;;  %v1276_v61 = vshll.u32 %v4227_v51, 16 }
  0x2e   : > { %4606 = vmatprep.mubr.msk.bf16.mxu1 %vm4973_vm1, %v4972_v2  ;;  %v767_v43 = vshrl.u32 %v647_v30, 16  ;;  %v770_v44 = vshll.u32 %v647_v30, 16  ;;  %v788_v19 = vrot.slane %v787_v8, 4  ;;  %v4915_v21 = vld [vmem:[%s5063_s18 + $0xe0] ss:$8 sps:$4 sm:$0xff]  }
  0x2f   : > { %v1251_v58 = vor.u32 %v1250_v47, %v1247_v46  ;;  %v1270_v8 = vrot.slane %v1268_v55, 5  ;;  %v1278_v12 = vrot.slane %v1276_v61, 5 }
  0x30   : > { %v769_v56 = vrot.slane %v767_v43, 4  ;;  %v772_v57 = vrot.slane %v770_v44, 5  ;;  %v793_v36 = vsel %vm5117_vm5, %v788_v19, %v792_v16  ;;  %v4224_v44 = vld [vmem:[%s5063_s18 + $0xc4] sm:$0x1]  ;;  %v4231_v16 = vld [vmem:[%s5063_s18 + $0xe0] sm:$0xf] }
  0x31   : > { %v1254_v54 = vshll.u32 %v4224_v44, 16  ;;  %v1252_v6 = vrot.slane %v1251_v58, 4 }
  0x32   : > { %v773_v7 = vor.u32 %v772_v57, %v769_v56 }
  0x33   : > { %v1256_v3 = vrot.slane %v1254_v54, 5  ;;  %v4919_v54 = vld [vmem:[%s5063_s18 + $0x128] ss:$8 sps:$4 sm:$0xff]  }
  0x34   : > { %4585 = vmatmul.mubr.msk.bf16.gmra.mxu0 %vm422_vm2, %v4910_v39  ;;  %v646_v39 = vld [vmem:[%s5063_s18 + $0x3c] sm:$0x1]  ;;  %v774_v18 = vrot.slane %v773_v7, 4 }
  0x35   : > { %4607 = vmatmul.mubr.msk.bf16.gmra.mxu1 %vm422_vm2, %v4911_v42  ;;  %4612 = vmatprep.mubr.msk.bf16.mxu0 %vm4973_vm1, %v4972_v2  ;;  %v758_v42 = vrot.slane %v756_v28, 5  ;;  %v762_v50 = vshll.u32 %v646_v39, 16  ;;  %v4225_v28 = vld [vmem:[%s5063_s18 + $0xc8] sm:$0xf]  ;;  %v1257_v19 = vsel %vm5117_vm5, %v1252_v6, %v1256_v3 }
  0x36   : > { %4634 = vmatprep.mubr.msk.bf16.mxu1 %vm4973_vm1, %v4972_v2  ;;  %v1259_v37 = vshrl.u32 %v4225_v28, 16  ;;  %v1262_v38 = vshll.u32 %v4225_v28, 16 }
  0x37   : > { %v759_v52 = vor.u32 %v758_v42, %v755_v41  ;;  %v764_v62 = vrot.slane %v762_v50, 5  ;;  %v4916_v50 = vld [vmem:[%s5063_s18 + $0xf0] ss:$8 sps:$4 sm:$0xff]  }
  0x38   : > { %v1261_v48 = vrot.slane %v1259_v37, 4  ;;  %v1264_v49 = vrot.slane %v1262_v38, 5 }
  0x39   : > { %v760_v4 = vrot.slane %v759_v52, 4  ;;  %v4229_v52 = vld [vmem:[%s5063_s18 + $0xd8] sm:$0xf] }
  0x3a   : > { %v1265_v59 = vor.u32 %v1264_v49, %v1261_v48  ;;  %v1290_v63 = vshll.u32 %v4229_v52, 16 }
  0x3b   : > { %v765_v14 = vsel %vm5117_vm5, %v760_v4, %v764_v62  ;;  %v1287_v62 = vshrl.u32 %v4229_v52, 16  ;;  %v4281_v4 = vld [vmem:[%s6152_s1 + $0xe] sm:$0x3] }
  0x3c   : > { %4613 = vmatmul.mubr.msk.bf16.vlgmr.msra.gmra.mxu0 %vm422_vm2, %v4167_v11  ;;  %v1231_v11 = vshrl.u32 %v4221_v0, 16  ;;  %v4170_v26 = vcombine.low %v751_v13, %v765_v14  ;;  %v4260_v0 = vld [vmem:[%s6152_s1 + $0xc] sm:$0x3]  ;;  %v1266_v7 = vrot.slane %v1265_v59, 4  ;;  %v1292_v14 = vrot.slane %v1290_v63, 5 }
  0x3d   : > { %4655 = vmatpush3.bf16.msra.mxu0 %v1111_v17  ;;  %4635 = vmatmul.mubr.msk.bf16.vlgmr.msra.gmra.mxu1 %vm422_vm2, %v4912_v15  ;;  %v778_v15 = vrot.slane %v776_v5, 5  ;;  %v4220_v17 = vld [vmem:[%s5063_s18 + $0xb4] sm:$0x1]  ;;  %v1289_v13 = vrot.slane %v1287_v62, 4  ;;  %v4238_v62 = vld [vmem:[%s5063_s18 + $0xfc] sm:$0x1] }
  0x3e   : > { %4616 = vmatprep.mubr.msk.bf16.mxu0 %vm4973_vm1, %v4972_v2  ;;  %4638 = vmatprep.mubr.msk.bf16.mxu1 %vm4973_vm1, %v4972_v2  ;;  %v1233_v24 = vrot.slane %v1231_v11, 4  ;;  %v1226_v29 = vshll.u32 %v4220_v17, 16  ;;  %v4233_v17 = vld [vmem:[%s5063_s18 + $0xe8] sm:$0xf]  ;;  %v4236_v59 = vld [vmem:[%s5063_s18 + $0xf4] sm:$0x1] }
  0x3f   : > { %4677 = vmatpush3.bf16.msra.mxu1 %v1389_v20  ;;  %4698 = vmatprep.subr.bf16.mxu0 %v4972_v2  ;;  %v4222_v20 = vld [vmem:[%s5063_s18 + $0xbc] sm:$0x1]  ;;  %v779_v35 = vsel %vm5117_vm5, %v774_v18, %v778_v15  ;;  %v1531_v15 = vsel %vm438_vm0, %v4260_v0, 0  ;;  %v1673_v18 = vsel %vm438_vm0, %v4281_v4, 0  ;;  %v1315_v27 = vshrl.u32 %v4233_v17, 16 }
  0x40   : > { %4720 = vmatprep.subr.bf16.mxu1 %v4972_v2  ;;  %v1240_v30 = vshll.u32 %v4222_v20, 16  ;;  %v1228_v39 = vrot.slane %v1226_v29, 5  ;;  %v4171_v41 = vcombine.low %v779_v35, %v793_v36  ;;  %v1271_v20 = vsel %vm5117_vm5, %v1266_v7, %v1270_v8  ;;  %v4918_v29 = vld [vmem:[%s5063_s18 + $0x118] ss:$8 sps:$4 sm:$0xff]   ;;  %v4234_v36 = vld [vmem:[%s5063_s18 + $0xec] sm:$0x1] }
  0x41   : > { %v1318_v28 = vshll.u32 %v4233_v17, 16  ;;  %v1324_v44 = vshll.u32 %v4234_v36, 16  ;;  %v1338_v3 = vshll.u32 %v4236_v59, 16  ;;  %v1352_v4 = vshll.u32 %v4238_v62, 16  ;;  %v4921_v17 = vld [vmem:[%s5063_s18 + $0x148] ss:$8 sps:$4 sm:$0xff]  }
  0x42   : > { %v1242_v40 = vrot.slane %v1240_v30, 5  ;;  %v4241_v30 = vcombine.low %v1257_v19, %v1271_v20  ;;  %v4312_v19 = vld [vmem:[%s6152_s1 + $0x10] sm:$0x3]  ;;  %v4296_v36 = vld [vmem:[%s5063_s18 + $0x18] sm:$0xf] }
  0x43   : > { %v1326_v58 = vrot.slane %v1324_v44, 5  ;;  %v4922_v20 = vld [vmem:[%s5063_s18 + $0x8] ss:$8 sps:$4 sm:$0xff]   ;;  %v1810_v44 = vshll.u32 %v4296_v36, 16  ;;  %v4299_v59 = vld [vmem:[%s5063_s18 + $0x24] sm:$0x1] }
  0x44   : > { %4617 = vmatmul.mubr.msk.bf16.gmra.mxu0 %vm422_vm2, %v4168_v31  ;;  %v1223_v31 = vor.u32 %v1222_v23, %v1219_v22  ;;  %v1296_v22 = vshll.u32 %v4230_v10, 16 }
  0x45   : > { %4639 = vmatmul.mubr.msk.bf16.gmra.mxu1 %vm422_vm2, %v4913_v32  ;;  %4620 = vmatprep.mubr.msk.bf16.mxu0 %vm4973_vm1, %v4972_v2  ;;  %v1237_v32 = vor.u32 %v1236_v25, %v1233_v24  ;;  %v1293_v24 = vor.u32 %v1292_v14, %v1289_v13  ;;  %v1301_v25 = vshrl.u32 %v4231_v16, 16  ;;  %v1354_v14 = vrot.slane %v1352_v4, 5 }
  0x46   : > { %4642 = vmatprep.mubr.msk.bf16.mxu1 %vm4973_vm1, %v4972_v2  ;;  %v1224_v42 = vrot.slane %v1223_v31, 4 }
  0x47   : > { %v1238_v43 = vrot.slane %v1237_v32, 4  ;;  %v1298_v32 = vrot.slane %v1296_v22, 5  ;;  %v1294_v35 = vrot.slane %v1293_v24, 4  ;;  %v1303_v37 = vrot.slane %v1301_v25, 4  ;;  %v4925_v24 = vld [vmem:[%s5063_s18 + $0x70] ss:$8 sps:$4 sm:$0xff]  }
  0x48   : > { %v1229_v56 = vsel %vm5117_vm5, %v1224_v42, %v1228_v39  ;;  %v1317_v39 = vrot.slane %v1315_v27, 4  ;;  %v4237_v42 = vld [vmem:[%s5063_s18 + $0xf8] sm:$0xf]  ;;  %v1951_v22 = vsel %vm438_vm0, %v4312_v19, 0  ;;  %v4926_v25 = vld [vmem:[%s5063_s18 + $0x28] ss:$8 sps:$4 sm:$0xff]  }
  0x49   : > { %v1243_v57 = vsel %vm5117_vm5, %v1238_v43, %v1242_v40  ;;  %v1320_v40 = vrot.slane %v1318_v28, 5  ;;  %v1310_v43 = vshll.u32 %v4232_v33, 16  ;;  %v1299_v46 = vsel %vm5117_vm5, %v1294_v35, %v1298_v32  ;;  %v4292_v27 = vld [vmem:[%s5063_s18 + $0x8] sm:$0xf]  ;;  %v4294_v28 = vld [vmem:[%s5063_s18 + $0x10] sm:$0xf] }
  0x4a   : > { %v4240_v5 = vcombine.low %v1229_v56, %v1243_v57  ;;  %v1346_v52 = vshll.u32 %v4237_v42, 16  ;;  %v1796_v32 = vshll.u32 %v4294_v28, 16  ;;  %v4928_v33 = vld [vmem:[%s5063_s18 + $0x38] ss:$8 sps:$4 sm:$0xff]  }
  0x4b   : > { %v1321_v49 = vor.u32 %v1320_v40, %v1317_v39  ;;  %v1312_v55 = vrot.slane %v1310_v43, 5  ;;  %v1807_v43 = vshrl.u32 %v4296_v36, 16 }
  0x4c   : > { %4621 = vmatmul.mubr.msk.bf16.gmra.mxu0 %vm422_vm2, %v4169_v60  ;;  %v1273_v60 = vshrl.u32 %v4227_v51, 16  ;;  %v1343_v51 = vshrl.u32 %v4237_v42, 16  ;;  %v1798_v40 = vrot.slane %v1796_v32, 5  ;;  %v4298_v42 = vld [vmem:[%s5063_s18 + $0x20] sm:$0xf] }
  0x4d   : > { %4643 = vmatmul.mubr.msk.bf16.gmra.mxu1 %vm422_vm2, %v4914_v1  ;;  %4624 = vmatprep.mubr.msk.bf16.mxu0 %vm4973_vm1, %v4972_v2  ;;  %v4917_v1 = vld [vmem:[%s5063_s18 + $0x108] ss:$8 sps:$4 sm:$0xff]   ;;  %v1322_v61 = vrot.slane %v1321_v49, 4  ;;  %v1821_v49 = vshrl.u32 %v4298_v42, 16 }
  0x4e   : > { %4646 = vmatprep.mubr.msk.bf16.mxu1 %vm4973_vm1, %v4972_v2  ;;  %v1275_v11 = vrot.slane %v1273_v60, 4  ;;  %v1345_v0 = vrot.slane %v1343_v51, 4  ;;  %v4930_v51 = vld [vmem:[%s5063_s18 + $0x48] ss:$8 sps:$4 sm:$0xff]  }
  0x4f   : > { %v1327_v6 = vsel %vm5117_vm5, %v1322_v61, %v1326_v58  ;;  %v4297_v58 = vld [vmem:[%s5063_s18 + $0x1c] sm:$0x1]  ;;  %v1823_v62 = vrot.slane %v1821_v49, 4 }
  0x50   : > { %v1279_v23 = vor.u32 %v1278_v12, %v1275_v11  ;;  %v1340_v12 = vrot.slane %v1338_v3, 5  ;;  %v1816_v4 = vshll.u32 %v4297_v58, 16 }
  0x52   : > { %v1280_v34 = vrot.slane %v1279_v23, 4  ;;  %v4924_v23 = vld [vmem:[%s5063_s18 + $0x18] ss:$8 sps:$4 sm:$0xff]  }
  0x54   : > { %4625 = vmatmul.mubr.msk.bf16.gmra.mxu0 %vm422_vm2, %v4170_v26  ;;  %v1304_v26 = vshll.u32 %v4231_v16, 16 }
  0x55   : > { %4647 = vmatmul.mubr.msk.bf16.gmra.mxu1 %vm422_vm2, %v4915_v21  ;;  %4628 = vmatprep.mubr.msk.bf16.mxu0 %vm4973_vm1, %v4972_v2  ;;  %v1282_v21 = vshll.u32 %v4228_v9, 16  ;;  %v4920_v9 = vld [vmem:[%s5063_s18 + $0x138] ss:$8 sps:$4 sm:$0xff]  }
  0x56   : > { %4650 = vmatprep.mubr.msk.bf16.mxu1 %vm4973_vm1, %v4972_v2  ;;  %v1306_v38 = vrot.slane %v1304_v26, 5  ;;  %v4927_v26 = vld [vmem:[%s5063_s18 + $0x80] ss:$8 sps:$4 sm:$0xff]  }
  0x57   : > { %v1284_v31 = vrot.slane %v1282_v21, 5  ;;  %v4923_v21 = vld [vmem:[%s5063_s18 + $0x60] ss:$8 sps:$4 sm:$0xff]  }
  0x58   : > { %v1307_v47 = vor.u32 %v1306_v38, %v1303_v37  ;;  %v4929_v37 = vld [vmem:[%s5063_s18 + $0x90] ss:$8 sps:$4 sm:$0xff]   ;;  %v4293_v38 = vld [vmem:[%s5063_s18 + $0xc] sm:$0x1] }
  0x59   : > { %v1285_v45 = vsel %vm5117_vm5, %v1280_v34, %v1284_v31  ;;  %v1793_v31 = vshrl.u32 %v4294_v28, 16 }
  0x5a   : > { %v4242_v56 = vcombine.low %v1285_v45, %v1299_v46  ;;  %v1308_v57 = vrot.slane %v1307_v47, 4  ;;  %v1788_v46 = vshll.u32 %v4293_v38, 16 }
  0x5b   : > { %v1795_v39 = vrot.slane %v1793_v31, 4 }
  0x5c   : > { %4629 = vmatmul.mubr.msk.bf16.gmra.mxu0 %vm422_vm2, %v4171_v41  ;;  %v4235_v41 = vld [vmem:[%s5063_s18 + $0xf0] sm:$0xf] }
  0x5d   : > { %4651 = vmatmul.mubr.msk.bf16.gmra.mxu1 %vm422_vm2, %v4916_v50  ;;  %4656 = vmatprep.mubr.msk.bf16.mxu0 %vm4973_vm1, %v4972_v2  ;;  %v1329_v48 = vshrl.u32 %v4235_v41, 16  ;;  %v1332_v50 = vshll.u32 %v4235_v41, 16  ;;  %v4295_v41 = vld [vmem:[%s5063_s18 + $0x14] sm:$0x1]  ;;  %v1799_v47 = vor.u32 %v1798_v40, %v1795_v39  ;;  %v4307_v40 = vld [vmem:[%s5063_s18 + $0x44] sm:$0x1] }
  0x5e   : > { %4678 = vmatprep.mubr.msk.bf16.mxu1 %vm4973_vm1, %v4972_v2 }
  0x5f   : > { %v1331_v60 = vrot.slane %v1329_v48, 4  ;;  %v1334_v63 = vrot.slane %v1332_v50, 5  ;;  %v1802_v48 = vshll.u32 %v4295_v41, 16  ;;  %v1824_v50 = vshll.u32 %v4298_v42, 16 }
  0x61   : > { %v1335_v7 = vor.u32 %v1334_v63, %v1331_v60  ;;  %v1800_v60 = vrot.slane %v1799_v47, 4  ;;  %v1804_v61 = vrot.slane %v1802_v48, 5  ;;  %v1826_v63 = vrot.slane %v1824_v50, 5  ;;  %v4308_v47 = vld [vmem:[%s5063_s18 + $0x48] sm:$0xf] }
  0x62   : > { %v4310_v48 = vld [vmem:[%s5063_s18 + $0x50] sm:$0xf]  ;;  %v1886_v50 = vshll.u32 %v4307_v40, 16 }
  0x63   : > { %v1336_v11 = vrot.slane %v1335_v7, 4  ;;  %v1905_v58 = vshrl.u32 %v4310_v48, 16 }
  0x64   : > { %4657 = vmatmul.mubr.msk.bf16.vlgmr.msra.gmra.mxu0 %vm422_vm2, %v4917_v1  ;;  %v1348_v1 = vrot.slane %v1346_v52, 5  ;;  %v4931_v52 = vld [vmem:[%s5063_s18 + $0xa0] ss:$8 sps:$4 sm:$0xff]  }
  0x65   : > { %4699 = vmatpush3.bf16.msra.mxu0 %v1531_v15  ;;  %4679 = vmatmul.mubr.msk.bf16.vlgmr.msra.gmra.mxu1 %vm422_vm2, %v4240_v5  ;;  %v1313_v5 = vsel %vm5117_vm5, %v1308_v57, %v1312_v55  ;;  %v1341_v15 = vsel %vm5117_vm5, %v1336_v11, %v1340_v12  ;;  %v1812_v55 = vrot.slane %v1810_v44, 5  ;;  %v1790_v57 = vrot.slane %v1788_v46, 5 }
  0x66   : > { %4660 = vmatprep.mubr.msk.bf16.mxu0 %vm4973_vm1, %v4972_v2  ;;  %4682 = vmatprep.mubr.msk.bf16.mxu1 %vm4973_vm1, %v4972_v2  ;;  %v1349_v8 = vor.u32 %v1348_v1, %v1345_v0  ;;  %v4243_v10 = vcombine.low %v1313_v5, %v1327_v6  ;;  %v4300_v0 = vld [vmem:[%s5063_s18 + $0x28] sm:$0xf]  ;;  %v4302_v1 = vld [vmem:[%s5063_s18 + $0x30] sm:$0xf]  ;;  %v1830_v6 = vshll.u32 %v4299_v59, 16  ;;  %v1908_v59 = vshll.u32 %v4310_v48, 16 }
  0x67   : > { %4721 = vmatpush3.bf16.msra.mxu1 %v1673_v18  ;;  %4742 = vmatprep.subr.bf16.mxu0 %v4972_v2  ;;  %v1835_v7 = vshrl.u32 %v4300_v0, 16  ;;  %v1849_v11 = vshrl.u32 %v4302_v1, 16  ;;  %v1852_v12 = vshll.u32 %v4302_v1, 16 }
  0x68   : > { %v1350_v13 = vrot.slane %v1349_v8, 4  ;;  %v1838_v8 = vshll.u32 %v4300_v0, 16 }
  0x6a   : > { %v1355_v16 = vsel %vm5117_vm5, %v1350_v13, %v1354_v14  ;;  %v1818_v14 = vrot.slane %v1816_v4, 5  ;;  %v1840_v19 = vrot.slane %v1838_v8, 5 }
  0x6b   : > { %v4244_v18 = vcombine.low %v1341_v15, %v1355_v16  ;;  %v4301_v16 = vld [vmem:[%s5063_s18 + $0x2c] sm:$0x1] }
  0x6c   : > { %4661 = vmatmul.mubr.msk.bf16.gmra.mxu0 %vm422_vm2, %v4918_v29  ;;  %v1779_v29 = vshrl.u32 %v4292_v27, 16 }
  0x6d   : > { %4683 = vmatmul.mubr.msk.bf16.gmra.mxu1 %vm422_vm2, %v4241_v30  ;;  %4664 = vmatprep.mubr.msk.bf16.mxu0 %vm4973_vm1, %v4972_v2  ;;  %v1782_v30 = vshll.u32 %v4292_v27, 16  ;;  %v1844_v27 = vshll.u32 %v4301_v16, 16 }
  0x6e   : > { %4686 = vmatprep.mubr.msk.bf16.mxu1 %vm4973_vm1, %v4972_v2  ;;  %v1781_v34 = vrot.slane %v1779_v29, 4 }
  0x6f   : > { %v1784_v35 = vrot.slane %v1782_v30, 5  ;;  %v1846_v36 = vrot.slane %v1844_v27, 5 }
  0x71   : > { %v1785_v45 = vor.u32 %v1784_v35, %v1781_v34 }
  0x74   : > { %4665 = vmatmul.mubr.msk.bf16.gmra.mxu0 %vm422_vm2, %v4919_v54  ;;  %v1809_v54 = vrot.slane %v1807_v43, 4 }
  0x75   : > { %4687 = vmatmul.mubr.msk.bf16.gmra.mxu1 %vm422_vm2, %v4242_v56  ;;  %4668 = vmatprep.mubr.msk.bf16.mxu0 %vm4973_vm1, %v4972_v2  ;;  %v1786_v56 = vrot.slane %v1785_v45, 4 }
  0x76   : > { %4690 = vmatprep.mubr.msk.bf16.mxu1 %vm4973_vm1, %v4972_v2  ;;  %v1813_v3 = vor.u32 %v1812_v55, %v1809_v54  ;;  %v1891_v54 = vshrl.u32 %v4308_v47, 16  ;;  %v1894_v55 = vshll.u32 %v4308_v47, 16 }
  0x77   : > { %v1791_v5 = vsel %vm5117_vm5, %v1786_v56, %v1790_v57 }
  0x78   : > { %v1814_v13 = vrot.slane %v1813_v3, 4  ;;  %v1893_v0 = vrot.slane %v1891_v54, 4  ;;  %v4309_v3 = vld [vmem:[%s5063_s18 + $0x4c] sm:$0x1]  ;;  %v1896_v4 = vrot.slane %v1894_v55, 5 }
  0x7c   : > { %4669 = vmatmul.mubr.msk.bf16.gmra.mxu0 %vm422_vm2, %v4920_v9  ;;  %v1805_v9 = vsel %vm5117_vm5, %v1800_v60, %v1804_v61 }
  0x7d   : > { %4691 = vmatmul.mubr.msk.bf16.gmra.mxu1 %vm422_vm2, %v4243_v10  ;;  %4672 = vmatprep.mubr.msk.bf16.mxu0 %vm4973_vm1, %v4972_v2  ;;  %v1827_v10 = vor.u32 %v1826_v63, %v1823_v62  ;;  %v4313_v15 = vcombine.low %v1791_v5, %v1805_v9  ;;  %v1888_v63 = vrot.slane %v1886_v50, 5  ;;  %v1907_v5 = vrot.slane %v1905_v58, 4 }
  0x7e   : > { %4694 = vmatprep.mubr.msk.bf16.mxu1 %vm4973_vm1, %v4972_v2  ;;  %v1900_v9 = vshll.u32 %v4309_v3, 16 }
  0x80   : > { %v1902_v16 = vrot.slane %v1900_v9, 5 }
  0x84   : > { %4673 = vmatmul.mubr.msk.bf16.gmra.mxu0 %vm422_vm2, %v4921_v17  ;;  %v4303_v17 = vld [vmem:[%s5063_s18 + $0x34] sm:$0x1] }
  0x85   : > { %4695 = vmatmul.mubr.msk.bf16.gmra.mxu1 %vm422_vm2, %v4244_v18  ;;  %4700 = vmatprep.mubr.msk.bf16.mxu0 %vm4973_vm1, %v4972_v2  ;;  %v1837_v18 = vrot.slane %v1835_v7, 4  ;;  %v1858_v29 = vshll.u32 %v4303_v17, 16  ;;  %v4311_v7 = vld [vmem:[%s5063_s18 + $0x54] sm:$0x1] }
  0x86   : > { %4722 = vmatprep.mubr.msk.bf16.mxu1 %vm4973_vm1, %v4972_v2 }
  0x87   : > { %v1841_v28 = vor.u32 %v1840_v19, %v1837_v18  ;;  %v1860_v44 = vrot.slane %v1858_v29, 5 }
  0x89   : > { %v1842_v39 = vrot.slane %v1841_v28, 4 }
  0x8c   : > { %4701 = vmatmul.mubr.msk.bf16.vlgmr.msra.gmra.mxu0 %vm422_vm2, %v4922_v20  ;;  %v1828_v20 = vrot.slane %v1827_v10, 4 }
  0x8d   : > { %4743 = vmatpush3.bf16.msra.mxu0 %v1951_v22  ;;  %4723 = vmatmul.mubr.msk.bf16.vlgmr.msra.gmra.mxu1 %vm422_vm2, %v4923_v21  ;;  %v1832_v21 = vrot.slane %v1830_v6, 5  ;;  %v1851_v22 = vrot.slane %v1849_v11, 4  ;;  %v1910_v6 = vrot.slane %v1908_v59, 5  ;;  %v1897_v11 = vor.u32 %v1896_v4, %v1893_v0 }
  0x8e   : > { %4704 = vmatprep.mubr.msk.bf16.mxu0 %vm4973_vm1, %v4972_v2  ;;  %4726 = vmatprep.mubr.msk.bf16.mxu1 %vm4973_vm1, %v4972_v2 }
  0x8f   : > { %v1833_v32 = vsel %vm5117_vm5, %v1828_v20, %v1832_v21 }
  0x94   : > { %4705 = vmatmul.mubr.msk.bf16.gmra.mxu0 %vm422_vm2, %v4924_v23  ;;  %v1854_v23 = vrot.slane %v1852_v12, 5  ;;  %v1911_v12 = vor.u32 %v1910_v6, %v1907_v5  ;;  %v2066_v6 = vld [vmem:[#allocation2] sm:$0x1] }
  0x95   : > { %4727 = vmatmul.mubr.msk.bf16.gmra.mxu1 %vm422_vm2, %v4925_v24  ;;  %4708 = vmatprep.mubr.msk.bf16.mxu0 %vm4973_vm1, %v4972_v2  ;;  %v4304_v24 = vld [vmem:[%s5063_s18 + $0x38] sm:$0xf] }
  0x96   : > { %4730 = vmatprep.mubr.msk.bf16.mxu1 %vm4973_vm1, %v4972_v2  ;;  %v1863_v30 = vshrl.u32 %v4304_v24, 16  ;;  %v1866_v31 = vshll.u32 %v4304_v24, 16  ;;  %v1912_v17 = vrot.slane %v1911_v12, 4  ;;  %v2067_v12 = vsel %vm5400_vm8, 0, %v2066_v6 }
  0x97   : > { %2068 = vst [vmem:[#allocation2] sm:$0x1] %v2067_v12 }
  0x98   : > { %v1865_v41 = vrot.slane %v1863_v30, 4  ;;  %v1868_v42 = vrot.slane %v1866_v31, 5 }
  0x9c   : > { %4709 = vmatmul.mubr.msk.bf16.gmra.mxu0 %vm422_vm2, %v4926_v25  ;;  %v4306_v25 = vld [vmem:[%s5063_s18 + $0x40] sm:$0xf] }
  0x9d   : > { %4731 = vmatmul.mubr.msk.bf16.gmra.mxu1 %vm422_vm2, %v4927_v26  ;;  %4712 = vmatprep.mubr.msk.bf16.mxu0 %vm4973_vm1, %v4972_v2  ;;  %v1819_v26 = vsel %vm5117_vm5, %v1814_v13, %v1818_v14  ;;  %v1877_v34 = vshrl.u32 %v4306_v25, 16  ;;  %v1880_v35 = vshll.u32 %v4306_v25, 16  ;;  %v1914_v13 = vshll.u32 %v4311_v7, 16 }
  0x9e   : > { %4734 = vmatprep.mubr.msk.bf16.mxu1 %vm4973_vm1, %v4972_v2  ;;  %v4314_v38 = vcombine.low %v1819_v26, %v1833_v32 }
  0x9f   : > { %v1879_v45 = vrot.slane %v1877_v34, 4  ;;  %v1882_v46 = vrot.slane %v1880_v35, 5  ;;  %v1916_v18 = vrot.slane %v1914_v13, 5 }
  0xa1   : > { %v1883_v57 = vor.u32 %v1882_v46, %v1879_v45  ;;  %v1917_v20 = vsel %vm5117_vm5, %v1912_v17, %v1916_v18 }
  0xa3   : > { %v1884_v1 = vrot.slane %v1883_v57, 4 }
  0xa4   : > { %4713 = vmatmul.mubr.msk.bf16.gmra.mxu0 %vm422_vm2, %v4928_v33  ;;  %v1855_v33 = vor.u32 %v1854_v23, %v1851_v22 }
  0xa5   : > { %4735 = vmatmul.mubr.msk.bf16.gmra.mxu1 %vm422_vm2, %v4929_v37  ;;  %4716 = vmatprep.mubr.msk.bf16.mxu0 %vm4973_vm1, %v4972_v2  ;;  %v4305_v37 = vld [vmem:[%s5063_s18 + $0x3c] sm:$0x1]  ;;  %v1889_v10 = vsel %vm5117_vm5, %v1884_v1, %v1888_v63 }
  0xa6   : > { %4738 = vmatprep.mubr.msk.bf16.mxu1 %vm4973_vm1, %v4972_v2  ;;  %v1856_v43 = vrot.slane %v1855_v33, 4  ;;  %v1872_v49 = vshll.u32 %v4305_v37, 16 }
  0xa8   : > { %v1861_v56 = vsel %vm5117_vm5, %v1856_v43, %v1860_v44  ;;  %v1874_v60 = vrot.slane %v1872_v49, 5 }
  0xac   : > { %4717 = vmatmul.mubr.msk.bf16.gmra.mxu0 %vm422_vm2, %v4930_v51  ;;  %v1847_v51 = vsel %vm5117_vm5, %v1842_v39, %v1846_v36 }
  0xad   : > { %4739 = vmatmul.mubr.msk.bf16.gmra.mxu1 %vm422_vm2, %v4931_v52  ;;  %4744 = vmatprep.mubr.msk.bf16.mxu0 %vm4973_vm1, %v4972_v2  ;;  %v1869_v52 = vor.u32 %v1868_v42, %v1865_v41  ;;  %v4315_v61 = vcombine.low %v1847_v51, %v1861_v56 }
  0xaf   : > { %v1870_v62 = vrot.slane %v1869_v52, 4 }
  0xb1   : > { %v1875_v8 = vsel %vm5117_vm5, %v1870_v62, %v1874_v60 }
  0xb2   : > { %v4316_v14 = vcombine.low %v1875_v8, %v1889_v10  ;;  %v2098_v10 = vld [vmem:[#allocation2 + $0x4] sm:$0x1] }
  0xb4   : > { %4745 = vmatmul.mubr.msk.bf16.vlgmr.msra.gmra.mxu0 %vm422_vm2, %v4313_v15  ;;  %v1898_v15 = vrot.slane %v1897_v11, 4 }
  0xb5   : > { %4748 = vmatprep.mubr.msk.bf16.mxu0 %vm4973_vm1, %v4972_v2 }
  0xb6   : > { %v1903_v19 = vsel %vm5117_vm5, %v1898_v15, %v1902_v16  ;;  %v2099_v15 = vsel %vm5408_vm10, 0, %v2098_v10 }
  0xb7   : > { %v4317_v21 = vcombine.low %v1903_v19, %v1917_v20  ;;  %2100 = vst [vmem:[#allocation2 + $0x4] sm:$0x1] %v2099_v15  ;;  %v2069_v19 = vld [vmem:[#allocation2 + $0x8] sm:$0x1]  ;;  %v2101_v20 = vld [vmem:[#allocation2 + $0xc] sm:$0x1] }
  0xb8   : > { %v2084_v15 = vld [vmem:[#allocation2 + $0x30] sm:$0x1] }
  0xbc   : > { %4749 = vmatmul.mubr.msk.bf16.gmra.mxu0 %vm422_vm2, %v4314_v38 }
  0xbd   : > { %4752 = vmatprep.mubr.msk.bf16.mxu0 %vm4973_vm1, %v4972_v2 }
  0xc4   : > { %4753 = vmatmul.mubr.msk.bf16.gmra.mxu0 %vm422_vm2, %v4315_v61 }
  0xc5   : > { %4756 = vmatprep.mubr.msk.bf16.mxu0 %vm4973_vm1, %v4972_v2 }
  0xcc   : > { %4757 = vmatmul.mubr.msk.bf16.gmra.mxu0 %vm422_vm2, %v4316_v14 }
  0xcd   : > { %4760 = vmatprep.mubr.msk.bf16.mxu0 %vm4973_vm1, %v4972_v2  ;;  %vm2691_vm1 = vcmask 1046532  }
  0xce   : > { %vm5765_vm3 = vmor %vm2690_vm15, %vm2691_vm1 }
  0xd4   : > { %v476_v22 = vpop.f32.mrf.mxu0  ;;  %4761 = vmatmul.mubr.msk.bf16.gmra.mxu0 %vm422_vm2, %v4317_v21 }
  0xd5   : > { %v592_v23 = vpop.f32.mrf.mxu1 }
  0xd6   : > { %v593_v24 = vadd.f32 %v592_v23, %v476_v22  ;;  %v4570_v25 = vpop.f32.mrf.mxu0  ;;  %v2070_v23 = vsel %vm5400_vm8, 0, %v2069_v19 }
  0xd7   : > { %v4592_v26 = vpop.f32.mrf.mxu1  ;;  %v2102_v25 = vsel %vm5408_vm10, 0, %v2101_v20  ;;  %2071 = vst [vmem:[#allocation2 + $0x8] sm:$0x1] %v2070_v23 }
  0xd8   : > { %v479_v27 = vpop.f32.mrf.mxu0  ;;  %2103 = vst [vmem:[#allocation2 + $0xc] sm:$0x1] %v2102_v25 }
  0xd9   : > { %v595_v28 = vpop.f32.mrf.mxu1 }
  0xda   : > { %v5381_v29 = vadd.f32 %v595_v28, %v479_v27  ;;  %v4571_v30 = vpop.f32.mrf.mxu0 }
  0xdb   : > { %v4593_v2 = vpop.f32.mrf.mxu1  ;;  %v2072_v30 = vld [vmem:[#allocation2 + $0x10] sm:$0x1] }
  0xdc   : > { %v484_v31 = vpop.f32.mrf.mxu0  ;;  %v2104_v2 = vld [vmem:[#allocation2 + $0x14] sm:$0x1] }
  0xdd   : > { %v600_v32 = vpop.f32.mrf.mxu1 }
  0xde   : > { %v5383_v33 = vadd.f32 %v600_v32, %v484_v31  ;;  %v4574_v34 = vpop.f32.mrf.mxu0 }
  0xdf   : > { %v4596_v35 = vpop.f32.mrf.mxu1  ;;  %v2073_v34 = vsel %vm5400_vm8, 0, %v2072_v30 }
  0xe0   : > { %v487_v36 = vpop.f32.mrf.mxu0  ;;  %v2105_v35 = vsel %vm5408_vm10, 0, %v2104_v2  ;;  %2074 = vst [vmem:[#allocation2 + $0x10] sm:$0x1] %v2073_v34 }
  0xe1   : > { %v603_v37 = vpop.f32.mrf.mxu1  ;;  %2106 = vst [vmem:[#allocation2 + $0x14] sm:$0x1] %v2105_v35 }
  0xe2   : > { %v5385_v38 = vadd.f32 %v603_v37, %v487_v36  ;;  %v4575_v39 = vpop.f32.mrf.mxu0 }
  0xe3   : > { %v4597_v40 = vpop.f32.mrf.mxu1 }
  0xe4   : > { %v492_v41 = vpop.f32.mrf.mxu0  ;;  %v2075_v40 = vld [vmem:[#allocation2 + $0x18] sm:$0x1] }
  0xe5   : > { %v608_v42 = vpop.f32.mrf.mxu1 }
  0xe6   : > { %v5387_v43 = vadd.f32 %v608_v42, %v492_v41  ;;  %v4578_v44 = vpop.f32.mrf.mxu0  ;;  %v2107_v41 = vld [vmem:[#allocation2 + $0x1c] sm:$0x1] }
  0xe7   : > { %v4600_v45 = vpop.f32.mrf.mxu1 }
  0xe8   : > { %v495_v46 = vpop.f32.mrf.mxu0  ;;  %v2076_v45 = vsel %vm5400_vm8, 0, %v2075_v40 }
  0xe9   : > { %v611_v47 = vpop.f32.mrf.mxu1  ;;  %2077 = vst [vmem:[#allocation2 + $0x18] sm:$0x1] %v2076_v45 }
  0xea   : > { %v5389_v48 = vadd.f32 %v611_v47, %v495_v46  ;;  %v4579_v49 = vpop.f32.mrf.mxu0  ;;  %v2108_v46 = vsel %vm5408_vm10, 0, %v2107_v41 }
  0xeb   : > { %v4601_v50 = vpop.f32.mrf.mxu1  ;;  %2109 = vst [vmem:[#allocation2 + $0x1c] sm:$0x1] %v2108_v46 }
  0xec   : > { %v500_v51 = vpop.f32.mrf.mxu0 }
  0xed   : > { %v616_v52 = vpop.f32.mrf.mxu1 }
  0xee   : > { %v5391_v54 = vadd.f32 %v616_v52, %v500_v51  ;;  %v4582_v55 = vpop.f32.mrf.mxu0  ;;  %v2078_v51 = vld [vmem:[#allocation2 + $0x20] sm:$0x1]  ;;  %v2110_v52 = vld [vmem:[#allocation2 + $0x24] sm:$0x1] }
  0xef   : > { %v4604_v56 = vpop.f32.mrf.mxu1 }
  0xf0   : > { %v503_v57 = vpop.f32.mrf.mxu0 }
  0xf1   : > { %v619_v58 = vpop.f32.mrf.mxu1 }
  0xf2   : > { %v5393_v59 = vadd.f32 %v619_v58, %v503_v57  ;;  %v4583_v60 = vpop.f32.mrf.mxu0  ;;  %v2079_v57 = vsel %vm5400_vm8, 0, %v2078_v51  ;;  %v2111_v58 = vsel %vm5408_vm10, 0, %v2110_v52 }
  0xf3   : > { %v4605_v61 = vpop.f32.mrf.mxu1  ;;  %2080 = vst [vmem:[#allocation2 + $0x20] sm:$0x1] %v2079_v57  ;;  %2112 = vst [vmem:[#allocation2 + $0x24] sm:$0x1] %v2111_v58 }
  0xf4   : > { %v508_v62 = vpop.f32.mrf.mxu0 }
  0xf5   : > { %v624_v63 = vpop.f32.mrf.mxu1 }
  0xf6   : > { %v5395_v0 = vadd.f32 %v624_v63, %v508_v62  ;;  %v4586_v1 = vpop.f32.mrf.mxu0  ;;  %v2081_v63 = vld [vmem:[#allocation2 + $0x28] sm:$0x1] }
  0xf7   : > { %v4608_v3 = vpop.f32.mrf.mxu1  ;;  %v2113_v1 = vld [vmem:[#allocation2 + $0x2c] sm:$0x1] }
  0xf8   : > { %v511_v4 = vpop.f32.mrf.mxu0  ;;  %v2114_v6 = vsel %vm5408_vm10, 0, %v2113_v1 }
  0xf9   : > { %v627_v5 = vpop.f32.mrf.mxu1  ;;  %2115 = vst [vmem:[#allocation2 + $0x2c] sm:$0x1] %v2114_v6 }
  0xfa   : > { %v5397_v7 = vadd.f32 %v627_v5, %v511_v4  ;;  %v4587_v8 = vpop.f32.mrf.mxu0  ;;  %v2082_v5 = vsel %vm5400_vm8, 0, %v2081_v63 }
  0xfb   : > { %v4609_v11 = vpop.f32.mrf.mxu1  ;;  %2083 = vst [vmem:[#allocation2 + $0x28] sm:$0x1] %v2082_v5 }
  0xfc   : > { %v863_v14 = vpop.f32.mrf.mxu0 }
  0xfd   : > { %v902_v16 = vadd.f32 %v863_v14, %v593_v24  ;;  %v1005_v17 = vpop.f32.mrf.mxu1 }
  0xfe   : > { %v4614_v18 = vpop.f32.mrf.mxu0 }
  0xff   : > { %v5414_v21 = vadd.f32 %v1005_v17, %v902_v16  ;;  %v4636_v22 = vpop.f32.mrf.mxu1  ;;  %v2116_v16 = vld [vmem:[#allocation2 + $0x34] sm:$0x1] }
 0x100   : > { %v866_v26 = vpop.f32.mrf.mxu0  ;;  %v2117_v19 = vsel %vm5408_vm10, 0, %v2116_v16 }
 0x101   : > { %v903_v27 = vadd.f32 %v866_v26, %v5381_v29  ;;  %v1008_v24 = vpop.f32.mrf.mxu1  ;;  %2118 = vst [vmem:[#allocation2 + $0x34] sm:$0x1] %v2117_v19  ;;  %v2087_v26 = vld [vmem:[#allocation2 + $0x38] sm:$0x1] }
 0x102   : > { %v4615_v28 = vpop.f32.mrf.mxu0  ;;  %v2088_v30 = vsel %vm5400_vm8, 0, %v2087_v26 }
 0x103   : > { %v5421_v31 = vadd.f32 %v1008_v24, %v903_v27  ;;  %v4637_v32 = vpop.f32.mrf.mxu1  ;;  %v2119_v27 = vld [vmem:[#allocation2 + $0x3c] sm:$0x1]  ;;  %2089 = vst [vmem:[#allocation2 + $0x38] sm:$0x1] %v2088_v30 }
 0x104   : > { %v871_v36 = vpop.f32.mrf.mxu0  ;;  %v2120_v2 = vsel %vm5408_vm10, 0, %v2119_v27  ;;  %v5509_v27 = vld [vmem:[%s6154_s3 + $0x14] sm:$0xf] }
 0x105   : > { %v904_v37 = vadd.f32 %v871_v36, %v5383_v33  ;;  %v1013_v39 = vpop.f32.mrf.mxu1  ;;  %2121 = vst [vmem:[#allocation2 + $0x3c] sm:$0x1] %v2120_v2 }
 0x106   : > { %v4618_v29 = vpop.f32.mrf.mxu0 }
 0x107   : > { %v5428_v42 = vadd.f32 %v1013_v39, %v904_v37  ;;  %v4640_v44 = vpop.f32.mrf.mxu1  ;;  %v2090_v37 = vld [vmem:[#allocation2 + $0x40] sm:$0x1]  ;;  %v2122_v39 = vld [vmem:[#allocation2 + $0x44] sm:$0x1] }
 0x108   : > { %v874_v47 = vpop.f32.mrf.mxu0  ;;  %v2091_v41 = vsel %vm5400_vm8, 0, %v2090_v37  ;;  %v2123_v44 = vsel %vm5408_vm10, 0, %v2122_v39 }
 0x109   : > { %v905_v49 = vadd.f32 %v874_v47, %v5385_v38  ;;  %v1016_v50 = vpop.f32.mrf.mxu1  ;;  %2092 = vst [vmem:[#allocation2 + $0x40] sm:$0x1] %v2091_v41  ;;  %2124 = vst [vmem:[#allocation2 + $0x44] sm:$0x1] %v2123_v44 }
 0x10a   : > { %v4619_v33 = vpop.f32.mrf.mxu0 }
 0x10b   : > { %v5435_v55 = vadd.f32 %v1016_v50, %v905_v49  ;;  %v4641_v56 = vpop.f32.mrf.mxu1  ;;  %v2093_v49 = vld [vmem:[#allocation2 + $0x48] sm:$0x1]  ;;  %v2125_v50 = vld [vmem:[#allocation2 + $0x4c] sm:$0x1] }
 0x10c   : > { %v879_v60 = vpop.f32.mrf.mxu0  ;;  %v2094_v52 = vsel %vm5400_vm8, 0, %v2093_v49  ;;  %v2126_v56 = vsel %vm5408_vm10, 0, %v2125_v50 }
 0x10d   : > { %v906_v61 = vadd.f32 %v879_v60, %v5387_v43  ;;  %v1021_v62 = vpop.f32.mrf.mxu1  ;;  %v4334_v43 = vld [vmem:[%s6154_s3 + $0x4] sm:$0xf]  ;;  %2095 = vst [vmem:[#allocation2 + $0x48] sm:$0x1] %v2094_v52  ;;  %2127 = vst [vmem:[#allocation2 + $0x4c] sm:$0x1] %v2126_v56 }
 0x10e   : > { %v4622_v38 = vpop.f32.mrf.mxu0  ;;  %4864 = vmatprep.subr.msk.bf16.mxu1 %vm2497_vm11, %v4334_v43  ;;  %v2499_v14 = vsel %vm2497_vm11, %v4334_v43, 0 }
 0x10f   : > { %v5442_v3 = vadd.f32 %v1021_v62, %v906_v61  ;;  %v4644_v4 = vpop.f32.mrf.mxu1  ;;  %4765 = vmatpush3.bf16.msra.mxu1 %v2499_v14  ;;  %v5496_v14 = vld [vmem:[%s6154_s3] sm:$0xf] }
 0x110   : > { %v882_v8 = vpop.f32.mrf.mxu0  ;;  %4865 = vmatprep.subr.msk.bf16.mxu1 %vm2497_vm11, %v5496_v14 }
 0x111   : > { %v907_v10 = vadd.f32 %v882_v8, %v5389_v48  ;;  %v1024_v11 = vpop.f32.mrf.mxu1  ;;  %v2085_v48 = vsel %vm5400_vm8, 0, %v2084_v15 }
 0x112   : > { %v4623_v12 = vpop.f32.mrf.mxu0  ;;  %2086 = vst [vmem:[#allocation2 + $0x30] sm:$0x1] %v2085_v48 }
 0x113   : > { %v5454_v17 = vadd.f32 %v1024_v11, %v907_v10  ;;  %v4645_v18 = vpop.f32.mrf.mxu1 }
 0x114   : > { %v887_v20 = vpop.f32.mrf.mxu0 }
 0x115   : > { %v908_v22 = vadd.f32 %v887_v20, %v5391_v54  ;;  %v1029_v23 = vpop.f32.mrf.mxu1  ;;  %v4368_v54 = vld [vmem:[%s6154_s3 + $0xc] sm:$0xf] }
 0x116   : > { %v4626_v25 = vpop.f32.mrf.mxu0  ;;  %4867 = vmatprep.subr.msk.bf16.mxu0 %vm2497_vm11, %v4368_v54  ;;  %v2871_v61 = vsel %vm2497_vm11, %v4368_v54, 0 }
 0x117   : > { %v5461_v24 = vadd.f32 %v1029_v23, %v908_v22  ;;  %v4648_v28 = vpop.f32.mrf.mxu1  ;;  %4795 = vmatpush3.bf16.msra.mxu0 %v2871_v61 }
 0x118   : > { %v890_v32 = vpop.f32.mrf.mxu0  ;;  %4869 = vmatprep.subr.msk.bf16.mxu0 %vm2497_vm11, %v5509_v27 }
 0x119   : > { %v909_v34 = vadd.f32 %v890_v32, %v5393_v59  ;;  %v1032_v35 = vpop.f32.mrf.mxu1 }
 0x11a   : > { %v4627_v36 = vpop.f32.mrf.mxu0 }
 0x11b   : > { %v5472_v29 = vadd.f32 %v1032_v35, %v909_v34  ;;  %v4649_v40 = vpop.f32.mrf.mxu1 }
 0x11c   : > { %v895_v59 = vpop.f32.mrf.mxu0 }
 0x11d   : > { %v910_v45 = vadd.f32 %v895_v59, %v5395_v0  ;;  %v1037_v46 = vpop.f32.mrf.mxu1 }
 0x11e   : > { %v4630_v47 = vpop.f32.mrf.mxu0 }
 0x11f   : > { %v5479_v33 = vadd.f32 %v1037_v46, %v910_v45  ;;  %v4652_v51 = vpop.f32.mrf.mxu1 }
 0x120   : > { %v898_v57 = vpop.f32.mrf.mxu0 }
 0x121   : > { %v911_v58 = vadd.f32 %v898_v57, %v5397_v7  ;;  %v1040_v60 = vpop.f32.mrf.mxu1 }
 0x122   : > { %v4631_v0 = vpop.f32.mrf.mxu0 }
 0x123   : > { %v1053_v62 = vadd.f32 %v1040_v60, %v911_v58  ;;  %v4653_v38 = vpop.f32.mrf.mxu1 }
 0x124   : > { %v1147_v63 = vpop.f32.mrf.mxu0 }
 0x125   : > { %v1186_v1 = vadd.f32 %v1147_v63, %v5414_v21  ;;  %v1425_v4 = vpop.f32.mrf.mxu1 }
 0x126   : > { %v4658_v5 = vpop.f32.mrf.mxu0 }
 0x127   : > { %v5488_v6 = vadd.f32 %v1425_v4, %v1186_v1  ;;  %v4680_v13 = vpop.f32.mrf.mxu1 }
 0x128   : > { %v1150_v8 = vpop.f32.mrf.mxu0 }
 0x129   : > { %v1187_v10 = vadd.f32 %v1150_v8, %v5421_v31  ;;  %v1428_v11 = vpop.f32.mrf.mxu1 }
 0x12a   : > { %v4659_v7 = vpop.f32.mrf.mxu0 }
 0x12b   : > { %v5491_v43 = vadd.f32 %v1428_v11, %v1187_v10  ;;  %v4681_v12 = vpop.f32.mrf.mxu1 }
 0x12c   : > { %v1155_v15 = vpop.f32.mrf.mxu0 }
 0x12d   : > { %v1188_v21 = vadd.f32 %v1155_v15, %v5428_v42  ;;  %v1433_v16 = vpop.f32.mrf.mxu1 }
 0x12e   : > { %v4662_v18 = vpop.f32.mrf.mxu0 }
 0x12f   : > { %v5501_v48 = vadd.f32 %v1433_v16, %v1188_v21  ;;  %v4684_v31 = vpop.f32.mrf.mxu1 }
 0x130   : > { %v1158_v19 = vpop.f32.mrf.mxu0 }
 0x131   : > { %v1189_v20 = vadd.f32 %v1158_v19, %v5435_v55  ;;  %v1436_v22 = vpop.f32.mrf.mxu1 }
 0x132   : > { %v4663_v23 = vpop.f32.mrf.mxu0 }
 0x133   : > { %v5504_v25 = vadd.f32 %v1436_v22, %v1189_v20  ;;  %v4685_v26 = vpop.f32.mrf.mxu1 }
 0x134   : > { %v1163_v28 = vpop.f32.mrf.mxu0 }
 0x135   : > { %v1190_v42 = vadd.f32 %v1163_v28, %v5442_v3  ;;  %v1441_v30 = vpop.f32.mrf.mxu1 }
 0x136   : > { %v4666_v2 = vpop.f32.mrf.mxu0 }
 0x137   : > { %v5514_v32 = vadd.f32 %v1441_v30, %v1190_v42  ;;  %v4688_v55 = vpop.f32.mrf.mxu1 }
 0x138   : > { %v1166_v34 = vpop.f32.mrf.mxu0 }
 0x139   : > { %v1191_v35 = vadd.f32 %v1166_v34, %v5454_v17  ;;  %v1444_v54 = vpop.f32.mrf.mxu1 }
 0x13a   : > { %v4667_v36 = vpop.f32.mrf.mxu0 }
 0x13b   : > { %v5517_v37 = vadd.f32 %v1444_v54, %v1191_v35  ;;  %v4689_v39 = vpop.f32.mrf.mxu1 }
 0x13c   : > { %v1171_v40 = vpop.f32.mrf.mxu0 }
 0x13d   : > { %v1192_v41 = vadd.f32 %v1171_v40, %v5461_v24  ;;  %v1449_v44 = vpop.f32.mrf.mxu1 }
 0x13e   : > { %v4670_v59 = vpop.f32.mrf.mxu0 }
 0x13f   : > { %v5520_v45 = vadd.f32 %v1449_v44, %v1192_v41  ;;  %v4692_v3 = vpop.f32.mrf.mxu1 }
 0x140   : > { %v1174_v46 = vpop.f32.mrf.mxu0 }
 0x141   : > { %v1193_v47 = vadd.f32 %v1174_v46, %v5472_v29  ;;  %v1452_v49 = vpop.f32.mrf.mxu1 }
 0x142   : > { %v4671_v50 = vpop.f32.mrf.mxu0 }
 0x143   : > { %v5523_v51 = vadd.f32 %v1452_v49, %v1193_v47  ;;  %v4693_v17 = vpop.f32.mrf.mxu1 }
 0x144   : > { %v1179_v52 = vpop.f32.mrf.mxu0 }
 0x145   : > { %v1194_v56 = vadd.f32 %v1179_v52, %v5479_v33  ;;  %v1457_v57 = vpop.f32.mrf.mxu1 }
 0x146   : > { %v4674_v58 = vpop.f32.mrf.mxu0 }
 0x147   : > { %v5526_v60 = vadd.f32 %v1457_v57, %v1194_v56  ;;  %v4696_v24 = vpop.f32.mrf.mxu1 }
 0x148   : > { %v1182_v0 = vpop.f32.mrf.mxu0  ;;  %v5555_v24 = vld [vmem:[%s6153_s2] ss:$0 sm:$0xff] }
 0x149   : > { %v1195_v61 = vadd.f32 %v1182_v0, %v1053_v62  ;;  %v1460_v38 = vpop.f32.mrf.mxu1 }
 0x14a   : > { %v4675_v63 = vpop.f32.mrf.mxu0 }
 0x14b   : > { %v5528_v1 = vadd.f32 %v1460_v38, %v1195_v61  ;;  %v4697_v29 = vpop.f32.mrf.mxu1 }
 0x14c   : > { %v1567_v4 = vpop.f32.mrf.mxu0 }
 0x14d   : > { %v1709_v5 = vpop.f32.mrf.mxu1  ;;  %v1606_v46 = vadd.f32 %v1567_v4, %v5488_v6 }
 0x14e   : > { %v4702_v13 = vpop.f32.mrf.mxu0 }
 0x14f   : > { %v4724_v8 = vpop.f32.mrf.mxu1  ;;  %v1748_v52 = vadd.f32 %v1709_v5, %v1606_v46  ;;  %v5588_v46 = vsel %vm2497_vm11, %v5509_v27, 0 }
 0x150   : > { %v1570_v10 = vpop.f32.mrf.mxu0 }
 0x151   : > { %v1712_v11 = vpop.f32.mrf.mxu1  ;;  %v1607_v56 = vadd.f32 %v1570_v10, %v5491_v43 }
 0x152   : > { %v4703_v7 = vpop.f32.mrf.mxu0 }
 0x153   : > { %v4725_v33 = vpop.f32.mrf.mxu1  ;;  %v1749_v38 = vadd.f32 %v1712_v11, %v1607_v56 }
 0x154   : > { %v1575_v12 = vpop.f32.mrf.mxu0 }
 0x155   : > { %v1717_v15 = vpop.f32.mrf.mxu1  ;;  %v1608_v6 = vadd.f32 %v1575_v12, %v5501_v48  ;;  %v2270_v12 = vld [vmem:[#allocation2] sm:$0xf] }
 0x156   : > { %v4706_v21 = vpop.f32.mrf.mxu0 }
 0x157   : > { %v4728_v16 = vpop.f32.mrf.mxu1  ;;  %v1750_v43 = vadd.f32 %v1717_v15, %v1608_v6  ;;  %v4974_v6 = vmov 0  }
 0x158   : > { %v1578_v18 = vpop.f32.mrf.mxu0 }
 0x159   : > { %v1720_v31 = vpop.f32.mrf.mxu1  ;;  %v1609_v7 = vadd.f32 %v1578_v18, %v5504_v25 }
 0x15a   : > { %v4707_v62 = vpop.f32.mrf.mxu0 }
 0x15b   : > { %v4729_v19 = vpop.f32.mrf.mxu1  ;;  %v2273_v62 = vld [vmem:[#allocation2 + $0x4] sm:$0x1]  ;;  %v1751_v18 = vadd.f32 %v1720_v31, %v1609_v7  ;;  %v5583_v31 = vld [vmem:[%s6154_s3 + $0x8] sm:$0xf] }
 0x15c   : > { %v1583_v20 = vpop.f32.mrf.mxu0  ;;  %v5598_v27 = vsel %vm2497_vm11, %v5583_v31, 0 }
 0x15d   : > { %v5530_v22 = vpop.f32.mrf.mxu1  ;;  %v1610_v48 = vadd.f32 %v1583_v20, %v5514_v32 }
 0x15e   : > { %v4710_v23 = vpop.f32.mrf.mxu0 }
 0x15f   : > { %v4732_v26 = vpop.f32.mrf.mxu1 }
 0x160   : > { %v1586_v28 = vpop.f32.mrf.mxu0 }
 0x161   : > { %v5532_v42 = vpop.f32.mrf.mxu1 }
 0x162   : > { %v4711_v30 = vpop.f32.mrf.mxu0 }
 0x163   : > { %v4733_v2 = vpop.f32.mrf.mxu1  ;;  %v1611_v30 = vadd.f32 %v1586_v28, %v5517_v37  ;;  %v1752_v37 = vadd.f32 %v5530_v22, %v1610_v48  ;;  %v2276_v22 = vld [vmem:[#allocation2 + $0x8] sm:$0xf] }
 0x164   : > { %v5534_v55 = vpop.f32.mrf.mxu0  ;;  %v5578_v2 = vsel %vm2497_vm11, %v5496_v14, 0 }
 0x165   : > { %v5536_v34 = vpop.f32.mrf.mxu1  ;;  %v1753_v56 = vadd.f32 %v5532_v42, %v1611_v30 }
 0x166   : > { %v4714_v35 = vpop.f32.mrf.mxu0 }
 0x167   : > { %v4736_v54 = vpop.f32.mrf.mxu1 }
 0x168   : > { %v5538_v36 = vpop.f32.mrf.mxu0 }
 0x169   : > { %v5540_v39 = vpop.f32.mrf.mxu1 }
 0x16a   : > { %v4715_v40 = vpop.f32.mrf.mxu0 }
 0x16b   : > { %v4737_v41 = vpop.f32.mrf.mxu1 }
 0x16c   : > { %v5542_v44 = vpop.f32.mrf.mxu0 }
 0x16d   : > { %v5544_v59 = vpop.f32.mrf.mxu1 }
 0x16e   : > { %v4718_v3 = vpop.f32.mrf.mxu0 }
 0x16f   : > { %v4740_v47 = vpop.f32.mrf.mxu1 }
 0x170   : > { %v5547_v49 = vpop.f32.mrf.mxu0 }
 0x171   : > { %v5549_v50 = vpop.f32.mrf.mxu1 }
 0x172   : > { %v4719_v17 = vpop.f32.mrf.mxu0 }
 0x173   : > { %v4741_v57 = vpop.f32.mrf.mxu1 }
 0x174   : > { %v1987_v58 = vpop.f32.mrf.mxu0  ;;  %v2279_v57 = vld [vmem:[#allocation2 + $0xc] sm:$0x1] }
 0x175   : > { %v2026_v0 = vadd.f32 %v1987_v58, %v1748_v52 }
 0x176   : > { %v4746_v61 = vpop.f32.mrf.mxu0 }
 0x177   : > { %v2043_v63 = vadd.f32 %v5555_v24, %v2026_v0 }
 0x178   : > { %v1990_v29 = vpop.f32.mrf.mxu0 }
 0x179   : > { %v2053_v4 = vmax.f32 %v2043_v63, 0.0  ;;  %v2027_v5 = vadd.f32 %v1990_v29, %v1749_v38  ;;  %v1612_v38 = vadd.f32 %v5534_v55, %v5520_v45  ;;  %v1614_v45 = vadd.f32 %v5542_v44, %v5526_v60 }
 0x17a   : > { %v4747_v13 = vpop.f32.mrf.mxu0 }
 0x17b   : > { %v4452_v8 = vpack.c.bf16 %v2053_v4, %v2053_v4  ;;  %v2044_v10 = vadd.f32 %v5555_v24, %v2027_v5  ;;  %v5609_v4 = vld [vmem:[%s6154_s3 + $0x1c] sm:$0xf]  ;;  %v1613_v5 = vadd.f32 %v5538_v36, %v5523_v51 }
 0x17c   : > { %v1995_v33 = vpop.f32.mrf.mxu0 }
 0x17d   : > { %v2169_v21 = vshrl.u32 %v4452_v8, 16  ;;  %v2054_v16 = vmax.f32 %v2044_v10, 0.0  ;;  %v2028_v11 = vadd.f32 %v1995_v33, %v1750_v43  ;;  %v2172_v23 = vshll.u32 %v4452_v8, 16  ;;  %v5618_v8 = vld [vmem:[%s6154_s3 + $0x10] sm:$0xf] }
 0x17e   : > { %v4750_v19 = vpop.f32.mrf.mxu0  ;;  %v1615_v10 = vadd.f32 %v5547_v49, %v5528_v1  ;;  %v1754_v1 = vadd.f32 %v5536_v34, %v1612_v38  ;;  %v2282_v49 = vld [vmem:[#allocation2 + $0x10] sm:$0xf] }
 0x17f   : > { %v2171_v15 = vrot.slane %v2169_v21, 7  ;;  %v4453_v26 = vpack.c.bf16 %v2054_v16, %v2054_v16  ;;  %v2045_v25 = vadd.f32 %v5555_v24, %v2028_v11  ;;  %v5629_v16 = vsel %vm2497_vm11, %v5609_v4, 0  ;;  %v2285_v11 = vld [vmem:[#allocation2 + $0x14] sm:$0x1] }
 0x180   : > { %v1998_v20 = vpop.f32.mrf.mxu0  ;;  %v1755_v19 = vadd.f32 %v5540_v39, %v1613_v5  ;;  %v5641_v30 = vadd.f32 %v5549_v50, %v1615_v10 }
 0x181   : > { %v2174_v35 = vor.u32 %v2172_v23, %v2171_v15  ;;  %v2175_v54 = vrot.slane %v2171_v15, 4  ;;  %v2177_v40 = vshrl.u32 %v4453_v26, 16  ;;  %v2055_v28 = vmax.f32 %v2045_v25, 0.0 }
 0x182   : > { %v2029_v41 = vadd.f32 %v1998_v20, %v1751_v18  ;;  %v4751_v3 = vpop.f32.mrf.mxu0  ;;  %v2180_v52 = vshll.u32 %v4453_v26, 16  ;;  %v5638_v18 = vadd.f32 %v5544_v59, %v1614_v45  ;;  %v2291_v59 = vld [vmem:[#allocation2 + $0x1c] sm:$0x1]  ;;  %v2297_v45 = vld [vmem:[#allocation2 + $0x24] sm:$0x1] }
 0x183   : > { %v2271_v14 = vsel %vm5572_vm13, %v2174_v35, %v2270_v12  ;;  %v2274_v47 = vsel %vm5400_vm8, %v2175_v54, %v2273_v62  ;;  %v2179_v17 = vrot.slane %v2177_v40, 7  ;;  %v4454_v58 = vpack.c.bf16 %v2055_v28, %v2055_v28 }
 0x184   : > { %2272 = vst [vmem:[#allocation2] sm:$0xf] %v2271_v14  ;;  %2275 = vst [vmem:[#allocation2 + $0x4] sm:$0x1] %v2274_v47  ;;  %v2046_v0 = vadd.f32 %v5555_v24, %v2029_v41  ;;  %v2003_v61 = vpop.f32.mrf.mxu0  ;;  %v5634_v62 = vsel %vm2497_vm11, %v5618_v8, 0 }
 0x185   : > { %2335 = vst.msk [vmem:[#allocation2] sm:$0xf] %vm2268_vm12, %v4974_v6  ;;  %v2182_v42 = vor.u32 %v2180_v52, %v2179_v17  ;;  %v2183_v63 = vrot.slane %v2179_v17, 4  ;;  %v2030_v29 = vadd.f32 %v2003_v61, %v1752_v37  ;;  %v2185_v55 = vshrl.u32 %v4454_v58, 16  ;;  %v2288_v37 = vld [vmem:[#allocation2 + $0x18] sm:$0xf] }
 0x186   : > { %2337 = vst.msk [vmem:[#allocation2 + $0x4] sm:$0x1] %vm2063_vm6, %v4974_v6  ;;  %v2056_v13 = vmax.f32 %v2046_v0, 0.0  ;;  %v4754_v43 = vpop.f32.mrf.mxu0  ;;  %v2188_v44 = vshll.u32 %v4454_v58, 16  ;;  %v2294_v61 = vld [vmem:[#allocation2 + $0x20] sm:$0xf] }
 0x187   : > { %v2277_v7 = vsel %vm5572_vm13, %v2182_v42, %v2276_v22  ;;  %v2280_v51 = vsel %vm5400_vm8, %v2183_v63, %v2279_v57  ;;  %v2047_v36 = vadd.f32 %v5555_v24, %v2030_v29  ;;  %v2187_v60 = vrot.slane %v2185_v55, 7 }
 0x188   : > { %2278 = vst [vmem:[#allocation2 + $0x8] sm:$0xf] %v2277_v7  ;;  %2281 = vst [vmem:[#allocation2 + $0xc] sm:$0x1] %v2280_v51  ;;  %v4455_v33 = vpack.c.bf16 %v2056_v13, %v2056_v13  ;;  %v2006_v21 = vpop.f32.mrf.mxu0 }
 0x189   : > { %v2057_v48 = vmax.f32 %v2047_v36, 0.0  ;;  %v2031_v12 = vadd.f32 %v2006_v21, %v1753_v56  ;;  %v2190_v15 = vor.u32 %v2188_v44, %v2187_v60  ;;  %v2191_v23 = vrot.slane %v2187_v60, 4  ;;  %v2300_v44 = vld [vmem:[#allocation2 + $0x28] sm:$0xf] }
 0x18a   : > { %v2193_v26 = vshrl.u32 %v4455_v33, 16  ;;  %v4755_v25 = vpop.f32.mrf.mxu0  ;;  %v2196_v40 = vshll.u32 %v4455_v33, 16 }
 0x18b   : > { %v4456_v34 = vpack.c.bf16 %v2057_v48, %v2057_v48  ;;  %v2048_v20 = vadd.f32 %v5555_v24, %v2031_v12  ;;  %v2283_v35 = vsel %vm5572_vm13, %v2190_v15, %v2282_v49  ;;  %v2286_v39 = vsel %vm5400_vm8, %v2191_v23, %v2285_v11  ;;  %v2303_v23 = vld [vmem:[#allocation2 + $0x2c] sm:$0x1]  ;;  %v5672_v25 = vld [vmem:[%s6157_s6] sm:$0x3] }
 0x18c   : > { %v2195_v54 = vrot.slane %v2193_v26, 7  ;;  %v2011_v28 = vpop.f32.mrf.mxu0  ;;  %v5648_v41 = vld [vmem:[#allocation2] sm:$0xf]  ;;  %2284 = vst [vmem:[#allocation2 + $0x10] sm:$0xf] %v2283_v35 }
 0x18d   : > { %2287 = vst [vmem:[#allocation2 + $0x14] sm:$0x1] %v2286_v39  ;;  %v2201_v50 = vshrl.u32 %v4456_v34, 16  ;;  %v2204_v3 = vshll.u32 %v4456_v34, 16  ;;  %v2058_v14 = vmax.f32 %v2048_v20, 0.0  ;;  %v2032_v47 = vadd.f32 %v2011_v28, %v1754_v1 }
 0x18e   : > { %v2198_v17 = vor.u32 %v2196_v40, %v2195_v54  ;;  %v2199_v52 = vrot.slane %v2195_v54, 4  ;;  %v4758_v56 = vpop.f32.mrf.mxu0  ;;  %v5650_v22 = vld [vmem:[#allocation2 + $0x4] sm:$0x1]  ;;  %v2359_v57 = vshrl.u32 %v5648_v41, 16  ;;  %v2362_v58 = vshll.u32 %v5648_v41, 16 }
 0x18f   : > { %v2203_v0 = vrot.slane %v2201_v50, 7  ;;  %v4457_v38 = vpack.c.bf16 %v2058_v14, %v2058_v14  ;;  %v2049_v42 = vadd.f32 %v5555_v24, %v2032_v47  ;;  %v2368_v63 = vshll.u32 %v5650_v22, 16  ;;  %v5660_v13 = vld [vmem:[#allocation2 + $0x8] sm:$0xf] }
 0x190   : > { %v2289_v29 = vsel %vm5572_vm13, %v2198_v17, %v2288_v37  ;;  %v2292_v5 = vsel %vm5400_vm8, %v2199_v52, %v2291_v59  ;;  %v2014_v55 = vpop.f32.mrf.mxu0  ;;  %v2361_v43 = vrot.slane %v2359_v57, 4  ;;  %v2364_v10 = vrot.slane %v2362_v58, 5  ;;  %v5677_v59 = vld [vmem:[#allocation2 + $0xc] sm:$0x1] }
 0x191   : > { %2290 = vst [vmem:[#allocation2 + $0x18] sm:$0xf] %v2289_v29  ;;  %2293 = vst [vmem:[#allocation2 + $0x1c] sm:$0x1] %v2292_v5  ;;  %v2206_v7 = vor.u32 %v2204_v3, %v2203_v0  ;;  %v2207_v51 = vrot.slane %v2203_v0, 4  ;;  %v2209_v36 = vshrl.u32 %v4457_v38, 16  ;;  %v2033_v21 = vadd.f32 %v2014_v55, %v1755_v19 }
 0x192   : > { %v2212_v60 = vshll.u32 %v4457_v38, 16  ;;  %v2059_v33 = vmax.f32 %v2049_v42, 0.0  ;;  %v4759_v1 = vpop.f32.mrf.mxu0  ;;  %v2365_v49 = vor.u32 %v2364_v10, %v2361_v43  ;;  %v5662_v11 = vrot.slane %v2368_v63, 5  ;;  %v2306_v5 = vld [vmem:[#allocation2 + $0x30] sm:$0xf] }
 0x193   : > { %v2295_v48 = vsel %vm5572_vm13, %v2206_v7, %v2294_v61  ;;  %v2298_v12 = vsel %vm5400_vm8, %v2207_v51, %v2297_v45  ;;  %v2211_v15 = vrot.slane %v2209_v36, 7  ;;  %v2373_v26 = vshrl.u32 %v5660_v13, 16  ;;  %v4932_v35 = vld [vmem:[#allocation2 + $0x8] ss:$8 sps:$4 sm:$0xff]   ;;  %v2309_v45 = vld [vmem:[#allocation2 + $0x34] sm:$0x1] }
 0x194   : > { %2296 = vst [vmem:[#allocation2 + $0x20] sm:$0xf] %v2295_v48  ;;  %2299 = vst [vmem:[#allocation2 + $0x24] sm:$0x1] %v2298_v12  ;;  %v4458_v19 = vpack.c.bf16 %v2059_v33, %v2059_v33  ;;  %v2050_v34 = vadd.f32 %v5555_v24, %v2033_v21  ;;  %v2019_v20 = vpop.f32.mrf.mxu0  ;;  %v2366_v39 = vrot.slane %v2365_v49, 4  ;;  %v2376_v54 = vshll.u32 %v5660_v13, 16  ;;  %4796 = vmatprep.mubr.msk.bf16.mxu0 %vm2484_vm14, %v4932_v35 }
 0x195   : > { %v2214_v40 = vor.u32 %v2212_v60, %v2211_v15  ;;  %v2215_v37 = vrot.slane %v2211_v15, 4  ;;  %v2034_v28 = vadd.f32 %v2019_v20, %v5638_v18  ;;  %v2375_v50 = vrot.slane %v2373_v26, 4  ;;  %v5680_v52 = vld [vmem:[#allocation2 + $0x10] sm:$0xf]  ;;  %v2312_v21 = vld [vmem:[#allocation2 + $0x38] sm:$0xf] }
 0x196   : > { %v2217_v3 = vshrl.u32 %v4458_v19, 16  ;;  %v2220_v14 = vshll.u32 %v4458_v19, 16  ;;  %v2060_v47 = vmax.f32 %v2050_v34, 0.0  ;;  %v4762_v17 = vpop.f32.mrf.mxu0  ;;  %v5684_v56 = vsel %vm438_vm0, %v5672_v25, 0  ;;  %v5704_v19 = vld [vmem:[#allocation2 + $0x14] sm:$0x1] }
 0x197   : > { %v2301_v57 = vsel %vm5572_vm13, %v2214_v40, %v2300_v44  ;;  %v2304_v18 = vsel %vm5400_vm8, %v2215_v37, %v2303_v23  ;;  %v2051_v58 = vadd.f32 %v5555_v24, %v2034_v28  ;;  %v2378_v0 = vrot.slane %v2376_v54, 5  ;;  %v2315_v20 = vld [vmem:[#allocation2 + $0x3c] sm:$0x1]  ;;  %v2318_v28 = vld [vmem:[#allocation2 + $0x40] sm:$0xf] }
 0x198   : > { %2302 = vst [vmem:[#allocation2 + $0x28] sm:$0xf] %v2301_v57  ;;  %2305 = vst [vmem:[#allocation2 + $0x2c] sm:$0x1] %v2304_v18  ;;  %v2219_v61 = vrot.slane %v2217_v3, 7  ;;  %v4459_v38 = vpack.c.bf16 %v2060_v47, %v2060_v47  ;;  %v2022_v42 = vpop.f32.mrf.mxu0  ;;  %v2371_v63 = vsel %vm5117_vm5, %v2366_v39, %v5662_v11  ;;  %v2382_v29 = vshll.u32 %v5677_v59, 16 }
 0x199   : > { %v2061_v55 = vmax.f32 %v2051_v58, 0.0  ;;  %v2035_v43 = vadd.f32 %v2022_v42, %v5641_v30  ;;  %v2379_v10 = vor.u32 %v2378_v0, %v2375_v50  ;;  %v2387_v7 = vshrl.u32 %v5680_v52, 16  ;;  %v5702_v26 = vld [vmem:[#allocation2 + $0x18] sm:$0xf]  ;;  %v2321_v0 = vld [vmem:[#allocation2 + $0x44] sm:$0x1] }
 0x19a   : > { %v2222_v51 = vor.u32 %v2220_v14, %v2219_v61  ;;  %v2223_v36 = vrot.slane %v2219_v61, 4  ;;  %v2225_v60 = vshrl.u32 %v4459_v38, 16  ;;  %v2228_v44 = vshll.u32 %v4459_v38, 16  ;;  %v4763_v33 = vpop.f32.mrf.mxu0 }
 0x19b   : > { %v4460_v1 = vpack.c.bf16 %v2061_v55, %v2061_v55  ;;  %v2052_v49 = vadd.f32 %v5555_v24, %v2035_v43  ;;  %v2380_v11 = vrot.slane %v2379_v10, 4  ;;  %v2384_v48 = vrot.slane %v2382_v29, 5  ;;  %v4933_v12 = vld [vmem:[#allocation2 + $0x18] ss:$8 sps:$4 sm:$0xff]   ;;  %v2327_v55 = vld [vmem:[#allocation2 + $0x4c] sm:$0x1] }
 0x19c   : > { %v2307_v15 = vsel %vm5572_vm13, %v2222_v51, %v2306_v5  ;;  %v2310_v30 = vsel %vm5400_vm8, %v2223_v36, %v2309_v45  ;;  %v2227_v23 = vrot.slane %v2225_v60, 7  ;;  %v2389_v34 = vrot.slane %v2387_v7, 4  ;;  %4797 = vmatmul.mubr.msk.bf16.vlgmr.msra.gmra.mxu0 %vm2484_vm14, %v4933_v12  ;;  %v5723_v5 = vld [vmem:[#allocation2 + $0x20] sm:$0xf]  ;;  %v2324_v45 = vld [vmem:[#allocation2 + $0x48] sm:$0xf] }
 0x19d   : > { %2308 = vst [vmem:[#allocation2 + $0x30] sm:$0xf] %v2307_v15  ;;  %2311 = vst [vmem:[#allocation2 + $0x34] sm:$0x1] %v2310_v30  ;;  %v2233_v35 = vshrl.u32 %v4460_v1, 16  ;;  %v2236_v24 = vshll.u32 %v4460_v1, 16  ;;  %v2385_v54 = vsel %vm5117_vm5, %v2380_v11, %v2384_v48  ;;  %4815 = vmatpush3.bf16.msra.mxu0 %v5588_v46 }
 0x19e   : > { %v2062_v39 = vmax.f32 %v2052_v49, 0.0  ;;  %v2230_v40 = vor.u32 %v2228_v44, %v2227_v23  ;;  %v2231_v37 = vrot.slane %v2227_v23, 4  ;;  %v4335_v50 = vcombine.low %v2371_v63, %v2385_v54  ;;  %4871 = vmatprep.subr.msk.bf16.mxu0 %vm2497_vm11, %v5609_v4  ;;  %v5720_v46 = vld [vmem:[#allocation2 + $0x1c] sm:$0x1]  ;;  %v5732_v1 = vld [vmem:[#allocation2 + $0x24] sm:$0x1] }
 0x19f   : > { %v2390_v3 = vshll.u32 %v5680_v52, 16  ;;  %v2235_v14 = vrot.slane %v2233_v35, 7  ;;  %v2396_v17 = vshll.u32 %v5704_v19, 16  ;;  %v2401_v57 = vshrl.u32 %v5702_v26, 16  ;;  %v5738_v35 = vld [vmem:[#allocation2 + $0xc] sm:$0x1] }
 0x1a0   : > { %v4461_v47 = vpack.c.bf16 %v2062_v39, %v2062_v39  ;;  %v2313_v18 = vsel %vm5572_vm13, %v2230_v40, %v2312_v21  ;;  %v2316_v58 = vsel %vm5400_vm8, %v2231_v37, %v2315_v20  ;;  %4766 = vmatprep.mubr.msk.bf16.mxu1 %vm2484_vm14, %v4335_v50  ;;  %v2404_v38 = vshll.u32 %v5702_v26, 16  ;;  %v5730_v21 = vld [vmem:[#allocation2 + $0x28] sm:$0xf] }
 0x1a1   : > { %v2392_v61 = vrot.slane %v2390_v3, 5  ;;  %2314 = vst [vmem:[#allocation2 + $0x38] sm:$0xf] %v2313_v18  ;;  %2317 = vst [vmem:[#allocation2 + $0x3c] sm:$0x1] %v2316_v58  ;;  %v2238_v42 = vor.u32 %v2236_v24, %v2235_v14  ;;  %v2239_v63 = vrot.slane %v2235_v14, 4 }
 0x1a2   : > { %v2241_v29 = vshrl.u32 %v4461_v47, 16  ;;  %v2244_v4 = vshll.u32 %v4461_v47, 16  ;;  %v2398_v10 = vrot.slane %v2396_v17, 5  ;;  %v2403_v7 = vrot.slane %v2401_v57, 4  ;;  %v3176_v37 = vld [vmem:[#allocation2 + $0x8] sm:$0xe] }
 0x1a3   : > { %v2393_v43 = vor.u32 %v2392_v61, %v2389_v34  ;;  %v2406_v51 = vrot.slane %v2404_v38, 5  ;;  %v2319_v36 = vsel %vm5572_vm13, %v2238_v42, %v2318_v28  ;;  %v2322_v60 = vsel %vm5400_vm8, %v2239_v63, %v2321_v0  ;;  %v5735_v34 = vld [vmem:[#allocation2 + $0x2c] sm:$0x1]  ;;  %v5749_v47 = vld [vmem:[#allocation2 + $0x14] sm:$0x1] }
 0x1a4   : > { %v2243_v44 = vrot.slane %v2241_v29, 7  ;;  %v2410_v33 = vshll.u32 %v5720_v46, 16  ;;  %2320 = vst [vmem:[#allocation2 + $0x40] sm:$0xf] %v2319_v36  ;;  %2323 = vst [vmem:[#allocation2 + $0x44] sm:$0x1] %v2322_v60  ;;  %v4343_v36 = vcombine.low %v5648_v41, %v5660_v13 }
 0x1a5   : > { %v2394_v49 = vrot.slane %v2393_v43, 4  ;;  %v2407_v11 = vor.u32 %v2406_v51, %v2403_v7  ;;  %v4934_v48 = vld [vmem:[#allocation2 + $0x28] ss:$8 sps:$4 sm:$0xff]   ;;  %v2415_v12 = vshrl.u32 %v5723_v5, 16  ;;  %v2418_v20 = vshll.u32 %v5723_v5, 16 }
 0x1a6   : > { %v2246_v15 = vor.u32 %v2244_v4, %v2243_v44  ;;  %v2247_v30 = vrot.slane %v2243_v44, 4  ;;  %v2412_v23 = vrot.slane %v2410_v33, 5  ;;  %4800 = vmatprep.mubr.msk.bf16.mxu0 %vm2484_vm14, %v4934_v48  ;;  %v2424_v40 = vshll.u32 %v5732_v1, 16  ;;  %v3177_v17 = vld [vmem:[#allocation2 + $0x10] sm:$0xe] }
 0x1a7   : > { %v2399_v24 = vsel %vm5117_vm5, %v2394_v49, %v2398_v10  ;;  %v2408_v39 = vrot.slane %v2407_v11, 4  ;;  %v2417_v54 = vrot.slane %v2415_v12, 4  ;;  %v2420_v3 = vrot.slane %v2418_v20, 5  ;;  %v5759_v42 = vld [vmem:[#allocation2 + $0x30] sm:$0xf] }
 0x1a8   : > { %v2325_v28 = vsel %vm5572_vm13, %v2246_v15, %v2324_v45  ;;  %v2328_v50 = vsel %vm5400_vm8, %v2247_v30, %v2327_v55  ;;  %v2429_v14 = vshrl.u32 %v5730_v21, 16  ;;  %v2426_v18 = vrot.slane %v2424_v40, 5  ;;  %v5761_v63 = vld [vmem:[#allocation2 + $0x34] sm:$0x1]  ;;  %v5776_v60 = vld [vmem:[#allocation2 + $0x1c] sm:$0x1] }
 0x1a9   : > { %2326 = vst [vmem:[#allocation2 + $0x48] sm:$0xf] %v2325_v28  ;;  %2329 = vst [vmem:[#allocation2 + $0x4c] sm:$0x1] %v2328_v50  ;;  %v2413_v57 = vsel %vm5117_vm5, %v2408_v39, %v2412_v23  ;;  %v2432_v58 = vshll.u32 %v5730_v21, 16  ;;  %v2438_v32 = vshll.u32 %v5735_v34, 16  ;;  %v2421_v0 = vor.u32 %v2420_v3, %v2417_v54 }
 0x1aa   : > { %2339 = vst.msk [vmem:[#allocation2 + $0x48] sm:$0xf] %vm2268_vm12, %v4974_v6  ;;  %v4336_v9 = vcombine.low %v2399_v24, %v2413_v57  ;;  %v2431_v61 = vrot.slane %v2429_v14, 4  ;;  %v4386_v38 = vrot.slane %v3176_v37, 9  ;;  %v3202_v55 = vrot.slane %v5738_v35, 5 }
 0x1ab   : > { %2340 = vst.msk [vmem:[#allocation2 + $0x4c] sm:$0x1] %vm2063_vm6, %v4974_v6  ;;  %v2434_v29 = vrot.slane %v2432_v58, 5  ;;  %v2440_v4 = vrot.slane %v2438_v32, 5  ;;  %v4387_v43 = vrot.slane %v3177_v17, 9  ;;  %v2422_v10 = vrot.slane %v2421_v0, 4 }
 0x1ac   : > { %v5770_v6 = vld [vmem:[#allocation2 + $0x38] sm:$0xf]  ;;  %4767 = vmatmul.mubr.msk.bf16.vlgmr.msra.gmra.mxu1 %vm2484_vm14, %v4336_v9  ;;  %v3206_v51 = vrot.slane %v5749_v47, 5  ;;  %v4344_v44 = vcombine.low %v5680_v52, %v5702_v26  ;;  %v5781_v49 = vld [vmem:[#allocation2 + $0x3c] sm:$0x1]  ;;  %v2443_v11 = vshrl.u32 %v5759_v42, 16  ;;  %v4345_v15 = vcombine.low %v5723_v5, %v5730_v21 }
 0x1ad   : > { %v4935_v7 = vld [vmem:[#allocation2 + $0x38] ss:$8 sps:$4 sm:$0xff]   ;;  %v2435_v33 = vor.u32 %v2434_v29, %v2431_v61  ;;  %4775 = vmatpush3.bf16.msra.mxu1 %v5578_v2  ;;  %v2446_v48 = vshll.u32 %v5759_v42, 16  ;;  %v3203_v30 = vsel %vm5765_vm3, %v4386_v38, %v3202_v55  ;;  %v2452_v2 = vshll.u32 %v5761_v63, 16  ;;  %v5794_v24 = vld [vmem:[#allocation2 + $0x24] sm:$0x1] }
 0x1ae   : > { %v3178_v12 = vld [vmem:[#allocation2 + $0x18] sm:$0xe]  ;;  %4801 = vmatmul.mubr.msk.bf16.gmra.mxu0 %vm2484_vm14, %v4935_v7  ;;  %v3207_v23 = vsel %vm5765_vm3, %v4387_v43, %v3206_v51  ;;  %v2457_v20 = vshrl.u32 %v5770_v6, 16  ;;  %v3179_v39 = vld [vmem:[#allocation2 + $0x20] sm:$0xe]  ;;  %4866 = vmatprep.subr.msk.bf16.mxu1 %vm2497_vm11, %v5583_v31  ;;  %v2445_v37 = vrot.slane %v2443_v11, 4  ;;  %v2427_v14 = vsel %vm5117_vm5, %v2422_v10, %v2426_v18 }
 0x1af   : > { %v2436_v54 = vrot.slane %v2435_v33, 4  ;;  %v4395_v40 = vcombine.low %v3203_v30, %v3207_v23  ;;  %v2448_v28 = vrot.slane %v2446_v48, 5  ;;  %v5798_v50 = vld [vmem:[#allocation2 + $0x2c] sm:$0x1]  ;;  %v3180_v3 = vld [vmem:[#allocation2 + $0x28] sm:$0xe] }
 0x1b0   : > { %v2459_v17 = vrot.slane %v2457_v20, 4  ;;  %v2460_v57 = vshll.u32 %v5770_v6, 16  ;;  %v2466_v58 = vshll.u32 %v5781_v49, 16  ;;  %v5804_v32 = vld [vmem:[#allocation2 + $0x34] sm:$0x1]  ;;  %v4388_v0 = vrot.slane %v3178_v12, 9 }
 0x1b1   : > { %v2441_v31 = vsel %vm5117_vm5, %v2436_v54, %v2440_v4  ;;  %4816 = vmatprep.mubr.msk.bf16.mxu0 %vm2484_vm14, %v4395_v40  ;;  %v2449_v9 = vor.u32 %v2448_v28, %v2445_v37  ;;  %v3210_v61 = vrot.slane %v5776_v60, 5  ;;  %v3181_v38 = vld [vmem:[#allocation2 + $0x30] sm:$0xe]  ;;  %v5810_v29 = vld [vmem:[#allocation2 + $0x3c] sm:$0x1]  ;;  %v2454_v55 = vrot.slane %v2452_v2, 5 }
 0x1b2   : > { %v4337_v18 = vcombine.low %v2427_v14, %v2441_v31  ;;  %v2462_v43 = vrot.slane %v2460_v57, 5  ;;  %v4389_v10 = vrot.slane %v3179_v39, 9  ;;  %v3182_v7 = vld [vmem:[#allocation2 + $0x38] sm:$0xe]  ;;  %v2468_v33 = vrot.slane %v2466_v58, 5 }
 0x1b3   : > { %v2450_v51 = vrot.slane %v2449_v9, 4  ;;  %v3214_v11 = vrot.slane %v5794_v24, 5  ;;  %v4390_v48 = vrot.slane %v3180_v3, 9  ;;  %v5813_v4 = vld [vmem:[#allocation2 + $0x44] sm:$0x1]  ;;  %v3218_v30 = vrot.slane %v5798_v50, 5 }
 0x1b4   : > { %4770 = vmatprep.mubr.msk.bf16.mxu1 %vm2484_vm14, %v4337_v18  ;;  %v2463_v12 = vor.u32 %v2462_v43, %v2459_v17  ;;  %v4391_v23 = vrot.slane %v3181_v38, 9  ;;  %v3222_v20 = vrot.slane %v5804_v32, 5  ;;  %v3183_v54 = vld [vmem:[#allocation2 + $0x40] sm:$0xe]  ;;  %v3211_v2 = vsel %vm5765_vm3, %v4388_v0, %v3210_v61  ;;  %v3453_v28 = vld [vmem:[#allocation2 + $0x10] sm:$0xf] }
 0x1b5   : > { %v3215_v39 = vsel %vm5765_vm3, %v4389_v10, %v3214_v11  ;;  %v4392_v40 = vrot.slane %v3182_v7, 9  ;;  %v3226_v37 = vrot.slane %v5810_v29, 5  ;;  %v3219_v17 = vsel %vm5765_vm3, %v4390_v48, %v3218_v30  ;;  %v3455_v58 = vld [vmem:[#allocation2 + $0x18] sm:$0xf]  ;;  %v5828_v61 = vld [vmem:[#allocation2 + $0x14] sm:$0x1] }
 0x1b6   : > { %v2464_v3 = vrot.slane %v2463_v12, 4  ;;  %v4396_v14 = vcombine.low %v3211_v2, %v3215_v39  ;;  %v3223_v57 = vsel %vm5765_vm3, %v4391_v23, %v3222_v20  ;;  %v4393_v9 = vrot.slane %v3183_v54, 9  ;;  %v5837_v10 = vld [vmem:[#allocation2 + $0x1c] sm:$0x1]  ;;  %v2666_v48 = vld [vmem:[#allocation2] sm:$0xe] }
 0x1b7   : > { %v4397_v31 = vcombine.low %v3219_v17, %v3223_v57  ;;  %v3230_v0 = vrot.slane %v5813_v4, 5  ;;  %v4346_v38 = vcombine.low %v5759_v42, %v5770_v6  ;;  %v2455_v18 = vsel %vm5117_vm5, %v2450_v51, %v2454_v55  ;;  %v2667_v55 = vld [vmem:[#allocation2 + $0x8] sm:$0xe]  ;;  %v3457_v39 = vld [vmem:[#allocation2 + $0x20] sm:$0xf] }
 0x1b8   : > { %v2469_v43 = vsel %vm5117_vm5, %v2464_v3, %v2468_v33  ;;  %4817 = vmatmul.mubr.msk.bf16.vlgmr.msra.gmra.mxu0 %vm2484_vm14, %v4396_v14  ;;  %v3470_v7 = vshrl.u32 %v3453_v28, 16  ;;  %v3473_v11 = vshll.u32 %v3453_v28, 16  ;;  %v3227_v30 = vsel %vm5765_vm3, %v4392_v40, %v3226_v37  ;;  %v3461_v13 = vld [vmem:[#allocation2 + $0x30] sm:$0xf] }
 0x1b9   : > { %v4338_v12 = vcombine.low %v2455_v18, %v2469_v43  ;;  %4820 = vmatprep.mubr.msk.bf16.mxu0 %vm2484_vm14, %v4397_v31  ;;  %v3484_v23 = vshrl.u32 %v3455_v58, 16  ;;  %v3487_v20 = vshll.u32 %v3455_v58, 16  ;;  %4835 = vmatpush3.bf16.msra.mxu0 %v5629_v16  ;;  %v3231_v51 = vsel %vm5765_vm3, %v4393_v9, %v3230_v0  ;;  %v5856_v58 = vld [vmem:[#allocation2 + $0x24] sm:$0x1]  ;;  %v3459_v9 = vld [vmem:[#allocation2 + $0x28] sm:$0xf] }
 0x1ba   : > { %v3472_v33 = vrot.slane %v3470_v7, 4  ;;  %v3475_v54 = vrot.slane %v3473_v11, 5  ;;  %v3479_v2 = vshll.u32 %v5828_v61, 16  ;;  %4873 = vmatprep.subr.msk.bf16.mxu0 %vm438_vm0, %v5672_v25  ;;  %v3493_v37 = vshll.u32 %v5837_v10, 16  ;;  %v5858_v0 = vld [vmem:[#allocation2 + $0x2c] sm:$0x1] }
 0x1bb   : > { %4771 = vmatmul.mubr.msk.bf16.gmra.mxu1 %vm2484_vm14, %v4338_v12  ;;  %v3486_v28 = vrot.slane %v3484_v23, 4  ;;  %v3489_v40 = vrot.slane %v3487_v20, 5  ;;  %v4351_v3 = vrot.slane %v2666_v48, 9  ;;  %v2695_v14 = vrot.slane %v5650_v22, 5  ;;  %v3463_v23 = vld [vmem:[#allocation2 + $0x38] sm:$0xf] }
 0x1bc   : > { %4776 = vmatprep.mubr.msk.bf16.mxu1 %vm2484_vm14, %v4343_v36  ;;  %v3476_v16 = vor.u32 %v3475_v54, %v3472_v33  ;;  %v4352_v17 = vrot.slane %v2667_v55, 9  ;;  %v2699_v57 = vrot.slane %v5677_v59, 5  ;;  %v4398_v25 = vcombine.low %v3227_v30, %v3231_v51  ;;  %v5868_v59 = vld [vmem:[#allocation2 + $0x34] sm:$0x1]  ;;  %v5874_v54 = vld [vmem:[#allocation2 + $0x3c] sm:$0x1] }
 0x1bd   : > { %v3490_v31 = vor.u32 %v3489_v40, %v3486_v28  ;;  %v3498_v18 = vshrl.u32 %v3457_v39, 16  ;;  %v3501_v43 = vshll.u32 %v3457_v39, 16  ;;  %v3481_v11 = vrot.slane %v3479_v2, 5  ;;  %v2668_v2 = vld [vmem:[#allocation2 + $0x10] sm:$0xe] }
 0x1be   : > { %v3477_v7 = vrot.slane %v3476_v16, 4  ;;  %v5862_v41 = vsel %vm5765_vm3, %v4351_v3, %v2695_v14  ;;  %v5866_v22 = vsel %vm5765_vm3, %v4352_v17, %v2699_v57  ;;  %v3495_v48 = vrot.slane %v3493_v37, 5  ;;  %v2669_v57 = vld [vmem:[#allocation2 + $0x18] sm:$0xe] }
 0x1bf   : > { %v3491_v36 = vrot.slane %v3490_v31, 4  ;;  %v3500_v12 = vrot.slane %v3498_v18, 4  ;;  %v3503_v30 = vrot.slane %v3501_v43, 5  ;;  %v4360_v20 = vcombine.low %v5862_v41, %v5866_v22  ;;  %v5927_v22 = vld [vmem:[#allocation2 + $0x4c] sm:$0x1] }
 0x1c0   : > { %4821 = vmatmul.mubr.msk.bf16.gmra.mxu0 %vm2484_vm14, %v4398_v25  ;;  %v3507_v55 = vshll.u32 %v5856_v58, 16  ;;  %v3512_v51 = vshrl.u32 %v3459_v9, 16  ;;  %v3515_v33 = vshll.u32 %v3459_v9, 16  ;;  %v3521_v40 = vshll.u32 %v5858_v0, 16 }
 0x1c1   : > { %v3496_v39 = vsel %vm5117_vm5, %v3491_v36, %v3495_v48  ;;  %v3504_v28 = vor.u32 %v3503_v30, %v3500_v12  ;;  %v3526_v37 = vshrl.u32 %v3461_v13, 16  ;;  %v3482_v3 = vsel %vm5117_vm5, %v3477_v7, %v3481_v11  ;;  %v2670_v36 = vld [vmem:[#allocation2 + $0x20] sm:$0xe]  ;;  %v2671_v48 = vld [vmem:[#allocation2 + $0x28] sm:$0xe] }
 0x1c2   : > { %v3514_v16 = vrot.slane %v3512_v51, 4  ;;  %v3517_v14 = vrot.slane %v3515_v33, 5  ;;  %v3529_v17 = vshll.u32 %v3461_v13, 16  ;;  %v4413_v25 = vcombine.low %v3482_v3, %v3496_v39 }
 0x1c3   : > { %4777 = vmatmul.mubr.msk.bf16.vlgmr.msra.gmra.mxu1 %vm2484_vm14, %v4344_v44  ;;  %v3505_v31 = vrot.slane %v3504_v28, 4  ;;  %v3528_v9 = vrot.slane %v3526_v37, 4  ;;  %v3535_v18 = vshll.u32 %v5868_v59, 16  ;;  %v3540_v11 = vshrl.u32 %v3463_v23, 16 }
 0x1c4   : > { %4785 = vmatpush3.bf16.msra.mxu1 %v5598_v27  ;;  %4780 = vmatprep.mubr.msk.bf16.mxu1 %vm2484_vm14, %v4345_v15  ;;  %v3518_v43 = vor.u32 %v3517_v14, %v3514_v16  ;;  %v3531_v7 = vrot.slane %v3529_v17, 5  ;;  %v3543_v13 = vshll.u32 %v3463_v23, 16  ;;  %v3509_v52 = vrot.slane %v3507_v55, 5  ;;  %v3467_v14 = vld [vmem:[#allocation2 + $0x48] sm:$0xf] }
 0x1c5   : > { %4836 = vmatprep.mubr.msk.bf16.mxu0 %vm2484_vm14, %v4413_v25  ;;  %v3523_v26 = vrot.slane %v3521_v40, 5  ;;  %v3549_v44 = vshll.u32 %v5874_v54, 16  ;;  %4868 = vmatprep.subr.msk.bf16.mxu1 %vm2497_vm11, %v5618_v8  ;;  %v4353_v27 = vrot.slane %v2668_v2, 9  ;;  %v3542_v21 = vrot.slane %v3540_v11, 4  ;;  %v3465_v2 = vld [vmem:[#allocation2 + $0x40] sm:$0xf] }
 0x1c6   : > { %v3519_v12 = vrot.slane %v3518_v43, 4  ;;  %v3532_v5 = vor.u32 %v3531_v7, %v3528_v9  ;;  %v3545_v15 = vrot.slane %v3543_v13, 5  ;;  %v3510_v30 = vsel %vm5117_vm5, %v3505_v31, %v3509_v52  ;;  %v2672_v7 = vld [vmem:[#allocation2 + $0x30] sm:$0xe]  ;;  %v2673_v52 = vld [vmem:[#allocation2 + $0x38] sm:$0xe] }
 0x1c7   : > { %v2703_v23 = vrot.slane %v5704_v19, 5  ;;  %v4354_v51 = vrot.slane %v2669_v57, 9  ;;  %v2707_v55 = vrot.slane %v5720_v46, 5  ;;  %v3537_v28 = vrot.slane %v3535_v18, 5 }
 0x1c8   : > { %v3524_v33 = vsel %vm5117_vm5, %v3519_v12, %v3523_v26  ;;  %v3533_v39 = vrot.slane %v3532_v5, 4  ;;  %v3546_v8 = vor.u32 %v3545_v15, %v3542_v21  ;;  %v4355_v3 = vrot.slane %v2670_v36, 9  ;;  %v2946_v26 = vld [vmem:[#allocation2 + $0x8] sm:$0xf] }
 0x1c9   : > { %v4414_v40 = vcombine.low %v3510_v30, %v3524_v33  ;;  %v2708_v37 = vsel %vm5765_vm3, %v4354_v51, %v2707_v55  ;;  %v2711_v16 = vrot.slane %v5732_v1, 5  ;;  %v3551_v19 = vrot.slane %v3549_v44, 5  ;;  %v5914_v1 = vld [vmem:[#allocation2 + $0x44] sm:$0x1] }
 0x1ca   : > { %v3547_v17 = vrot.slane %v3546_v8, 4  ;;  %v2704_v46 = vsel %vm5765_vm3, %v4353_v27, %v2703_v23  ;;  %v4356_v57 = vrot.slane %v2671_v48, 9  ;;  %v3538_v25 = vsel %vm5117_vm5, %v3533_v39, %v3537_v28  ;;  %v2948_v23 = vld [vmem:[#allocation2 + $0x10] sm:$0xf]  ;;  %v5937_v8 = vld [vmem:[%s6154_s3 + $0x18] sm:$0xf] }
 0x1cb   : > { %4781 = vmatmul.mubr.msk.bf16.gmra.mxu1 %vm2484_vm14, %v4346_v38  ;;  %4837 = vmatmul.mubr.msk.bf16.vlgmr.msra.gmra.mxu0 %vm2484_vm14, %v4414_v40  ;;  %v2715_v31 = vrot.slane %v5735_v34, 5  ;;  %v3554_v9 = vshrl.u32 %v3465_v2, 16  ;;  %v3557_v18 = vshll.u32 %v3465_v2, 16  ;;  %v4361_v6 = vcombine.low %v2704_v46, %v2708_v37 }
 0x1cc   : > { %4786 = vmatprep.mubr.msk.bf16.mxu1 %vm2484_vm14, %v4360_v20  ;;  %v3552_v42 = vsel %vm5117_vm5, %v3547_v17, %v3551_v19  ;;  %v3568_v38 = vshrl.u32 %v3467_v14, 16  ;;  %v3571_v43 = vshll.u32 %v3467_v14, 16  ;;  %4855 = vmatpush3.bf16.msra.mxu0 %v5684_v56  ;;  %v2712_v34 = vsel %vm5765_vm3, %v4355_v3, %v2711_v16  ;;  %v2950_v3 = vld [vmem:[#allocation2 + $0x18] sm:$0xf] }
 0x1cd   : > { %v4415_v11 = vcombine.low %v3538_v25, %v3552_v42  ;;  %v3556_v13 = vrot.slane %v3554_v9, 4  ;;  %v3559_v36 = vrot.slane %v3557_v18, 5  ;;  %v2716_v41 = vsel %vm5765_vm3, %v4356_v57, %v2715_v31  ;;  %v2952_v31 = vld [vmem:[#allocation2 + $0x20] sm:$0xf] }
 0x1ce   : > { %v3563_v20 = vshll.u32 %v5914_v1, 16  ;;  %v3570_v44 = vrot.slane %v3568_v38, 4  ;;  %v3573_v27 = vrot.slane %v3571_v43, 5  ;;  %v3577_v48 = vshll.u32 %v5927_v22, 16  ;;  %v4944_v9 = vld [vmem:[%s5566_s26] sm:$0xff]  }
 0x1cf   : > { %4840 = vmatprep.mubr.msk.bf16.mxu0 %vm2484_vm14, %v4415_v11  ;;  %v3560_v56 = vor.u32 %v3559_v36, %v3556_v13  ;;  %v4357_v12 = vrot.slane %v2672_v7, 9  ;;  %v2719_v5 = vrot.slane %v5761_v63, 5  ;;  %v4358_v15 = vrot.slane %v2673_v52, 9  ;;  %v2954_v11 = vld [vmem:[#allocation2 + $0x28] sm:$0xf] }
 0x1d0   : > { %v3574_v21 = vor.u32 %v3573_v27, %v3570_v44  ;;  %v2723_v30 = vrot.slane %v5781_v49, 5  ;;  %v2963_v51 = vshrl.u32 %v2946_v26, 16  ;;  %v4362_v55 = vcombine.low %v2712_v34, %v2716_v41  ;;  %v2956_v44 = vld [vmem:[#allocation2 + $0x30] sm:$0xf] }
 0x1d1   : > { %v3561_v33 = vrot.slane %v3560_v56, 4  ;;  %v3579_v39 = vrot.slane %v3577_v48, 5  ;;  %v2966_v28 = vshll.u32 %v2946_v26, 16  ;;  %v3565_v2 = vrot.slane %v3563_v20, 5 }
 0x1d2   : > { %v3575_v40 = vrot.slane %v3574_v21, 4  ;;  %v2720_v63 = vsel %vm5765_vm3, %v4357_v12, %v2719_v5  ;;  %v2965_v37 = vrot.slane %v2963_v51, 4  ;;  %v2724_v49 = vsel %vm5765_vm3, %v4358_v15, %v2723_v30 }
 0x1d3   : > { %4787 = vmatmul.mubr.msk.bf16.vlgmr.msra.gmra.mxu1 %vm2484_vm14, %v4361_v6  ;;  %v2968_v16 = vrot.slane %v2966_v28, 5  ;;  %v2972_v14 = vshll.u32 %v5738_v35, 16  ;;  %v2977_v17 = vshrl.u32 %v2948_v23, 16  ;;  %v3566_v19 = vsel %vm5117_vm5, %v3561_v33, %v3565_v2  ;;  %v4945_v33 = vld [vmem:[%s5566_s26 + $0x8] sm:$0xff]  }
 0x1d4   : > { %4805 = vmatpush3.bf16.msra.mxu1 %v5634_v62  ;;  %4790 = vmatprep.mubr.msk.bf16.mxu1 %vm2484_vm14, %v4362_v55  ;;  %v3580_v46 = vsel %vm5117_vm5, %v3575_v40, %v3579_v39  ;;  %v2980_v57 = vshll.u32 %v2948_v23, 16  ;;  %v2986_v25 = vshll.u32 %v5749_v47, 16  ;;  %v2991_v62 = vshrl.u32 %v2950_v3, 16  ;;  %v2958_v40 = vld [vmem:[#allocation2 + $0x38] sm:$0xf] }
 0x1d5   : > { %v4416_v18 = vcombine.low %v3566_v19, %v3580_v46  ;;  %v2969_v42 = vor.u32 %v2968_v16, %v2965_v37  ;;  %v2979_v6 = vrot.slane %v2977_v17, 4  ;;  %4870 = vmatprep.subr.msk.bf16.mxu1 %vm2497_vm11, %v5937_v8  ;;  %v4363_v35 = vcombine.low %v2720_v63, %v2724_v49  ;;  %v4946_v63 = vld [vmem:[%s5566_s26 + $0x10] sm:$0xff]  }
 0x1d6   : > { %v2982_v38 = vrot.slane %v2980_v57, 5  ;;  %v2994_v43 = vshll.u32 %v2950_v3, 16  ;;  %v3000_v7 = vshll.u32 %v5776_v60, 16  ;;  %v2993_v13 = vrot.slane %v2991_v62, 4  ;;  %v2960_v57 = vld [vmem:[#allocation2 + $0x40] sm:$0xf] }
 0x1d7   : > { %4841 = vmatmul.mubr.msk.bf16.gmra.mxu0 %vm2484_vm14, %v4416_v18  ;;  %v2970_v34 = vrot.slane %v2969_v42, 4  ;;  %v3005_v47 = vshrl.u32 %v2952_v31, 16  ;;  %v3008_v36 = vshll.u32 %v2952_v31, 16  ;;  %v2974_v52 = vrot.slane %v2972_v14, 5 }
 0x1d8   : > { %v2983_v26 = vor.u32 %v2982_v38, %v2979_v6  ;;  %v2988_v41 = vrot.slane %v2986_v25, 5  ;;  %v2996_v20 = vrot.slane %v2994_v43, 5  ;;  %4856 = vmatprep.mubr.msk.bf16.mxu0 %vm422_vm2, %v4944_v9  ;;  %v3014_v48 = vshll.u32 %v5794_v24, 16 }
 0x1d9   : > { %v3007_v27 = vrot.slane %v3005_v47, 4  ;;  %v3010_v56 = vrot.slane %v3008_v36, 5  ;;  %v3019_v60 = vshrl.u32 %v2954_v11, 16  ;;  %v3002_v21 = vrot.slane %v3000_v7, 5 }
 0x1da   : > { %v2984_v12 = vrot.slane %v2983_v26, 4  ;;  %v2997_v5 = vor.u32 %v2996_v20, %v2993_v13  ;;  %v3022_v15 = vshll.u32 %v2954_v11, 16  ;;  %v2975_v30 = vsel %vm5117_vm5, %v2970_v34, %v2974_v52  ;;  %v4429_v13 = vld [vmem:[%s6154_s3 + $0x20] sm:$0xf]  ;;  %v4947_v52 = vld [vmem:[%s5566_s26 + $0x18] sm:$0xff]  }
 0x1db   : > { %4791 = vmatmul.mubr.msk.bf16.gmra.mxu1 %vm2484_vm14, %v4363_v35  ;;  %v3011_v23 = vor.u32 %v3010_v56, %v3007_v27  ;;  %v3021_v51 = vrot.slane %v3019_v60, 4  ;;  %v3033_v55 = vshrl.u32 %v2956_v44, 16  ;;  %v3036_v2 = vshll.u32 %v2956_v44, 16 }
 0x1dc   : > { %v2989_v39 = vsel %vm5117_vm5, %v2984_v12, %v2988_v41  ;;  %v2998_v28 = vrot.slane %v2997_v5, 4  ;;  %v3024_v24 = vrot.slane %v3022_v15, 5  ;;  %v3016_v49 = vrot.slane %v3014_v48, 5 }
 0x1dd   : > { %v4378_v37 = vcombine.low %v2975_v30, %v2989_v39  ;;  %v3012_v3 = vrot.slane %v3011_v23, 4  ;;  %v3035_v16 = vrot.slane %v3033_v55, 4  ;;  %v3028_v17 = vshll.u32 %v5798_v50, 16  ;;  %v3684_v30 = vld [vmem:[#allocation2 + $0x18] sm:$0xe] }
 0x1de   : > { %v3025_v14 = vor.u32 %v3024_v24, %v3021_v51  ;;  %v3038_v19 = vrot.slane %v3036_v2, 5  ;;  %v3042_v46 = vshll.u32 %v5804_v32, 16  ;;  %v3047_v31 = vshrl.u32 %v2958_v40, 16  ;;  %v4941_v23 = vld [vmem:[#allocation2 + $0x20] ss:$8 sps:$4 sm:$0xff]  }
 0x1df   : > { %4806 = vmatprep.mubr.msk.bf16.mxu1 %vm2484_vm14, %v4378_v37  ;;  %v3017_v25 = vsel %vm5117_vm5, %v3012_v3, %v3016_v49  ;;  %v3050_v9 = vshll.u32 %v2958_v40, 16  ;;  %4857 = vmatmul.mubr.msk.bf16.vlgmr.msra.gmra.mxu0 %vm422_vm2, %v4945_v33  ;;  %v3003_v18 = vsel %vm5117_vm5, %v2998_v28, %v3002_v21  ;;  %v3378_v42 = vsel %vm2497_vm11, %v5937_v8, 0  ;;  %v4942_v55 = vld [vmem:[#allocation2 + $0x30] ss:$8 sps:$4 sm:$0xff]   ;;  %v3686_v40 = vld [vmem:[#allocation2 + $0x28] sm:$0xe] }
 0x1e0   : > { %v3026_v50 = vrot.slane %v3025_v14, 4  ;;  %v3039_v6 = vor.u32 %v3038_v19, %v3035_v16  ;;  %4860 = vmatprep.mubr.msk.bf16.mxu0 %vm422_vm2, %v4946_v63  ;;  %v4379_v32 = vcombine.low %v3003_v18, %v3017_v25  ;;  %v3049_v62 = vrot.slane %v3047_v31, 4  ;;  %v3683_v33 = vld [vmem:[#allocation2 + $0x10] sm:$0xe]  ;;  %v3688_v63 = vld [vmem:[#allocation2 + $0x38] sm:$0xe] }
 0x1e1   : > { %v3052_v35 = vrot.slane %v3050_v9, 5  ;;  %v3061_v38 = vshrl.u32 %v2960_v57, 16  ;;  %v3030_v43 = vrot.slane %v3028_v17, 5  ;;  %v3044_v11 = vrot.slane %v3042_v46, 5  ;;  %v4943_v37 = vld [vmem:[#allocation2 + $0x40] ss:$8 sps:$4 sm:$0xff]  }
 0x1e2   : > { %v3040_v7 = vrot.slane %v3039_v6, 4  ;;  %v3064_v34 = vshll.u32 %v2960_v57, 16  ;;  %v3056_v47 = vshll.u32 %v5810_v29, 16  ;;  %v3070_v44 = vshll.u32 %v5813_v4, 16  ;;  %v4940_v4 = vld [vmem:[#allocation2 + $0x10] ss:$8 sps:$4 sm:$0xff]  }
 0x1e3   : > { %4807 = vmatmul.mubr.msk.bf16.vlgmr.msra.gmra.mxu1 %vm2484_vm14, %v4379_v32  ;;  %v3053_v8 = vor.u32 %v3052_v35, %v3049_v62  ;;  %v3063_v36 = vrot.slane %v3061_v38, 4  ;;  %v3031_v26 = vsel %vm5117_vm5, %v3026_v50, %v3030_v43  ;;  %v3766_v51 = vsel %vm2497_vm11, %v4429_v13, 0  ;;  %v3685_v49 = vld [vmem:[#allocation2 + $0x20] sm:$0xe]  ;;  %v3687_v17 = vld [vmem:[#allocation2 + $0x30] sm:$0xe] }
 0x1e4   : > { %4825 = vmatpush3.bf16.msra.mxu1 %v3378_v42  ;;  %v3045_v41 = vsel %vm5117_vm5, %v3040_v7, %v3044_v11  ;;  %v3066_v20 = vrot.slane %v3064_v34, 5  ;;  %v3058_v29 = vrot.slane %v3056_v47, 5  ;;  %v3072_v12 = vrot.slane %v3070_v44, 5  ;;  %v3690_v18 = vld [vmem:[#allocation2 + $0x48] sm:$0xe] }
 0x1e5   : > { %v4380_v27 = vcombine.low %v3031_v26, %v3045_v41  ;;  %4872 = vmatprep.subr.msk.bf16.mxu1 %vm2497_vm11, %v4429_v13  ;;  %v3054_v56 = vrot.slane %v3053_v8, 4  ;;  %v4422_v39 = vrot.slane %v3684_v30, 9  ;;  %v3713_v28 = vrot.slane %v5837_v10, 5  ;;  %v3689_v6 = vld [vmem:[#allocation2 + $0x40] sm:$0xe] }
 0x1e6   : > { %v3067_v48 = vor.u32 %v3066_v20, %v3063_v36  ;;  %v4421_v53 = vrot.slane %v3683_v33, 9  ;;  %v3709_v24 = vrot.slane %v5828_v61, 5  ;;  %v4424_v14 = vrot.slane %v3686_v40, 9 }
 0x1e7   : > { %4810 = vmatprep.mubr.msk.bf16.mxu1 %vm2484_vm14, %v4380_v27  ;;  %4861 = vmatmul.mubr.msk.bf16.gmra.mxu0 %vm422_vm2, %v4947_v52  ;;  %v3059_v5 = vsel %vm5117_vm5, %v3054_v56, %v3058_v29  ;;  %v3714_v2 = vsel %vm5765_vm3, %v4422_v39, %v3713_v28  ;;  %v3721_v10 = vrot.slane %v5858_v0, 5  ;;  %v4426_v19 = vrot.slane %v3688_v63, 9 }
 0x1e8   : > { %v3068_v60 = vrot.slane %v3067_v48, 4  ;;  %v3710_v3 = vsel %vm5765_vm3, %v4421_v53, %v3709_v24  ;;  %v3729_v61 = vrot.slane %v5874_v54, 5  ;;  %v4423_v46 = vrot.slane %v3685_v49, 9 }
 0x1e9   : > { %v4430_v16 = vcombine.low %v3710_v3, %v3714_v2  ;;  %v3717_v57 = vrot.slane %v5856_v58, 5  ;;  %v4425_v25 = vrot.slane %v3687_v17, 9  ;;  %v3725_v31 = vrot.slane %v5868_v59, 5 }
 0x1ea   : > { %v3073_v21 = vsel %vm5117_vm5, %v3068_v60, %v3072_v12  ;;  %v3722_v9 = vsel %vm5765_vm3, %v4424_v14, %v3721_v10  ;;  %v3730_v0 = vsel %vm5765_vm3, %v4426_v19, %v3729_v61  ;;  %v4428_v58 = vrot.slane %v3690_v18, 9 }
 0x1eb   : > { %v4381_v15 = vcombine.low %v3059_v5, %v3073_v21  ;;  %v3718_v42 = vsel %vm5765_vm3, %v4423_v46, %v3717_v57  ;;  %v3726_v54 = vsel %vm5765_vm3, %v4425_v25, %v3725_v31  ;;  %v3737_v62 = vrot.slane %v5927_v22, 5 }
 0x1ec   : > { %v4431_v50 = vcombine.low %v3718_v42, %v3722_v9  ;;  %v4432_v32 = vcombine.low %v3726_v54, %v3730_v0  ;;  %v4427_v59 = vrot.slane %v3689_v6, 9  ;;  %v3733_v35 = vrot.slane %v5914_v1, 5 }
 0x1ed   : > { %4811 = vmatmul.mubr.msk.bf16.gmra.mxu1 %vm2484_vm14, %v4381_v15  ;;  %v3738_v38 = vsel %vm5765_vm3, %v4428_v58, %v3737_v62 }
 0x1ee   : > { %4826 = vmatprep.mubr.msk.bf16.mxu1 %vm2484_vm14, %v4940_v4  ;;  %v3734_v43 = vsel %vm5765_vm3, %v4427_v59, %v3733_v35 }
 0x1ef   : > { %v4433_v7 = vcombine.low %v3734_v43, %v3738_v38 }
 0x1f5   : > { %4827 = vmatmul.mubr.msk.bf16.vlgmr.msra.gmra.mxu1 %vm2484_vm14, %v4941_v23 }
 0x1f6   : > { %4845 = vmatpush3.bf16.msra.mxu1 %v3766_v51  ;;  %4830 = vmatprep.mubr.msk.bf16.mxu1 %vm2484_vm14, %v4942_v55 }
 0x1fd   : > { %4831 = vmatmul.mubr.msk.bf16.gmra.mxu1 %vm2484_vm14, %v4943_v37 }
 0x1fe   : > { %4846 = vmatprep.mubr.msk.bf16.mxu1 %vm2484_vm14, %v4430_v16 }
 0x205   : > { %4847 = vmatmul.mubr.msk.bf16.vlgmr.msra.gmra.mxu1 %vm2484_vm14, %v4431_v50 }
 0x206   : > { %4850 = vmatprep.mubr.msk.bf16.mxu1 %vm2484_vm14, %v4432_v32 }
 0x20d   : > { %4851 = vmatmul.mubr.msk.bf16.gmra.mxu1 %vm2484_vm14, %v4433_v7 }
 0x25c   : > { %v6029_v11 = vpop.f32.mrf.mxu0 }
 0x25e   : > { %v6031_v34 = vpop.f32.mrf.mxu0 }
 0x260   : > { %v6033_v22 = vpop.f32.mrf.mxu0 }
 0x262   : > { %v6035_v13 = vpop.f32.mrf.mxu0 }
 0x26c   : > { %v4768_v8 = vpop.f32.mrf.mxu1 }
 0x26e   : > { %v6037_v47 = vpop.f32.mrf.mxu0  ;;  %v2535_v1 = vpop.f32.mrf.mxu1 }
 0x270   : > { %v6039_v36 = vpop.f32.mrf.mxu0  ;;  %v4769_v52 = vpop.f32.mrf.mxu1 }
 0x272   : > { %v6041_v45 = vpop.f32.mrf.mxu0  ;;  %v2538_v26 = vpop.f32.mrf.mxu1 }
 0x274   : > { %v6043_v41 = vpop.f32.mrf.mxu0 }
 0x278   : > { %v6045_v27 = vpop.f32.mrf.mxu0 }
 0x27a   : > { %v6047_v48 = vpop.f32.mrf.mxu0 }
 0x27b   : > { %v4772_v20 = vpop.f32.mrf.mxu1 }
 0x27c   : > { %v6051_v12 = vpop.f32.mrf.mxu0 }
 0x27d   : > { %v2551_v44 = vpop.f32.mrf.mxu1 }
 0x27e   : > { %v6053_v15 = vpop.f32.mrf.mxu0 }
 0x27f   : > { %v4773_v56 = vpop.f32.mrf.mxu1 }
 0x280   : > { %v6055_v23 = vpop.f32.mrf.mxu0 }
 0x281   : > { %v6049_v29 = vpop.f32.mrf.mxu1 }
 0x282   : > { %v6057_v33 = vpop.f32.mrf.mxu0 }
 0x283   : > { %v4778_v60 = vpop.f32.mrf.mxu1 }
 0x284   : > { %v6059_v53 = vpop.f32.mrf.mxu0  ;;  %v2644_v50 = vadd.f32 %v4778_v60, %v4768_v8 }
 0x285   : > { %v2635_v5 = vpop.f32.mrf.mxu1  ;;  %6170 = vst [vmem:[#allocation3_spill] sm:$0xff] %v6059_v53 }
 0x286   : > { %v6061_v40 = vpop.f32.mrf.mxu0  ;;  %v2636_v6 = vadd.f32 %v2635_v5, %v2535_v1 }
 0x287   : > { %v4779_v21 = vpop.f32.mrf.mxu1  ;;  %6171 = vst [vmem:[#allocation4_spill] sm:$0xff] %v6061_v40 }
 0x288   : > { %v2647_v59 = vadd.f32 %v4779_v21, %v4769_v52 }
 0x289   : > { %v2638_v4 = vpop.f32.mrf.mxu1 }
 0x28a   : > { %v2639_v43 = vadd.f32 %v2638_v4, %v2538_v26 }
 0x28b   : > { %v4782_v30 = vpop.f32.mrf.mxu1  ;;  %v6063_v3 = vpop.f32.mrf.mxu0 }
 0x28c   : > { %v2660_v60 = vadd.f32 %v4782_v30, %v4772_v20 }
 0x28d   : > { %v2651_v51 = vpop.f32.mrf.mxu1  ;;  %v6065_v14 = vpop.f32.mrf.mxu0 }
 0x28e   : > { %v2652_v1 = vadd.f32 %v2651_v51, %v2551_v44 }
 0x28f   : > { %v4783_v55 = vpop.f32.mrf.mxu1  ;;  %v6067_v19 = vpop.f32.mrf.mxu0 }
 0x290   : > { %v2663_v21 = vadd.f32 %v4783_v55, %v4773_v56 }
 0x291   : > { %v2654_v39 = vpop.f32.mrf.mxu1  ;;  %v6069_v57 = vpop.f32.mrf.mxu0 }
 0x292   : > { %6172 = vst [vmem:[#allocation5_spill] sm:$0xff] %v6069_v57 }
 0x293   : > { %v4788_v28 = vpop.f32.mrf.mxu1 }
 0x294   : > { %v2821_v32 = vadd.f32 %v4788_v28, %v2644_v50 }
 0x295   : > { %v2788_v24 = vpop.f32.mrf.mxu1 }
 0x296   : > { %v2819_v35 = vadd.f32 %v2788_v24, %v2636_v6  ;;  %v2940_v40 = vadd.f32 %v6029_v11, %v2821_v32 }
 0x297   : > { %v4789_v2 = vpop.f32.mrf.mxu1  ;;  %v6071_v31 = vpop.f32.mrf.mxu0 }
 0x298   : > { %6173 = vst [vmem:[#allocation6_spill] sm:$0xff] %v6071_v31  ;;  %v2822_v7 = vadd.f32 %v4789_v2, %v2647_v59  ;;  %v2938_v8 = vadd.f32 %v6031_v34, %v2819_v35  ;;  %v6175_v59 = vld [vmem:[#allocation3_spill] sm:$0xff] }
 0x299   : > { %v2791_v63 = vpop.f32.mrf.mxu1  ;;  %v6073_v18 = vpop.f32.mrf.mxu0 }
 0x29a   : > { %6174 = vst [vmem:[#allocation7_spill] sm:$0xff] %v6073_v18  ;;  %v2820_v53 = vadd.f32 %v2791_v63, %v2639_v43  ;;  %v2941_v52 = vadd.f32 %v6033_v22, %v2822_v7  ;;  %v6176_v43 = vld [vmem:[#allocation5_spill] sm:$0xff] }
 0x29b   : > { %v4792_v37 = vpop.f32.mrf.mxu1  ;;  %v6075_v58 = vpop.f32.mrf.mxu0 }
 0x29c   : > { %v2825_v24 = vadd.f32 %v4792_v37, %v2660_v60  ;;  %v2939_v11 = vadd.f32 %v6035_v13, %v2820_v53  ;;  %v6177_v60 = vld [vmem:[#allocation4_spill] sm:$0xff] }
 0x29d   : > { %v2804_v49 = vpop.f32.mrf.mxu1  ;;  %v6078_v31 = vpop.f32.mrf.mxu0 }
 0x29e   : > { %v2823_v26 = vadd.f32 %v2804_v49, %v2652_v1  ;;  %v2944_v22 = vadd.f32 %v6037_v47, %v2825_v24 }
 0x29f   : > { %v4793_v16 = vpop.f32.mrf.mxu1  ;;  %v4858_v28 = vpop.f32.mrf.mxu0 }
 0x2a0   : > { %v2826_v63 = vadd.f32 %v4793_v16, %v2663_v21  ;;  %v2942_v56 = vadd.f32 %v6039_v36, %v2823_v26  ;;  %v6096_v36 = vld [vmem:[%s6155_s4] ss:$0 sm:$0xff] }
 0x2a1   : > { %v2807_v10 = vpop.f32.mrf.mxu1  ;;  %v3934_v20 = vpop.f32.mrf.mxu0 }
 0x2a3   : > { %v4808_v17 = vpop.f32.mrf.mxu1  ;;  %v4859_v49 = vpop.f32.mrf.mxu0 }
 0x2a4   : > { %v3170_v18 = vadd.f32 %v4808_v17, %v2940_v40  ;;  %v2655_v40 = vadd.f32 %v2654_v39, %v6049_v29  ;;  %v2945_v29 = vadd.f32 %v6041_v45, %v2826_v63 }
 0x2a5   : > { %v3137_v61 = vpop.f32.mrf.mxu1 }
 0x2a6   : > { %v3168_v50 = vadd.f32 %v3137_v61, %v2938_v8  ;;  %v3328_v6 = vadd.f32 %v6045_v27, %v3170_v18  ;;  %v2824_v17 = vadd.f32 %v2807_v10, %v2655_v40 }
 0x2a7   : > { %v4809_v46 = vpop.f32.mrf.mxu1 }
 0x2a8   : > { %v3171_v2 = vadd.f32 %v4809_v46, %v2941_v52  ;;  %v3326_v51 = vadd.f32 %v6047_v48, %v3168_v50  ;;  %v2943_v47 = vadd.f32 %v6043_v41, %v2824_v17 }
 0x2a9   : > { %v3140_v25 = vpop.f32.mrf.mxu1 }
 0x2aa   : > { %v3169_v44 = vadd.f32 %v3140_v25, %v2939_v11  ;;  %v3329_v13 = vadd.f32 %v6051_v12, %v3171_v2  ;;  %v6179_v11 = vld [vmem:[#allocation7_spill] sm:$0xff] }
 0x2ac   : > { %v3327_v61 = vadd.f32 %v6053_v15, %v3169_v44 }
 0x2ad   : > { %v4812_v9 = vpop.f32.mrf.mxu1 }
 0x2ae   : > { %v3174_v53 = vadd.f32 %v4812_v9, %v2944_v22 }
 0x2af   : > { %v3153_v0 = vpop.f32.mrf.mxu1 }
 0x2b0   : > { %v3172_v27 = vadd.f32 %v3153_v0, %v2942_v56  ;;  %v3937_v0 = vpop.f32.mrf.mxu0 }
 0x2b1   : > { %v4813_v42 = vpop.f32.mrf.mxu1 }
 0x2b2   : > { %v3175_v10 = vadd.f32 %v4813_v42, %v2945_v29  ;;  %v3330_v15 = vadd.f32 %v6057_v33, %v3172_v27 }
 0x2b3   : > { %v3156_v54 = vpop.f32.mrf.mxu1 }
 0x2b4   : > { %v3173_v9 = vadd.f32 %v3156_v54, %v2943_v47  ;;  %v3333_v35 = vadd.f32 %v6175_v59, %v3175_v10 }
 0x2b5   : > { %v4828_v62 = vpop.f32.mrf.mxu1 }
 0x2b6   : > { %v3447_v30 = vadd.f32 %v4828_v62, %v3328_v6  ;;  %v3331_v1 = vadd.f32 %v6177_v60, %v3173_v9 }
 0x2b7   : > { %v3414_v38 = vpop.f32.mrf.mxu1 }
 0x2b8   : > { %v3445_v37 = vadd.f32 %v3414_v38, %v3326_v51  ;;  %v3677_v48 = vadd.f32 %v6063_v3, %v3447_v30 }
 0x2b9   : > { %v4829_v57 = vpop.f32.mrf.mxu1 }
 0x2ba   : > { %v3448_v16 = vadd.f32 %v4829_v57, %v3329_v13  ;;  %v3675_v45 = vadd.f32 %v6065_v14, %v3445_v37  ;;  %v3332_v57 = vadd.f32 %v6055_v23, %v3174_v53  ;;  %v4447_v14 = vld [vmem:[%s6158_s7] ss:$0 sm:$0xff] }
 0x2bb   : > { %v3417_v5 = vpop.f32.mrf.mxu1 }
 0x2bc   : > { %v3446_v12 = vadd.f32 %v3417_v5, %v3327_v61  ;;  %v3678_v42 = vadd.f32 %v6067_v19, %v3448_v16  ;;  %v4862_v5 = vpop.f32.mrf.mxu0 }
 0x2bd   : > { %v4832_v4 = vpop.f32.mrf.mxu1 }
 0x2be   : > { %v3451_v32 = vadd.f32 %v4832_v4, %v3332_v57  ;;  %v3676_v7 = vadd.f32 %v6176_v43, %v3446_v12  ;;  %v3950_v30 = vpop.f32.mrf.mxu0 }
 0x2bf   : > { %v3430_v34 = vpop.f32.mrf.mxu1 }
 0x2c0   : > { %v3449_v62 = vadd.f32 %v3430_v34, %v3330_v15  ;;  %v4863_v61 = vpop.f32.mrf.mxu0 }
 0x2c1   : > { %v4833_v55 = vpop.f32.mrf.mxu1 }
 0x2c2   : > { %v3452_v8 = vadd.f32 %v4833_v55, %v3333_v35  ;;  %v3679_v6 = vadd.f32 %v6179_v11, %v3449_v62  ;;  %v3953_v15 = vpop.f32.mrf.mxu0 }
 0x2c3   : > { %v3433_v39 = vpop.f32.mrf.mxu1 }
 0x2c4   : > { %v3450_v26 = vadd.f32 %v3433_v39, %v3331_v1  ;;  %v3682_v17 = vadd.f32 %v6075_v58, %v3452_v8 }
 0x2c5   : > { %v4848_v46 = vpop.f32.mrf.mxu1 }
 0x2c6   : > { %v3835_v25 = vadd.f32 %v4848_v46, %v3677_v48  ;;  %v3680_v27 = vadd.f32 %v6078_v31, %v3450_v26 }
 0x2c7   : > { %v3802_v3 = vpop.f32.mrf.mxu1 }
 0x2c8   : > { %v3850_v41 = vadd.f32 %v6096_v36, %v3835_v25  ;;  %v3833_v18 = vadd.f32 %v3802_v3, %v3675_v45 }
 0x2c9   : > { %v4849_v54 = vpop.f32.mrf.mxu1 }
 0x2ca   : > { %v3967_v23 = vadd.f32 %v4858_v28, %v3850_v41  ;;  %v3848_v33 = vadd.f32 %v6096_v36, %v3833_v18  ;;  %v3836_v38 = vadd.f32 %v4849_v54, %v3678_v42  ;;  %v6178_v28 = vld [vmem:[#allocation6_spill] sm:$0xff] }
 0x2cb   : > { %v3805_v19 = vpop.f32.mrf.mxu1  ;;  %v3681_v4 = vadd.f32 %v6178_v28, %v3451_v32 }
 0x2cc   : > { %v3982_v50 = vadd.f32 %v4447_v14, %v3967_v23  ;;  %v3965_v52 = vadd.f32 %v3934_v20, %v3848_v33  ;;  %v3851_v21 = vadd.f32 %v6096_v36, %v3836_v38  ;;  %v3834_v24 = vadd.f32 %v3805_v19, %v3676_v7 }
 0x2cd   : > { %v4852_v2 = vpop.f32.mrf.mxu1 }
 0x2ce   : > { %v3990_v40 = vmax.f32 %v3982_v50, 0.0  ;;  %v3980_v63 = vadd.f32 %v4447_v14, %v3965_v52  ;;  %v3968_v34 = vadd.f32 %v4859_v49, %v3851_v21  ;;  %v3849_v20 = vadd.f32 %v6096_v36, %v3834_v24 }
 0x2cf   : > { %v3839_v44 = vadd.f32 %v4852_v2, %v3681_v4  ;;  %v3818_v51 = vpop.f32.mrf.mxu1 }
 0x2d0   : > { %3998 = vst.msk [vmem:[%s6115_s27 + $0x10] sm:$0xff] %vm2484_vm14, %v3990_v40  ;;  %v3988_v22 = vmax.f32 %v3980_v63, 0.0  ;;  %v3983_v56 = vadd.f32 %v4447_v14, %v3968_v34  ;;  %v3966_v55 = vadd.f32 %v3937_v0, %v3849_v20  ;;  %v3837_v37 = vadd.f32 %v3818_v51, %v3679_v6 }
 0x2d1   : > { %v3854_v13 = vadd.f32 %v6096_v36, %v3839_v44  ;;  %v4853_v53 = vpop.f32.mrf.mxu1 }
 0x2d2   : > { %3996 = vst.msk [vmem:[%s6115_s27] sm:$0xff] %vm2484_vm14, %v3988_v22  ;;  %v3991_v29 = vmax.f32 %v3983_v56, 0.0  ;;  %v3981_v39 = vadd.f32 %v4447_v14, %v3966_v55  ;;  %v3852_v49 = vadd.f32 %v6096_v36, %v3837_v37  ;;  %v3840_v58 = vadd.f32 %v4853_v53, %v3682_v17 }
 0x2d3   : > { %v3971_v16 = vadd.f32 %v4862_v5, %v3854_v13  ;;  %v3821_v48 = vpop.f32.mrf.mxu1 }
 0x2d4   : > { %3999 = vst.msk [vmem:[%s6115_s27 + $0x18] sm:$0xff] %vm2484_vm14, %v3991_v29  ;;  %v3989_v10 = vmax.f32 %v3981_v39, 0.0  ;;  %v3969_v47 = vadd.f32 %v3950_v30, %v3852_v49  ;;  %v3855_v46 = vadd.f32 %v6096_v36, %v3840_v58  ;;  %v3838_v31 = vadd.f32 %v3821_v48, %v3680_v27 }
 0x2d5   : > { %v3986_v12 = vadd.f32 %v4447_v14, %v3971_v16 }
 0x2d6   : > { %3997 = vst.msk [vmem:[%s6115_s27 + $0x8] sm:$0xff] %vm2484_vm14, %v3989_v10  ;;  %v3984_v25 = vadd.f32 %v4447_v14, %v3969_v47  ;;  %v3972_v45 = vadd.f32 %v4863_v61, %v3855_v46  ;;  %v3853_v9 = vadd.f32 %v6096_v36, %v3838_v31 }
 0x2d7   : > { %v3994_v57 = vmax.f32 %v3986_v12, 0.0 }
 0x2d8   : > { %v3992_v3 = vmax.f32 %v3984_v25, 0.0  ;;  %v3987_v0 = vadd.f32 %v4447_v14, %v3972_v45  ;;  %v3970_v41 = vadd.f32 %v3953_v15, %v3853_v9 }
 0x2d9   : > { %4002 = vst.msk [vmem:[%s6115_s27 + $0x30] sm:$0xff] %vm2484_vm14, %v3994_v57 }
 0x2da   : > { %4000 = vst.msk [vmem:[%s6115_s27 + $0x20] sm:$0xff] %vm2484_vm14, %v3992_v3  ;;  %v3995_v18 = vmax.f32 %v3987_v0, 0.0  ;;  %v3985_v42 = vadd.f32 %v4447_v14, %v3970_v41 }
 0x2dc   : > { %4003 = vst.msk [vmem:[%s6115_s27 + $0x38] sm:$0xff] %vm2484_vm14, %v3995_v18  ;;  %v3993_v32 = vmax.f32 %v3985_v42, 0.0 }
 0x2de   : > { %4001 = vst.msk [vmem:[%s6115_s27 + $0x28] sm:$0xff] %vm2484_vm14, %v3993_v32 }
 0x2df PF: > { %s18_s29 = sadd.s32 1, %s4970_s29   ;;  %s6180_s27 = smov %s4966_s28 }
 0x2e0   : > { %p15_p5 = scmp.ge.s32.totalorder %s18_s29, 4   ;;  %s6181_s28 = smov %s6183_s30 }
 0x2e2   :  { %17 = sbr.rel (!%p15_p5) target bundleno = 2 (0x2), region = 114 }

</bundles_post_ra>
